<compile_context>
chip_gen: v7x
topology: tpu7x:2x2x1
jax: 0.10.0
libtpu: 0.0.40
codegen_flags: <defaults>
</compile_context>

<pallas_src>
import jax
import jax.numpy as jnp
import numpy as np
from jax import lax
from jax.experimental import pallas as pl
from jax.experimental.pallas import tpu as pltpu


def _bilstm_kernel(x2d_ref, wih_all_ref, b_all_ref, whh_f_ref, whh_b_ref,
                   h0_ref, c0_ref, woutf_ref, woutb_ref, bout_ref,
                   out_ref, pxf_scr, pxb_scr, hidf_scr, hidb_scr):
    T, Bp, GH = pxf_scr.shape          # GH = 4 * Hp
    Hp = GH // 4

    # ---- hoisted input projection: one MXU matmul, off the recurrent path ---
    px_all = (jnp.dot(x2d_ref[...], wih_all_ref[...],
                      preferred_element_type=jnp.float32)
              + b_all_ref[...])                        # (T*Bp, 2*GH)
    pxf_scr[...] = px_all[:, :GH].reshape(T, Bp, GH)   # lane-aligned split
    pxb_scr[...] = px_all[:, GH:].reshape(T, Bp, GH)

    whh_f = whh_f_ref[...]
    whh_b = whh_b_ref[...]

    def gates_to_hc(gates, c):
        # PyTorch LSTM gate order: i, f, g, o.  Hp = 128 so every slice is a
        # full-vreg (lane-aligned) extract — no sub-vreg relayout.
        i = jax.nn.sigmoid(gates[:, 0 * Hp:1 * Hp])
        f = jax.nn.sigmoid(gates[:, 1 * Hp:2 * Hp])
        g = jnp.tanh(gates[:, 2 * Hp:3 * Hp])
        o = jax.nn.sigmoid(gates[:, 3 * Hp:4 * Hp])
        c_new = f * c + i * g
        h_new = o * jnp.tanh(c_new)
        return h_new, c_new

    # ---- fused fwd/bwd recurrence: two independent chains per iteration -----
    def body(k, carry):
        hf, cf, hb, cb = carry
        tb = T - 1 - k
        gf = jnp.dot(hf, whh_f, preferred_element_type=jnp.float32) + pxf_scr[k]
        gb = jnp.dot(hb, whh_b, preferred_element_type=jnp.float32) + pxb_scr[tb]
        hf_new, cf_new = gates_to_hc(gf, cf)
        hb_new, cb_new = gates_to_hc(gb, cb)
        hidf_scr[k] = hf_new
        hidb_scr[tb] = hb_new
        return (hf_new, cf_new, hb_new, cb_new)

    lax.fori_loop(0, T, body,
                  (h0_ref[0], c0_ref[0], h0_ref[1], c0_ref[1]),
                  unroll=True)

    # ---- output projection: single 2D lane-dense matmul per direction -------
    hidf = hidf_scr[...].reshape(T * Bp, Hp)
    hidb = hidb_scr[...].reshape(T * Bp, Hp)
    out_ref[...] = (jnp.dot(hidf, woutf_ref[...], preferred_element_type=jnp.float32)
                    + jnp.dot(hidb, woutb_ref[...], preferred_element_type=jnp.float32)
                    + bout_ref[...])


def _round_up(x, m):
    return ((x + m - 1) // m) * m


def _pad_gate_cols(w, H, Hp):
    """Pad a (..., 4H) gate-blocked matrix to (..., 4Hp), zero-padding each of
    the i/f/g/o blocks independently so gate k starts at column k*Hp."""
    lead = w.shape[:-1]
    w4 = w.reshape(lead + (4, H))
    w4 = jnp.pad(w4, [(0, 0)] * len(lead) + [(0, 0), (0, Hp - H)])
    return w4.reshape(lead + (4 * Hp,))


def bilstm_forward(input_ids, params, h0, c0):
    """Pallas BILSTM forward.  input_ids: (B, T) int32 -> (B, T, output_dim) f32."""
    emb = params['embedding']                                 # (V, E)
    B, T = input_ids.shape
    E = emb.shape[1]
    H = params['whh_f'].shape[0]
    O = params['w_out'].shape[1]

    Bp = _round_up(B, 8)       # sublane-aligned batch
    Hp = _round_up(H, 128)     # lane-aligned hidden (exact zero padding)
    Op = _round_up(O, 128)     # lane-dense output store
    GH = 4 * Hp

    # embedding gather + time-major layout + batch padding (wrapper glue)
    x = jnp.take(emb, input_ids, axis=0).astype(jnp.float32)  # (B, T, E)
    x_tbe = jnp.transpose(x, (1, 0, 2))                       # (T, B, E)
    x_tbe = jnp.pad(x_tbe, ((0, 0), (0, Bp - B), (0, 0)))     # (T, Bp, E)
    x2d = x_tbe.reshape(T * Bp, E)                            # (T*Bp, E)

    # gate-padded weights; both directions concatenated for one input matmul
    wih_f = _pad_gate_cols(params['wih_f'], H, Hp)            # (E, GH)
    wih_b = _pad_gate_cols(params['wih_b'], H, Hp)
    b_f = _pad_gate_cols(params['b_f'], H, Hp)                # (1, GH)
    b_b = _pad_gate_cols(params['b_b'], H, Hp)
    wih_all = jnp.concatenate([wih_f, wih_b], axis=1)         # (E, 2*GH)
    b_all = jnp.concatenate([b_f, b_b], axis=1)               # (1, 2*GH)

    whh_f = jnp.pad(_pad_gate_cols(params['whh_f'], H, Hp), ((0, Hp - H), (0, 0)))
    whh_b = jnp.pad(_pad_gate_cols(params['whh_b'], H, Hp), ((0, Hp - H), (0, 0)))

    w_out = params['w_out']                                   # (2H, O)
    woutf = jnp.pad(w_out[:H], ((0, Hp - H), (0, Op - O)))    # (Hp, Op)
    woutb = jnp.pad(w_out[H:], ((0, Hp - H), (0, Op - O)))    # (Hp, Op)
    bout = jnp.pad(params['b_out'], ((0, 0), (0, Op - O)))    # (1, Op)

    h0p = jnp.pad(h0, ((0, 0), (0, Bp - B), (0, Hp - H)))     # (2, Bp, Hp)
    c0p = jnp.pad(c0, ((0, 0), (0, Bp - B), (0, Hp - H)))

    out2d = pl.pallas_call(
        _bilstm_kernel,
        out_shape=jax.ShapeDtypeStruct((T * Bp, Op), jnp.float32),
        in_specs=[pl.BlockSpec(memory_space=pltpu.MemorySpace.VMEM)] * 10,
        out_specs=pl.BlockSpec(memory_space=pltpu.MemorySpace.VMEM),
        scratch_shapes=[pltpu.VMEM((T, Bp, GH), jnp.float32),   # px fwd
                        pltpu.VMEM((T, Bp, GH), jnp.float32),   # px bwd
                        pltpu.VMEM((T, Bp, Hp), jnp.float32),   # hid fwd
                        pltpu.VMEM((T, Bp, Hp), jnp.float32)],  # hid bwd
    )(x2d, wih_all, b_all, whh_f, whh_b, h0p, c0p, woutf, woutb, bout)

    out = out2d.reshape(T, Bp, Op)[:, :B, :O]                 # strip padding
    return jnp.transpose(out, (1, 0, 2))                      # (B, T, O)


# ---------------- pure-JAX reference (matches torch.nn.LSTM semantics) --------
def _lstm_dir_ref(x_tbe, wih, whh, b, h0, c0, H):
    def step(carry, x_t):
        h, c = carry
        gates = (x_t @ wih + h @ whh + b)
        i = jax.nn.sigmoid(gates[:, 0 * H:1 * H])
        f = jax.nn.sigmoid(gates[:, 1 * H:2 * H])
        g = jnp.tanh(gates[:, 2 * H:3 * H])
        o = jax.nn.sigmoid(gates[:, 3 * H:4 * H])
        c_new = f * c + i * g
        h_new = o * jnp.tanh(c_new)
        return (h_new, c_new), h_new
    _, hs = lax.scan(step, (h0, c0), x_tbe)
    return hs  # (T, B, H)


def bilstm_reference(input_ids, params, h0, c0):
    emb = params['embedding']
    x = jnp.take(emb, input_ids, axis=0)
    x_tbe = jnp.transpose(x, (1, 0, 2)).astype(jnp.float32)
    H = params['whh_f'].shape[0]
    hs_f = _lstm_dir_ref(x_tbe, params['wih_f'], params['whh_f'], params['b_f'],
                         h0[0], c0[0], H)
    hs_b = _lstm_dir_ref(x_tbe[::-1], params['wih_b'], params['whh_b'], params['b_b'],
                         h0[1], c0[1], H)[::-1]
    hid = jnp.concatenate([hs_f, hs_b], axis=-1)              # (T, B, 2H)
    out = jnp.einsum('tbk,ko->tbo', hid, params['w_out']) + params['b_out'][None, :, :]
    return jnp.transpose(out, (1, 0, 2))


# ---------------- deterministic parameter construction ------------------------
def make_params(key, vocab, embed_dim, hidden, out_dim):
    ks = jax.random.split(key, 12)
    k_scale = 1.0 / np.sqrt(hidden)

    def unif(k, shape):
        return jax.random.uniform(k, shape, jnp.float32, -k_scale, k_scale)

    params = {
        'embedding': jax.random.normal(ks[0], (vocab, embed_dim), jnp.float32),
        # stored transposed vs. PyTorch: (E, 4H) / (H, 4H) so x @ W gives gates
        'wih_f': unif(ks[1], (embed_dim, 4 * hidden)),
        'whh_f': unif(ks[2], (hidden, 4 * hidden)),
        'b_f': unif(ks[3], (1, 4 * hidden)) + unif(ks[4], (1, 4 * hidden)),  # b_ih + b_hh
        'wih_b': unif(ks[5], (embed_dim, 4 * hidden)),
        'whh_b': unif(ks[6], (hidden, 4 * hidden)),
        'b_b': unif(ks[7], (1, 4 * hidden)) + unif(ks[8], (1, 4 * hidden)),
        'w_out': unif(ks[9], (2 * hidden, out_dim)),           # Linear.weight.T
        'b_out': unif(ks[10], (1, out_dim)),
    }
    return params


if __name__ == "__main__":
    B, T = 2, 8                 # batch, max_seq_len
    VOCAB, E = 50, 32           # embed_vocab_size, embed_dim
    H, O = 32, 8                # hidden_units, output_dim

    key = jax.random.PRNGKey(0)
    k_par, k_ids, k_h0, k_c0 = jax.random.split(key, 4)

    params = make_params(k_par, VOCAB, E, H, O)
    input_ids = jax.random.randint(k_ids, (B, T), 0, VOCAB, dtype=jnp.int32)

    # The PyTorch forward draws random h0/c0 each call (torch.randn); here we
    # draw them deterministically from the PRNG and feed them explicitly.
    h0 = jax.random.normal(k_h0, (2, B, H), jnp.float32)
    c0 = jax.random.normal(k_c0, (2, B, H), jnp.float32)

    out = bilstm_forward(input_ids, params, h0, c0)
    out = jax.block_until_ready(out)

    ref = bilstm_reference(input_ids, params, h0, c0)
    np.testing.assert_allclose(np.asarray(out), np.asarray(ref), rtol=2e-3, atol=2e-3)
    assert out.shape == (B, T, O)

    print("KERNEL_OK")
</pallas_src>

<mosaic_0001>
module attributes {stable_mosaic.version = 11 : i64} {
  func.func @_bilstm_kernel(%arg0: memref<64x32xf32, #tpu.memory_space<vmem>>, %arg1: memref<32x1024xf32, #tpu.memory_space<vmem>>, %arg2: memref<1x1024xf32, #tpu.memory_space<vmem>>, %arg3: memref<128x512xf32, #tpu.memory_space<vmem>>, %arg4: memref<128x512xf32, #tpu.memory_space<vmem>>, %arg5: memref<2x8x128xf32, #tpu.memory_space<vmem>>, %arg6: memref<2x8x128xf32, #tpu.memory_space<vmem>>, %arg7: memref<128x128xf32, #tpu.memory_space<vmem>>, %arg8: memref<128x128xf32, #tpu.memory_space<vmem>>, %arg9: memref<1x128xf32, #tpu.memory_space<vmem>>, %arg10: memref<64x128xf32, #tpu.memory_space<vmem>>, %arg11: memref<8x8x512xf32, #tpu.memory_space<vmem>>, %arg12: memref<8x8x512xf32, #tpu.memory_space<vmem>>, %arg13: memref<8x8x128xf32, #tpu.memory_space<vmem>>, %arg14: memref<8x8x128xf32, #tpu.memory_space<vmem>>) attributes {dimension_semantics = [], scalar_prefetch = 0 : i64, scratch_operands = 4 : i64, tpu.core_type = #tpu.core_type<tc>} {
    %c0 = arith.constant 0 : index
    %c0_0 = arith.constant 0 : index
    %0 = vector.load %arg0[%c0, %c0_0] : memref<64x32xf32, #tpu.memory_space<vmem>>, vector<64x32xf32>
    %c0_1 = arith.constant 0 : index
    %c0_2 = arith.constant 0 : index
    %1 = vector.load %arg1[%c0_1, %c0_2] : memref<32x1024xf32, #tpu.memory_space<vmem>>, vector<32x1024xf32>
    %cst = arith.constant dense<0.000000e+00> : vector<64x1024xf32>
    %2 = tpu.matmul %0, %1, %cst {dimension_numbers = #tpu.dot_dimension_numbers<[1], [0], [0], [1], [0, 0, 1, 1], [], []>} : vector<64x32xf32>, vector<32x1024xf32>, vector<64x1024xf32> -> vector<64x1024xf32>
    %c0_3 = arith.constant 0 : index
    %c0_4 = arith.constant 0 : index
    %3 = vector.load %arg2[%c0_3, %c0_4] : memref<1x1024xf32, #tpu.memory_space<vmem>>, vector<1x1024xf32>
    %4 = vector.broadcast %3 : vector<1x1024xf32> to vector<64x1024xf32>
    %5 = arith.addf %2, %4 : vector<64x1024xf32>
    %6 = vector.extract_strided_slice %5 {offsets = [0, 0], sizes = [64, 512], strides = [1, 1]} : vector<64x1024xf32> to vector<64x512xf32>
    %7 = vector.shape_cast %6 : vector<64x512xf32> to vector<8x8x512xf32>
    %c0_5 = arith.constant 0 : index
    %c0_6 = arith.constant 0 : index
    %c0_7 = arith.constant 0 : index
    %8 = vector.load %arg11[%c0_5, %c0_6, %c0_7] : memref<8x8x512xf32, #tpu.memory_space<vmem>>, vector<8x8x512xf32>
    tpu.vector_store %arg11[%c0_5, %c0_6, %c0_7], %7 {strides = array<i32>} : memref<8x8x512xf32, #tpu.memory_space<vmem>>, vector<8x8x512xf32>,
    %9 = vector.extract_strided_slice %5 {offsets = [0, 512], sizes = [64, 512], strides = [1, 1]} : vector<64x1024xf32> to vector<64x512xf32>
    %10 = vector.shape_cast %9 : vector<64x512xf32> to vector<8x8x512xf32>
    %c0_8 = arith.constant 0 : index
    %c0_9 = arith.constant 0 : index
    %c0_10 = arith.constant 0 : index
    %11 = vector.load %arg12[%c0_8, %c0_9, %c0_10] : memref<8x8x512xf32, #tpu.memory_space<vmem>>, vector<8x8x512xf32>
    tpu.vector_store %arg12[%c0_8, %c0_9, %c0_10], %10 {strides = array<i32>} : memref<8x8x512xf32, #tpu.memory_space<vmem>>, vector<8x8x512xf32>,
    %c0_11 = arith.constant 0 : index
    %c0_12 = arith.constant 0 : index
    %12 = vector.load %arg3[%c0_11, %c0_12] : memref<128x512xf32, #tpu.memory_space<vmem>>, vector<128x512xf32>
    %c0_13 = arith.constant 0 : index
    %c0_14 = arith.constant 0 : index
    %13 = vector.load %arg4[%c0_13, %c0_14] : memref<128x512xf32, #tpu.memory_space<vmem>>, vector<128x512xf32>
    %c0_15 = arith.constant 0 : index
    %c0_16 = arith.constant 0 : index
    %c0_17 = arith.constant 0 : index
    %14 = vector.load %arg5[%c0_15, %c0_16, %c0_17] : memref<2x8x128xf32, #tpu.memory_space<vmem>>, vector<1x8x128xf32>
    %15 = vector.shape_cast %14 : vector<1x8x128xf32> to vector<8x128xf32>
    %c0_18 = arith.constant 0 : index
    %c0_19 = arith.constant 0 : index
    %c0_20 = arith.constant 0 : index
    %16 = vector.load %arg6[%c0_18, %c0_19, %c0_20] : memref<2x8x128xf32, #tpu.memory_space<vmem>>, vector<1x8x128xf32>
    %17 = vector.shape_cast %16 : vector<1x8x128xf32> to vector<8x128xf32>
    %c1 = arith.constant 1 : index
    %c0_21 = arith.constant 0 : index
    %c0_22 = arith.constant 0 : index
    %18 = vector.load %arg5[%c1, %c0_21, %c0_22] : memref<2x8x128xf32, #tpu.memory_space<vmem>>, vector<1x8x128xf32>
    %19 = vector.shape_cast %18 : vector<1x8x128xf32> to vector<8x128xf32>
    %c1_23 = arith.constant 1 : index
    %c0_24 = arith.constant 0 : index
    %c0_25 = arith.constant 0 : index
    %20 = vector.load %arg6[%c1_23, %c0_24, %c0_25] : memref<2x8x128xf32, #tpu.memory_space<vmem>>, vector<1x8x128xf32>
    %21 = vector.shape_cast %20 : vector<1x8x128xf32> to vector<8x128xf32>
    %c0_i32 = arith.constant 0 : i32
    %c7_i32 = arith.constant 7 : i32
    %22 = arith.subi %c7_i32, %c0_i32 : i32
    %cst_26 = arith.constant dense<0.000000e+00> : vector<8x512xf32>
    %23 = tpu.matmul %15, %12, %cst_26 {dimension_numbers = #tpu.dot_dimension_numbers<[1], [0], [0], [1], [0, 0, 1, 1], [], []>} : vector<8x128xf32>, vector<128x512xf32>, vector<8x512xf32> -> vector<8x512xf32>
    %24 = arith.index_cast %c0_i32 : i32 to index
    %c0_27 = arith.constant 0 : index
    %c0_28 = arith.constant 0 : index
    %25 = vector.load %arg11[%24, %c0_27, %c0_28] : memref<8x8x512xf32, #tpu.memory_space<vmem>>, vector<1x8x512xf32>
    %26 = vector.shape_cast %25 : vector<1x8x512xf32> to vector<8x512xf32>
    %27 = arith.addf %23, %26 : vector<8x512xf32>
    %cst_29 = arith.constant dense<0.000000e+00> : vector<8x512xf32>
    %28 = tpu.matmul %19, %13, %cst_29 {dimension_numbers = #tpu.dot_dimension_numbers<[1], [0], [0], [1], [0, 0, 1, 1], [], []>} : vector<8x128xf32>, vector<128x512xf32>, vector<8x512xf32> -> vector<8x512xf32>
    %29 = arith.index_cast %22 : i32 to index
    %c0_30 = arith.constant 0 : index
    %c0_31 = arith.constant 0 : index
    %30 = vector.load %arg12[%29, %c0_30, %c0_31] : memref<8x8x512xf32, #tpu.memory_space<vmem>>, vector<1x8x512xf32>
    %31 = vector.shape_cast %30 : vector<1x8x512xf32> to vector<8x512xf32>
    %32 = arith.addf %28, %31 : vector<8x512xf32>
    %33 = vector.extract_strided_slice %27 {offsets = [0, 0], sizes = [8, 128], strides = [1, 1]} : vector<8x512xf32> to vector<8x128xf32>
    %34 = arith.negf %33 : vector<8x128xf32>
    %35 = math.exp %34 : vector<8x128xf32>
    %cst_32 = arith.constant 1.000000e+00 : f32
    %36 = vector.broadcast %cst_32 : f32 to vector<8x128xf32>
    %37 = arith.addf %36, %35 : vector<8x128xf32>
    %38 = arith.divf %36, %37 : vector<8x128xf32>
    %39 = vector.extract_strided_slice %27 {offsets = [0, 128], sizes = [8, 128], strides = [1, 1]} : vector<8x512xf32> to vector<8x128xf32>
    %40 = arith.negf %39 : vector<8x128xf32>
    %41 = math.exp %40 : vector<8x128xf32>
    %cst_33 = arith.constant 1.000000e+00 : f32
    %42 = vector.broadcast %cst_33 : f32 to vector<8x128xf32>
    %43 = arith.addf %42, %41 : vector<8x128xf32>
    %44 = arith.divf %42, %43 : vector<8x128xf32>
    %45 = vector.extract_strided_slice %27 {offsets = [0, 256], sizes = [8, 128], strides = [1, 1]} : vector<8x512xf32> to vector<8x128xf32>
    %46 = math.tanh %45 : vector<8x128xf32>
    %47 = vector.extract_strided_slice %27 {offsets = [0, 384], sizes = [8, 128], strides = [1, 1]} : vector<8x512xf32> to vector<8x128xf32>
    %48 = arith.negf %47 : vector<8x128xf32>
    %49 = math.exp %48 : vector<8x128xf32>
    %cst_34 = arith.constant 1.000000e+00 : f32
    %50 = vector.broadcast %cst_34 : f32 to vector<8x128xf32>
    %51 = arith.addf %50, %49 : vector<8x128xf32>
    %52 = arith.divf %50, %51 : vector<8x128xf32>
    %53 = arith.mulf %44, %17 : vector<8x128xf32>
    %54 = arith.mulf %38, %46 : vector<8x128xf32>
    %55 = arith.addf %53, %54 : vector<8x128xf32>
    %56 = math.tanh %55 : vector<8x128xf32>
    %57 = arith.mulf %52, %56 : vector<8x128xf32>
    %58 = vector.extract_strided_slice %32 {offsets = [0, 0], sizes = [8, 128], strides = [1, 1]} : vector<8x512xf32> to vector<8x128xf32>
    %59 = arith.negf %58 : vector<8x128xf32>
    %60 = math.exp %59 : vector<8x128xf32>
    %cst_35 = arith.constant 1.000000e+00 : f32
    %61 = vector.broadcast %cst_35 : f32 to vector<8x128xf32>
    %62 = arith.addf %61, %60 : vector<8x128xf32>
    %63 = arith.divf %61, %62 : vector<8x128xf32>
    %64 = vector.extract_strided_slice %32 {offsets = [0, 128], sizes = [8, 128], strides = [1, 1]} : vector<8x512xf32> to vector<8x128xf32>
    %65 = arith.negf %64 : vector<8x128xf32>
    %66 = math.exp %65 : vector<8x128xf32>
    %cst_36 = arith.constant 1.000000e+00 : f32
    %67 = vector.broadcast %cst_36 : f32 to vector<8x128xf32>
    %68 = arith.addf %67, %66 : vector<8x128xf32>
    %69 = arith.divf %67, %68 : vector<8x128xf32>
    %70 = vector.extract_strided_slice %32 {offsets = [0, 256], sizes = [8, 128], strides = [1, 1]} : vector<8x512xf32> to vector<8x128xf32>
    %71 = math.tanh %70 : vector<8x128xf32>
    %72 = vector.extract_strided_slice %32 {offsets = [0, 384], sizes = [8, 128], strides = [1, 1]} : vector<8x512xf32> to vector<8x128xf32>
    %73 = arith.negf %72 : vector<8x128xf32>
    %74 = math.exp %73 : vector<8x128xf32>
    %cst_37 = arith.constant 1.000000e+00 : f32
    %75 = vector.broadcast %cst_37 : f32 to vector<8x128xf32>
    %76 = arith.addf %75, %74 : vector<8x128xf32>
    %77 = arith.divf %75, %76 : vector<8x128xf32>
    %78 = arith.mulf %69, %21 : vector<8x128xf32>
    %79 = arith.mulf %63, %71 : vector<8x128xf32>
    %80 = arith.addf %78, %79 : vector<8x128xf32>
    %81 = math.tanh %80 : vector<8x128xf32>
    %82 = arith.mulf %77, %81 : vector<8x128xf32>
    %83 = arith.index_cast %c0_i32 : i32 to index
    %c0_38 = arith.constant 0 : index
    %c0_39 = arith.constant 0 : index
    %84 = vector.load %arg13[%83, %c0_38, %c0_39] : memref<8x8x128xf32, #tpu.memory_space<vmem>>, vector<1x8x128xf32>
    %85 = vector.shape_cast %84 : vector<1x8x128xf32> to vector<8x128xf32>
    %86 = vector.shape_cast %57 : vector<8x128xf32> to vector<1x8x128xf32>
    tpu.vector_store %arg13[%83, %c0_38, %c0_39], %86 {strides = array<i32>} : memref<8x8x128xf32, #tpu.memory_space<vmem>>, vector<1x8x128xf32>,
    %87 = arith.index_cast %22 : i32 to index
    %c0_40 = arith.constant 0 : index
    %c0_41 = arith.constant 0 : index
    %88 = vector.load %arg14[%87, %c0_40, %c0_41] : memref<8x8x128xf32, #tpu.memory_space<vmem>>, vector<1x8x128xf32>
    %89 = vector.shape_cast %88 : vector<1x8x128xf32> to vector<8x128xf32>
    %90 = vector.shape_cast %82 : vector<8x128xf32> to vector<1x8x128xf32>
    tpu.vector_store %arg14[%87, %c0_40, %c0_41], %90 {strides = array<i32>} : memref<8x8x128xf32, #tpu.memory_space<vmem>>, vector<1x8x128xf32>,
    %c1_i32 = arith.constant 1 : i32
    %c7_i32_42 = arith.constant 7 : i32
    %91 = arith.subi %c7_i32_42, %c1_i32 : i32
    %cst_43 = arith.constant dense<0.000000e+00> : vector<8x512xf32>
    %92 = tpu.matmul %57, %12, %cst_43 {dimension_numbers = #tpu.dot_dimension_numbers<[1], [0], [0], [1], [0, 0, 1, 1], [], []>} : vector<8x128xf32>, vector<128x512xf32>, vector<8x512xf32> -> vector<8x512xf32>
    %93 = arith.index_cast %c1_i32 : i32 to index
    %c0_44 = arith.constant 0 : index
    %c0_45 = arith.constant 0 : index
    %94 = vector.load %arg11[%93, %c0_44, %c0_45] : memref<8x8x512xf32, #tpu.memory_space<vmem>>, vector<1x8x512xf32>
    %95 = vector.shape_cast %94 : vector<1x8x512xf32> to vector<8x512xf32>
    %96 = arith.addf %92, %95 : vector<8x512xf32>
    %cst_46 = arith.constant dense<0.000000e+00> : vector<8x512xf32>
    %97 = tpu.matmul %82, %13, %cst_46 {dimension_numbers = #tpu.dot_dimension_numbers<[1], [0], [0], [1], [0, 0, 1, 1], [], []>} : vector<8x128xf32>, vector<128x512xf32>, vector<8x512xf32> -> vector<8x512xf32>
    %98 = arith.index_cast %91 : i32 to index
    %c0_47 = arith.constant 0 : index
    %c0_48 = arith.constant 0 : index
    %99 = vector.load %arg12[%98, %c0_47, %c0_48] : memref<8x8x512xf32, #tpu.memory_space<vmem>>, vector<1x8x512xf32>
    %100 = vector.shape_cast %99 : vector<1x8x512xf32> to vector<8x512xf32>
    %101 = arith.addf %97, %100 : vector<8x512xf32>
    %102 = vector.extract_strided_slice %96 {offsets = [0, 0], sizes = [8, 128], strides = [1, 1]} : vector<8x512xf32> to vector<8x128xf32>
    %103 = arith.negf %102 : vector<8x128xf32>
    %104 = math.exp %103 : vector<8x128xf32>
    %cst_49 = arith.constant 1.000000e+00 : f32
    %105 = vector.broadcast %cst_49 : f32 to vector<8x128xf32>
    %106 = arith.addf %105, %104 : vector<8x128xf32>
    %107 = arith.divf %105, %106 : vector<8x128xf32>
    %108 = vector.extract_strided_slice %96 {offsets = [0, 128], sizes = [8, 128], strides = [1, 1]} : vector<8x512xf32> to vector<8x128xf32>
    %109 = arith.negf %108 : vector<8x128xf32>
    %110 = math.exp %109 : vector<8x128xf32>
    %cst_50 = arith.constant 1.000000e+00 : f32
    %111 = vector.broadcast %cst_50 : f32 to vector<8x128xf32>
    %112 = arith.addf %111, %110 : vector<8x128xf32>
    %113 = arith.divf %111, %112 : vector<8x128xf32>
    %114 = vector.extract_strided_slice %96 {offsets = [0, 256], sizes = [8, 128], strides = [1, 1]} : vector<8x512xf32> to vector<8x128xf32>
    %115 = math.tanh %114 : vector<8x128xf32>
    %116 = vector.extract_strided_slice %96 {offsets = [0, 384], sizes = [8, 128], strides = [1, 1]} : vector<8x512xf32> to vector<8x128xf32>
    %117 = arith.negf %116 : vector<8x128xf32>
    %118 = math.exp %117 : vector<8x128xf32>
    %cst_51 = arith.constant 1.000000e+00 : f32
    %119 = vector.broadcast %cst_51 : f32 to vector<8x128xf32>
    %120 = arith.addf %119, %118 : vector<8x128xf32>
    %121 = arith.divf %119, %120 : vector<8x128xf32>
    %122 = arith.mulf %113, %55 : vector<8x128xf32>
    %123 = arith.mulf %107, %115 : vector<8x128xf32>
    %124 = arith.addf %122, %123 : vector<8x128xf32>
    %125 = math.tanh %124 : vector<8x128xf32>
    %126 = arith.mulf %121, %125 : vector<8x128xf32>
    %127 = vector.extract_strided_slice %101 {offsets = [0, 0], sizes = [8, 128], strides = [1, 1]} : vector<8x512xf32> to vector<8x128xf32>
    %128 = arith.negf %127 : vector<8x128xf32>
    %129 = math.exp %128 : vector<8x128xf32>
    %cst_52 = arith.constant 1.000000e+00 : f32
    %130 = vector.broadcast %cst_52 : f32 to vector<8x128xf32>
    %131 = arith.addf %130, %129 : vector<8x128xf32>
    %132 = arith.divf %130, %131 : vector<8x128xf32>
    %133 = vector.extract_strided_slice %101 {offsets = [0, 128], sizes = [8, 128], strides = [1, 1]} : vector<8x512xf32> to vector<8x128xf32>
    %134 = arith.negf %133 : vector<8x128xf32>
    %135 = math.exp %134 : vector<8x128xf32>
    %cst_53 = arith.constant 1.000000e+00 : f32
    %136 = vector.broadcast %cst_53 : f32 to vector<8x128xf32>
    %137 = arith.addf %136, %135 : vector<8x128xf32>
    %138 = arith.divf %136, %137 : vector<8x128xf32>
    %139 = vector.extract_strided_slice %101 {offsets = [0, 256], sizes = [8, 128], strides = [1, 1]} : vector<8x512xf32> to vector<8x128xf32>
    %140 = math.tanh %139 : vector<8x128xf32>
    %141 = vector.extract_strided_slice %101 {offsets = [0, 384], sizes = [8, 128], strides = [1, 1]} : vector<8x512xf32> to vector<8x128xf32>
    %142 = arith.negf %141 : vector<8x128xf32>
    %143 = math.exp %142 : vector<8x128xf32>
    %cst_54 = arith.constant 1.000000e+00 : f32
    %144 = vector.broadcast %cst_54 : f32 to vector<8x128xf32>
    %145 = arith.addf %144, %143 : vector<8x128xf32>
    %146 = arith.divf %144, %145 : vector<8x128xf32>
    %147 = arith.mulf %138, %80 : vector<8x128xf32>
    %148 = arith.mulf %132, %140 : vector<8x128xf32>
    %149 = arith.addf %147, %148 : vector<8x128xf32>
    %150 = math.tanh %149 : vector<8x128xf32>
    %151 = arith.mulf %146, %150 : vector<8x128xf32>
    %152 = arith.index_cast %c1_i32 : i32 to index
    %c0_55 = arith.constant 0 : index
    %c0_56 = arith.constant 0 : index
    %153 = vector.load %arg13[%152, %c0_55, %c0_56] : memref<8x8x128xf32, #tpu.memory_space<vmem>>, vector<1x8x128xf32>
    %154 = vector.shape_cast %153 : vector<1x8x128xf32> to vector<8x128xf32>
    %155 = vector.shape_cast %126 : vector<8x128xf32> to vector<1x8x128xf32>
    tpu.vector_store %arg13[%152, %c0_55, %c0_56], %155 {strides = array<i32>} : memref<8x8x128xf32, #tpu.memory_space<vmem>>, vector<1x8x128xf32>,
    %156 = arith.index_cast %91 : i32 to index
    %c0_57 = arith.constant 0 : index
    %c0_58 = arith.constant 0 : index
    %157 = vector.load %arg14[%156, %c0_57, %c0_58] : memref<8x8x128xf32, #tpu.memory_space<vmem>>, vector<1x8x128xf32>
    %158 = vector.shape_cast %157 : vector<1x8x128xf32> to vector<8x128xf32>
    %159 = vector.shape_cast %151 : vector<8x128xf32> to vector<1x8x128xf32>
    tpu.vector_store %arg14[%156, %c0_57, %c0_58], %159 {strides = array<i32>} : memref<8x8x128xf32, #tpu.memory_space<vmem>>, vector<1x8x128xf32>,
    %c2_i32 = arith.constant 2 : i32
    %c7_i32_59 = arith.constant 7 : i32
    %160 = arith.subi %c7_i32_59, %c2_i32 : i32
    %cst_60 = arith.constant dense<0.000000e+00> : vector<8x512xf32>
    %161 = tpu.matmul %126, %12, %cst_60 {dimension_numbers = #tpu.dot_dimension_numbers<[1], [0], [0], [1], [0, 0, 1, 1], [], []>} : vector<8x128xf32>, vector<128x512xf32>, vector<8x512xf32> -> vector<8x512xf32>
    %162 = arith.index_cast %c2_i32 : i32 to index
    %c0_61 = arith.constant 0 : index
    %c0_62 = arith.constant 0 : index
    %163 = vector.load %arg11[%162, %c0_61, %c0_62] : memref<8x8x512xf32, #tpu.memory_space<vmem>>, vector<1x8x512xf32>
    %164 = vector.shape_cast %163 : vector<1x8x512xf32> to vector<8x512xf32>
    %165 = arith.addf %161, %164 : vector<8x512xf32>
    %cst_63 = arith.constant dense<0.000000e+00> : vector<8x512xf32>
    %166 = tpu.matmul %151, %13, %cst_63 {dimension_numbers = #tpu.dot_dimension_numbers<[1], [0], [0], [1], [0, 0, 1, 1], [], []>} : vector<8x128xf32>, vector<128x512xf32>, vector<8x512xf32> -> vector<8x512xf32>
    %167 = arith.index_cast %160 : i32 to index
    %c0_64 = arith.constant 0 : index
    %c0_65 = arith.constant 0 : index
    %168 = vector.load %arg12[%167, %c0_64, %c0_65] : memref<8x8x512xf32, #tpu.memory_space<vmem>>, vector<1x8x512xf32>
    %169 = vector.shape_cast %168 : vector<1x8x512xf32> to vector<8x512xf32>
    %170 = arith.addf %166, %169 : vector<8x512xf32>
    %171 = vector.extract_strided_slice %165 {offsets = [0, 0], sizes = [8, 128], strides = [1, 1]} : vector<8x512xf32> to vector<8x128xf32>
    %172 = arith.negf %171 : vector<8x128xf32>
    %173 = math.exp %172 : vector<8x128xf32>
    %cst_66 = arith.constant 1.000000e+00 : f32
    %174 = vector.broadcast %cst_66 : f32 to vector<8x128xf32>
    %175 = arith.addf %174, %173 : vector<8x128xf32>
    %176 = arith.divf %174, %175 : vector<8x128xf32>
    %177 = vector.extract_strided_slice %165 {offsets = [0, 128], sizes = [8, 128], strides = [1, 1]} : vector<8x512xf32> to vector<8x128xf32>
    %178 = arith.negf %177 : vector<8x128xf32>
    %179 = math.exp %178 : vector<8x128xf32>
    %cst_67 = arith.constant 1.000000e+00 : f32
    %180 = vector.broadcast %cst_67 : f32 to vector<8x128xf32>
    %181 = arith.addf %180, %179 : vector<8x128xf32>
    %182 = arith.divf %180, %181 : vector<8x128xf32>
    %183 = vector.extract_strided_slice %165 {offsets = [0, 256], sizes = [8, 128], strides = [1, 1]} : vector<8x512xf32> to vector<8x128xf32>
    %184 = math.tanh %183 : vector<8x128xf32>
    %185 = vector.extract_strided_slice %165 {offsets = [0, 384], sizes = [8, 128], strides = [1, 1]} : vector<8x512xf32> to vector<8x128xf32>
    %186 = arith.negf %185 : vector<8x128xf32>
    %187 = math.exp %186 : vector<8x128xf32>
    %cst_68 = arith.constant 1.000000e+00 : f32
    %188 = vector.broadcast %cst_68 : f32 to vector<8x128xf32>
    %189 = arith.addf %188, %187 : vector<8x128xf32>
    %190 = arith.divf %188, %189 : vector<8x128xf32>
    %191 = arith.mulf %182, %124 : vector<8x128xf32>
    %192 = arith.mulf %176, %184 : vector<8x128xf32>
    %193 = arith.addf %191, %192 : vector<8x128xf32>
    %194 = math.tanh %193 : vector<8x128xf32>
    %195 = arith.mulf %190, %194 : vector<8x128xf32>
    %196 = vector.extract_strided_slice %170 {offsets = [0, 0], sizes = [8, 128], strides = [1, 1]} : vector<8x512xf32> to vector<8x128xf32>
    %197 = arith.negf %196 : vector<8x128xf32>
    %198 = math.exp %197 : vector<8x128xf32>
    %cst_69 = arith.constant 1.000000e+00 : f32
    %199 = vector.broadcast %cst_69 : f32 to vector<8x128xf32>
    %200 = arith.addf %199, %198 : vector<8x128xf32>
    %201 = arith.divf %199, %200 : vector<8x128xf32>
    %202 = vector.extract_strided_slice %170 {offsets = [0, 128], sizes = [8, 128], strides = [1, 1]} : vector<8x512xf32> to vector<8x128xf32>
    %203 = arith.negf %202 : vector<8x128xf32>
    %204 = math.exp %203 : vector<8x128xf32>
    %cst_70 = arith.constant 1.000000e+00 : f32
    %205 = vector.broadcast %cst_70 : f32 to vector<8x128xf32>
    %206 = arith.addf %205, %204 : vector<8x128xf32>
    %207 = arith.divf %205, %206 : vector<8x128xf32>
    %208 = vector.extract_strided_slice %170 {offsets = [0, 256], sizes = [8, 128], strides = [1, 1]} : vector<8x512xf32> to vector<8x128xf32>
    %209 = math.tanh %208 : vector<8x128xf32>
    %210 = vector.extract_strided_slice %170 {offsets = [0, 384], sizes = [8, 128], strides = [1, 1]} : vector<8x512xf32> to vector<8x128xf32>
    %211 = arith.negf %210 : vector<8x128xf32>
    %212 = math.exp %211 : vector<8x128xf32>
    %cst_71 = arith.constant 1.000000e+00 : f32
    %213 = vector.broadcast %cst_71 : f32 to vector<8x128xf32>
    %214 = arith.addf %213, %212 : vector<8x128xf32>
    %215 = arith.divf %213, %214 : vector<8x128xf32>
    %216 = arith.mulf %207, %149 : vector<8x128xf32>
    %217 = arith.mulf %201, %209 : vector<8x128xf32>
    %218 = arith.addf %216, %217 : vector<8x128xf32>
    %219 = math.tanh %218 : vector<8x128xf32>
    %220 = arith.mulf %215, %219 : vector<8x128xf32>
    %221 = arith.index_cast %c2_i32 : i32 to index
    %c0_72 = arith.constant 0 : index
    %c0_73 = arith.constant 0 : index
    %222 = vector.load %arg13[%221, %c0_72, %c0_73] : memref<8x8x128xf32, #tpu.memory_space<vmem>>, vector<1x8x128xf32>
    %223 = vector.shape_cast %222 : vector<1x8x128xf32> to vector<8x128xf32>
    %224 = vector.shape_cast %195 : vector<8x128xf32> to vector<1x8x128xf32>
    tpu.vector_store %arg13[%221, %c0_72, %c0_73], %224 {strides = array<i32>} : memref<8x8x128xf32, #tpu.memory_space<vmem>>, vector<1x8x128xf32>,
    %225 = arith.index_cast %160 : i32 to index
    %c0_74 = arith.constant 0 : index
    %c0_75 = arith.constant 0 : index
    %226 = vector.load %arg14[%225, %c0_74, %c0_75] : memref<8x8x128xf32, #tpu.memory_space<vmem>>, vector<1x8x128xf32>
    %227 = vector.shape_cast %226 : vector<1x8x128xf32> to vector<8x128xf32>
    %228 = vector.shape_cast %220 : vector<8x128xf32> to vector<1x8x128xf32>
    tpu.vector_store %arg14[%225, %c0_74, %c0_75], %228 {strides = array<i32>} : memref<8x8x128xf32, #tpu.memory_space<vmem>>, vector<1x8x128xf32>,
    %c3_i32 = arith.constant 3 : i32
    %c7_i32_76 = arith.constant 7 : i32
    %229 = arith.subi %c7_i32_76, %c3_i32 : i32
    %cst_77 = arith.constant dense<0.000000e+00> : vector<8x512xf32>
    %230 = tpu.matmul %195, %12, %cst_77 {dimension_numbers = #tpu.dot_dimension_numbers<[1], [0], [0], [1], [0, 0, 1, 1], [], []>} : vector<8x128xf32>, vector<128x512xf32>, vector<8x512xf32> -> vector<8x512xf32>
    %231 = arith.index_cast %c3_i32 : i32 to index
    %c0_78 = arith.constant 0 : index
    %c0_79 = arith.constant 0 : index
    %232 = vector.load %arg11[%231, %c0_78, %c0_79] : memref<8x8x512xf32, #tpu.memory_space<vmem>>, vector<1x8x512xf32>
    %233 = vector.shape_cast %232 : vector<1x8x512xf32> to vector<8x512xf32>
    %234 = arith.addf %230, %233 : vector<8x512xf32>
    %cst_80 = arith.constant dense<0.000000e+00> : vector<8x512xf32>
    %235 = tpu.matmul %220, %13, %cst_80 {dimension_numbers = #tpu.dot_dimension_numbers<[1], [0], [0], [1], [0, 0, 1, 1], [], []>} : vector<8x128xf32>, vector<128x512xf32>, vector<8x512xf32> -> vector<8x512xf32>
    %236 = arith.index_cast %229 : i32 to index
    %c0_81 = arith.constant 0 : index
    %c0_82 = arith.constant 0 : index
    %237 = vector.load %arg12[%236, %c0_81, %c0_82] : memref<8x8x512xf32, #tpu.memory_space<vmem>>, vector<1x8x512xf32>
    %238 = vector.shape_cast %237 : vector<1x8x512xf32> to vector<8x512xf32>
    %239 = arith.addf %235, %238 : vector<8x512xf32>
    %240 = vector.extract_strided_slice %234 {offsets = [0, 0], sizes = [8, 128], strides = [1, 1]} : vector<8x512xf32> to vector<8x128xf32>
    %241 = arith.negf %240 : vector<8x128xf32>
    %242 = math.exp %241 : vector<8x128xf32>
    %cst_83 = arith.constant 1.000000e+00 : f32
    %243 = vector.broadcast %cst_83 : f32 to vector<8x128xf32>
    %244 = arith.addf %243, %242 : vector<8x128xf32>
    %245 = arith.divf %243, %244 : vector<8x128xf32>
    %246 = vector.extract_strided_slice %234 {offsets = [0, 128], sizes = [8, 128], strides = [1, 1]} : vector<8x512xf32> to vector<8x128xf32>
    %247 = arith.negf %246 : vector<8x128xf32>
    %248 = math.exp %247 : vector<8x128xf32>
    %cst_84 = arith.constant 1.000000e+00 : f32
    %249 = vector.broadcast %cst_84 : f32 to vector<8x128xf32>
    %250 = arith.addf %249, %248 : vector<8x128xf32>
    %251 = arith.divf %249, %250 : vector<8x128xf32>
    %252 = vector.extract_strided_slice %234 {offsets = [0, 256], sizes = [8, 128], strides = [1, 1]} : vector<8x512xf32> to vector<8x128xf32>
    %253 = math.tanh %252 : vector<8x128xf32>
    %254 = vector.extract_strided_slice %234 {offsets = [0, 384], sizes = [8, 128], strides = [1, 1]} : vector<8x512xf32> to vector<8x128xf32>
    %255 = arith.negf %254 : vector<8x128xf32>
    %256 = math.exp %255 : vector<8x128xf32>
    %cst_85 = arith.constant 1.000000e+00 : f32
    %257 = vector.broadcast %cst_85 : f32 to vector<8x128xf32>
    %258 = arith.addf %257, %256 : vector<8x128xf32>
    %259 = arith.divf %257, %258 : vector<8x128xf32>
    %260 = arith.mulf %251, %193 : vector<8x128xf32>
    %261 = arith.mulf %245, %253 : vector<8x128xf32>
    %262 = arith.addf %260, %261 : vector<8x128xf32>
    %263 = math.tanh %262 : vector<8x128xf32>
    %264 = arith.mulf %259, %263 : vector<8x128xf32>
    %265 = vector.extract_strided_slice %239 {offsets = [0, 0], sizes = [8, 128], strides = [1, 1]} : vector<8x512xf32> to vector<8x128xf32>
    %266 = arith.negf %265 : vector<8x128xf32>
    %267 = math.exp %266 : vector<8x128xf32>
    %cst_86 = arith.constant 1.000000e+00 : f32
    %268 = vector.broadcast %cst_86 : f32 to vector<8x128xf32>
    %269 = arith.addf %268, %267 : vector<8x128xf32>
    %270 = arith.divf %268, %269 : vector<8x128xf32>
    %271 = vector.extract_strided_slice %239 {offsets = [0, 128], sizes = [8, 128], strides = [1, 1]} : vector<8x512xf32> to vector<8x128xf32>
    %272 = arith.negf %271 : vector<8x128xf32>
    %273 = math.exp %272 : vector<8x128xf32>
    %cst_87 = arith.constant 1.000000e+00 : f32
    %274 = vector.broadcast %cst_87 : f32 to vector<8x128xf32>
    %275 = arith.addf %274, %273 : vector<8x128xf32>
    %276 = arith.divf %274, %275 : vector<8x128xf32>
    %277 = vector.extract_strided_slice %239 {offsets = [0, 256], sizes = [8, 128], strides = [1, 1]} : vector<8x512xf32> to vector<8x128xf32>
    %278 = math.tanh %277 : vector<8x128xf32>
    %279 = vector.extract_strided_slice %239 {offsets = [0, 384], sizes = [8, 128], strides = [1, 1]} : vector<8x512xf32> to vector<8x128xf32>
    %280 = arith.negf %279 : vector<8x128xf32>
    %281 = math.exp %280 : vector<8x128xf32>
    %cst_88 = arith.constant 1.000000e+00 : f32
    %282 = vector.broadcast %cst_88 : f32 to vector<8x128xf32>
    %283 = arith.addf %282, %281 : vector<8x128xf32>
    %284 = arith.divf %282, %283 : vector<8x128xf32>
    %285 = arith.mulf %276, %218 : vector<8x128xf32>
    %286 = arith.mulf %270, %278 : vector<8x128xf32>
    %287 = arith.addf %285, %286 : vector<8x128xf32>
    %288 = math.tanh %287 : vector<8x128xf32>
    %289 = arith.mulf %284, %288 : vector<8x128xf32>
    %290 = arith.index_cast %c3_i32 : i32 to index
    %c0_89 = arith.constant 0 : index
    %c0_90 = arith.constant 0 : index
    %291 = vector.load %arg13[%290, %c0_89, %c0_90] : memref<8x8x128xf32, #tpu.memory_space<vmem>>, vector<1x8x128xf32>
    %292 = vector.shape_cast %291 : vector<1x8x128xf32> to vector<8x128xf32>
    %293 = vector.shape_cast %264 : vector<8x128xf32> to vector<1x8x128xf32>
    tpu.vector_store %arg13[%290, %c0_89, %c0_90], %293 {strides = array<i32>} : memref<8x8x128xf32, #tpu.memory_space<vmem>>, vector<1x8x128xf32>,
    %294 = arith.index_cast %229 : i32 to index
    %c0_91 = arith.constant 0 : index
    %c0_92 = arith.constant 0 : index
    %295 = vector.load %arg14[%294, %c0_91, %c0_92] : memref<8x8x128xf32, #tpu.memory_space<vmem>>, vector<1x8x128xf32>
    %296 = vector.shape_cast %295 : vector<1x8x128xf32> to vector<8x128xf32>
    %297 = vector.shape_cast %289 : vector<8x128xf32> to vector<1x8x128xf32>
    tpu.vector_store %arg14[%294, %c0_91, %c0_92], %297 {strides = array<i32>} : memref<8x8x128xf32, #tpu.memory_space<vmem>>, vector<1x8x128xf32>,
    %c4_i32 = arith.constant 4 : i32
    %c7_i32_93 = arith.constant 7 : i32
    %298 = arith.subi %c7_i32_93, %c4_i32 : i32
    %cst_94 = arith.constant dense<0.000000e+00> : vector<8x512xf32>
    %299 = tpu.matmul %264, %12, %cst_94 {dimension_numbers = #tpu.dot_dimension_numbers<[1], [0], [0], [1], [0, 0, 1, 1], [], []>} : vector<8x128xf32>, vector<128x512xf32>, vector<8x512xf32> -> vector<8x512xf32>
    %300 = arith.index_cast %c4_i32 : i32 to index
    %c0_95 = arith.constant 0 : index
    %c0_96 = arith.constant 0 : index
    %301 = vector.load %arg11[%300, %c0_95, %c0_96] : memref<8x8x512xf32, #tpu.memory_space<vmem>>, vector<1x8x512xf32>
    %302 = vector.shape_cast %301 : vector<1x8x512xf32> to vector<8x512xf32>
    %303 = arith.addf %299, %302 : vector<8x512xf32>
    %cst_97 = arith.constant dense<0.000000e+00> : vector<8x512xf32>
    %304 = tpu.matmul %289, %13, %cst_97 {dimension_numbers = #tpu.dot_dimension_numbers<[1], [0], [0], [1], [0, 0, 1, 1], [], []>} : vector<8x128xf32>, vector<128x512xf32>, vector<8x512xf32> -> vector<8x512xf32>
    %305 = arith.index_cast %298 : i32 to index
    %c0_98 = arith.constant 0 : index
    %c0_99 = arith.constant 0 : index
    %306 = vector.load %arg12[%305, %c0_98, %c0_99] : memref<8x8x512xf32, #tpu.memory_space<vmem>>, vector<1x8x512xf32>
    %307 = vector.shape_cast %306 : vector<1x8x512xf32> to vector<8x512xf32>
    %308 = arith.addf %304, %307 : vector<8x512xf32>
    %309 = vector.extract_strided_slice %303 {offsets = [0, 0], sizes = [8, 128], strides = [1, 1]} : vector<8x512xf32> to vector<8x128xf32>
    %310 = arith.negf %309 : vector<8x128xf32>
    %311 = math.exp %310 : vector<8x128xf32>
    %cst_100 = arith.constant 1.000000e+00 : f32
    %312 = vector.broadcast %cst_100 : f32 to vector<8x128xf32>
    %313 = arith.addf %312, %311 : vector<8x128xf32>
    %314 = arith.divf %312, %313 : vector<8x128xf32>
    %315 = vector.extract_strided_slice %303 {offsets = [0, 128], sizes = [8, 128], strides = [1, 1]} : vector<8x512xf32> to vector<8x128xf32>
    %316 = arith.negf %315 : vector<8x128xf32>
    %317 = math.exp %316 : vector<8x128xf32>
    %cst_101 = arith.constant 1.000000e+00 : f32
    %318 = vector.broadcast %cst_101 : f32 to vector<8x128xf32>
    %319 = arith.addf %318, %317 : vector<8x128xf32>
    %320 = arith.divf %318, %319 : vector<8x128xf32>
    %321 = vector.extract_strided_slice %303 {offsets = [0, 256], sizes = [8, 128], strides = [1, 1]} : vector<8x512xf32> to vector<8x128xf32>
    %322 = math.tanh %321 : vector<8x128xf32>
    %323 = vector.extract_strided_slice %303 {offsets = [0, 384], sizes = [8, 128], strides = [1, 1]} : vector<8x512xf32> to vector<8x128xf32>
    %324 = arith.negf %323 : vector<8x128xf32>
    %325 = math.exp %324 : vector<8x128xf32>
    %cst_102 = arith.constant 1.000000e+00 : f32
    %326 = vector.broadcast %cst_102 : f32 to vector<8x128xf32>
    %327 = arith.addf %326, %325 : vector<8x128xf32>
    %328 = arith.divf %326, %327 : vector<8x128xf32>
    %329 = arith.mulf %320, %262 : vector<8x128xf32>
    %330 = arith.mulf %314, %322 : vector<8x128xf32>
    %331 = arith.addf %329, %330 : vector<8x128xf32>
    %332 = math.tanh %331 : vector<8x128xf32>
    %333 = arith.mulf %328, %332 : vector<8x128xf32>
    %334 = vector.extract_strided_slice %308 {offsets = [0, 0], sizes = [8, 128], strides = [1, 1]} : vector<8x512xf32> to vector<8x128xf32>
    %335 = arith.negf %334 : vector<8x128xf32>
    %336 = math.exp %335 : vector<8x128xf32>
    %cst_103 = arith.constant 1.000000e+00 : f32
    %337 = vector.broadcast %cst_103 : f32 to vector<8x128xf32>
    %338 = arith.addf %337, %336 : vector<8x128xf32>
    %339 = arith.divf %337, %338 : vector<8x128xf32>
    %340 = vector.extract_strided_slice %308 {offsets = [0, 128], sizes = [8, 128], strides = [1, 1]} : vector<8x512xf32> to vector<8x128xf32>
    %341 = arith.negf %340 : vector<8x128xf32>
    %342 = math.exp %341 : vector<8x128xf32>
    %cst_104 = arith.constant 1.000000e+00 : f32
    %343 = vector.broadcast %cst_104 : f32 to vector<8x128xf32>
    %344 = arith.addf %343, %342 : vector<8x128xf32>
    %345 = arith.divf %343, %344 : vector<8x128xf32>
    %346 = vector.extract_strided_slice %308 {offsets = [0, 256], sizes = [8, 128], strides = [1, 1]} : vector<8x512xf32> to vector<8x128xf32>
    %347 = math.tanh %346 : vector<8x128xf32>
    %348 = vector.extract_strided_slice %308 {offsets = [0, 384], sizes = [8, 128], strides = [1, 1]} : vector<8x512xf32> to vector<8x128xf32>
    %349 = arith.negf %348 : vector<8x128xf32>
    %350 = math.exp %349 : vector<8x128xf32>
    %cst_105 = arith.constant 1.000000e+00 : f32
    %351 = vector.broadcast %cst_105 : f32 to vector<8x128xf32>
    %352 = arith.addf %351, %350 : vector<8x128xf32>
    %353 = arith.divf %351, %352 : vector<8x128xf32>
    %354 = arith.mulf %345, %287 : vector<8x128xf32>
    %355 = arith.mulf %339, %347 : vector<8x128xf32>
    %356 = arith.addf %354, %355 : vector<8x128xf32>
    %357 = math.tanh %356 : vector<8x128xf32>
    %358 = arith.mulf %353, %357 : vector<8x128xf32>
    %359 = arith.index_cast %c4_i32 : i32 to index
    %c0_106 = arith.constant 0 : index
    %c0_107 = arith.constant 0 : index
    %360 = vector.load %arg13[%359, %c0_106, %c0_107] : memref<8x8x128xf32, #tpu.memory_space<vmem>>, vector<1x8x128xf32>
    %361 = vector.shape_cast %360 : vector<1x8x128xf32> to vector<8x128xf32>
    %362 = vector.shape_cast %333 : vector<8x128xf32> to vector<1x8x128xf32>
    tpu.vector_store %arg13[%359, %c0_106, %c0_107], %362 {strides = array<i32>} : memref<8x8x128xf32, #tpu.memory_space<vmem>>, vector<1x8x128xf32>,
    %363 = arith.index_cast %298 : i32 to index
    %c0_108 = arith.constant 0 : index
    %c0_109 = arith.constant 0 : index
    %364 = vector.load %arg14[%363, %c0_108, %c0_109] : memref<8x8x128xf32, #tpu.memory_space<vmem>>, vector<1x8x128xf32>
    %365 = vector.shape_cast %364 : vector<1x8x128xf32> to vector<8x128xf32>
    %366 = vector.shape_cast %358 : vector<8x128xf32> to vector<1x8x128xf32>
    tpu.vector_store %arg14[%363, %c0_108, %c0_109], %366 {strides = array<i32>} : memref<8x8x128xf32, #tpu.memory_space<vmem>>, vector<1x8x128xf32>,
    %c5_i32 = arith.constant 5 : i32
    %c7_i32_110 = arith.constant 7 : i32
    %367 = arith.subi %c7_i32_110, %c5_i32 : i32
    %cst_111 = arith.constant dense<0.000000e+00> : vector<8x512xf32>
    %368 = tpu.matmul %333, %12, %cst_111 {dimension_numbers = #tpu.dot_dimension_numbers<[1], [0], [0], [1], [0, 0, 1, 1], [], []>} : vector<8x128xf32>, vector<128x512xf32>, vector<8x512xf32> -> vector<8x512xf32>
    %369 = arith.index_cast %c5_i32 : i32 to index
    %c0_112 = arith.constant 0 : index
    %c0_113 = arith.constant 0 : index
    %370 = vector.load %arg11[%369, %c0_112, %c0_113] : memref<8x8x512xf32, #tpu.memory_space<vmem>>, vector<1x8x512xf32>
    %371 = vector.shape_cast %370 : vector<1x8x512xf32> to vector<8x512xf32>
    %372 = arith.addf %368, %371 : vector<8x512xf32>
    %cst_114 = arith.constant dense<0.000000e+00> : vector<8x512xf32>
    %373 = tpu.matmul %358, %13, %cst_114 {dimension_numbers = #tpu.dot_dimension_numbers<[1], [0], [0], [1], [0, 0, 1, 1], [], []>} : vector<8x128xf32>, vector<128x512xf32>, vector<8x512xf32> -> vector<8x512xf32>
    %374 = arith.index_cast %367 : i32 to index
    %c0_115 = arith.constant 0 : index
    %c0_116 = arith.constant 0 : index
    %375 = vector.load %arg12[%374, %c0_115, %c0_116] : memref<8x8x512xf32, #tpu.memory_space<vmem>>, vector<1x8x512xf32>
    %376 = vector.shape_cast %375 : vector<1x8x512xf32> to vector<8x512xf32>
    %377 = arith.addf %373, %376 : vector<8x512xf32>
    %378 = vector.extract_strided_slice %372 {offsets = [0, 0], sizes = [8, 128], strides = [1, 1]} : vector<8x512xf32> to vector<8x128xf32>
    %379 = arith.negf %378 : vector<8x128xf32>
    %380 = math.exp %379 : vector<8x128xf32>
    %cst_117 = arith.constant 1.000000e+00 : f32
    %381 = vector.broadcast %cst_117 : f32 to vector<8x128xf32>
    %382 = arith.addf %381, %380 : vector<8x128xf32>
    %383 = arith.divf %381, %382 : vector<8x128xf32>
    %384 = vector.extract_strided_slice %372 {offsets = [0, 128], sizes = [8, 128], strides = [1, 1]} : vector<8x512xf32> to vector<8x128xf32>
    %385 = arith.negf %384 : vector<8x128xf32>
    %386 = math.exp %385 : vector<8x128xf32>
    %cst_118 = arith.constant 1.000000e+00 : f32
    %387 = vector.broadcast %cst_118 : f32 to vector<8x128xf32>
    %388 = arith.addf %387, %386 : vector<8x128xf32>
    %389 = arith.divf %387, %388 : vector<8x128xf32>
    %390 = vector.extract_strided_slice %372 {offsets = [0, 256], sizes = [8, 128], strides = [1, 1]} : vector<8x512xf32> to vector<8x128xf32>
    %391 = math.tanh %390 : vector<8x128xf32>
    %392 = vector.extract_strided_slice %372 {offsets = [0, 384], sizes = [8, 128], strides = [1, 1]} : vector<8x512xf32> to vector<8x128xf32>
    %393 = arith.negf %392 : vector<8x128xf32>
    %394 = math.exp %393 : vector<8x128xf32>
    %cst_119 = arith.constant 1.000000e+00 : f32
    %395 = vector.broadcast %cst_119 : f32 to vector<8x128xf32>
    %396 = arith.addf %395, %394 : vector<8x128xf32>
    %397 = arith.divf %395, %396 : vector<8x128xf32>
    %398 = arith.mulf %389, %331 : vector<8x128xf32>
    %399 = arith.mulf %383, %391 : vector<8x128xf32>
    %400 = arith.addf %398, %399 : vector<8x128xf32>
    %401 = math.tanh %400 : vector<8x128xf32>
    %402 = arith.mulf %397, %401 : vector<8x128xf32>
    %403 = vector.extract_strided_slice %377 {offsets = [0, 0], sizes = [8, 128], strides = [1, 1]} : vector<8x512xf32> to vector<8x128xf32>
    %404 = arith.negf %403 : vector<8x128xf32>
    %405 = math.exp %404 : vector<8x128xf32>
    %cst_120 = arith.constant 1.000000e+00 : f32
    %406 = vector.broadcast %cst_120 : f32 to vector<8x128xf32>
    %407 = arith.addf %406, %405 : vector<8x128xf32>
    %408 = arith.divf %406, %407 : vector<8x128xf32>
    %409 = vector.extract_strided_slice %377 {offsets = [0, 128], sizes = [8, 128], strides = [1, 1]} : vector<8x512xf32> to vector<8x128xf32>
    %410 = arith.negf %409 : vector<8x128xf32>
    %411 = math.exp %410 : vector<8x128xf32>
    %cst_121 = arith.constant 1.000000e+00 : f32
    %412 = vector.broadcast %cst_121 : f32 to vector<8x128xf32>
    %413 = arith.addf %412, %411 : vector<8x128xf32>
    %414 = arith.divf %412, %413 : vector<8x128xf32>
    %415 = vector.extract_strided_slice %377 {offsets = [0, 256], sizes = [8, 128], strides = [1, 1]} : vector<8x512xf32> to vector<8x128xf32>
    %416 = math.tanh %415 : vector<8x128xf32>
    %417 = vector.extract_strided_slice %377 {offsets = [0, 384], sizes = [8, 128], strides = [1, 1]} : vector<8x512xf32> to vector<8x128xf32>
    %418 = arith.negf %417 : vector<8x128xf32>
    %419 = math.exp %418 : vector<8x128xf32>
    %cst_122 = arith.constant 1.000000e+00 : f32
    %420 = vector.broadcast %cst_122 : f32 to vector<8x128xf32>
    %421 = arith.addf %420, %419 : vector<8x128xf32>
    %422 = arith.divf %420, %421 : vector<8x128xf32>
    %423 = arith.mulf %414, %356 : vector<8x128xf32>
    %424 = arith.mulf %408, %416 : vector<8x128xf32>
    %425 = arith.addf %423, %424 : vector<8x128xf32>
    %426 = math.tanh %425 : vector<8x128xf32>
    %427 = arith.mulf %422, %426 : vector<8x128xf32>
    %428 = arith.index_cast %c5_i32 : i32 to index
    %c0_123 = arith.constant 0 : index
    %c0_124 = arith.constant 0 : index
    %429 = vector.load %arg13[%428, %c0_123, %c0_124] : memref<8x8x128xf32, #tpu.memory_space<vmem>>, vector<1x8x128xf32>
    %430 = vector.shape_cast %429 : vector<1x8x128xf32> to vector<8x128xf32>
    %431 = vector.shape_cast %402 : vector<8x128xf32> to vector<1x8x128xf32>
    tpu.vector_store %arg13[%428, %c0_123, %c0_124], %431 {strides = array<i32>} : memref<8x8x128xf32, #tpu.memory_space<vmem>>, vector<1x8x128xf32>,
    %432 = arith.index_cast %367 : i32 to index
    %c0_125 = arith.constant 0 : index
    %c0_126 = arith.constant 0 : index
    %433 = vector.load %arg14[%432, %c0_125, %c0_126] : memref<8x8x128xf32, #tpu.memory_space<vmem>>, vector<1x8x128xf32>
    %434 = vector.shape_cast %433 : vector<1x8x128xf32> to vector<8x128xf32>
    %435 = vector.shape_cast %427 : vector<8x128xf32> to vector<1x8x128xf32>
    tpu.vector_store %arg14[%432, %c0_125, %c0_126], %435 {strides = array<i32>} : memref<8x8x128xf32, #tpu.memory_space<vmem>>, vector<1x8x128xf32>,
    %c6_i32 = arith.constant 6 : i32
    %c7_i32_127 = arith.constant 7 : i32
    %436 = arith.subi %c7_i32_127, %c6_i32 : i32
    %cst_128 = arith.constant dense<0.000000e+00> : vector<8x512xf32>
    %437 = tpu.matmul %402, %12, %cst_128 {dimension_numbers = #tpu.dot_dimension_numbers<[1], [0], [0], [1], [0, 0, 1, 1], [], []>} : vector<8x128xf32>, vector<128x512xf32>, vector<8x512xf32> -> vector<8x512xf32>
    %438 = arith.index_cast %c6_i32 : i32 to index
    %c0_129 = arith.constant 0 : index
    %c0_130 = arith.constant 0 : index
    %439 = vector.load %arg11[%438, %c0_129, %c0_130] : memref<8x8x512xf32, #tpu.memory_space<vmem>>, vector<1x8x512xf32>
    %440 = vector.shape_cast %439 : vector<1x8x512xf32> to vector<8x512xf32>
    %441 = arith.addf %437, %440 : vector<8x512xf32>
    %cst_131 = arith.constant dense<0.000000e+00> : vector<8x512xf32>
    %442 = tpu.matmul %427, %13, %cst_131 {dimension_numbers = #tpu.dot_dimension_numbers<[1], [0], [0], [1], [0, 0, 1, 1], [], []>} : vector<8x128xf32>, vector<128x512xf32>, vector<8x512xf32> -> vector<8x512xf32>
    %443 = arith.index_cast %436 : i32 to index
    %c0_132 = arith.constant 0 : index
    %c0_133 = arith.constant 0 : index
    %444 = vector.load %arg12[%443, %c0_132, %c0_133] : memref<8x8x512xf32, #tpu.memory_space<vmem>>, vector<1x8x512xf32>
    %445 = vector.shape_cast %444 : vector<1x8x512xf32> to vector<8x512xf32>
    %446 = arith.addf %442, %445 : vector<8x512xf32>
    %447 = vector.extract_strided_slice %441 {offsets = [0, 0], sizes = [8, 128], strides = [1, 1]} : vector<8x512xf32> to vector<8x128xf32>
    %448 = arith.negf %447 : vector<8x128xf32>
    %449 = math.exp %448 : vector<8x128xf32>
    %cst_134 = arith.constant 1.000000e+00 : f32
    %450 = vector.broadcast %cst_134 : f32 to vector<8x128xf32>
    %451 = arith.addf %450, %449 : vector<8x128xf32>
    %452 = arith.divf %450, %451 : vector<8x128xf32>
    %453 = vector.extract_strided_slice %441 {offsets = [0, 128], sizes = [8, 128], strides = [1, 1]} : vector<8x512xf32> to vector<8x128xf32>
    %454 = arith.negf %453 : vector<8x128xf32>
    %455 = math.exp %454 : vector<8x128xf32>
    %cst_135 = arith.constant 1.000000e+00 : f32
    %456 = vector.broadcast %cst_135 : f32 to vector<8x128xf32>
    %457 = arith.addf %456, %455 : vector<8x128xf32>
    %458 = arith.divf %456, %457 : vector<8x128xf32>
    %459 = vector.extract_strided_slice %441 {offsets = [0, 256], sizes = [8, 128], strides = [1, 1]} : vector<8x512xf32> to vector<8x128xf32>
    %460 = math.tanh %459 : vector<8x128xf32>
    %461 = vector.extract_strided_slice %441 {offsets = [0, 384], sizes = [8, 128], strides = [1, 1]} : vector<8x512xf32> to vector<8x128xf32>
    %462 = arith.negf %461 : vector<8x128xf32>
    %463 = math.exp %462 : vector<8x128xf32>
    %cst_136 = arith.constant 1.000000e+00 : f32
    %464 = vector.broadcast %cst_136 : f32 to vector<8x128xf32>
    %465 = arith.addf %464, %463 : vector<8x128xf32>
    %466 = arith.divf %464, %465 : vector<8x128xf32>
    %467 = arith.mulf %458, %400 : vector<8x128xf32>
    %468 = arith.mulf %452, %460 : vector<8x128xf32>
    %469 = arith.addf %467, %468 : vector<8x128xf32>
    %470 = math.tanh %469 : vector<8x128xf32>
    %471 = arith.mulf %466, %470 : vector<8x128xf32>
    %472 = vector.extract_strided_slice %446 {offsets = [0, 0], sizes = [8, 128], strides = [1, 1]} : vector<8x512xf32> to vector<8x128xf32>
    %473 = arith.negf %472 : vector<8x128xf32>
    %474 = math.exp %473 : vector<8x128xf32>
    %cst_137 = arith.constant 1.000000e+00 : f32
    %475 = vector.broadcast %cst_137 : f32 to vector<8x128xf32>
    %476 = arith.addf %475, %474 : vector<8x128xf32>
    %477 = arith.divf %475, %476 : vector<8x128xf32>
    %478 = vector.extract_strided_slice %446 {offsets = [0, 128], sizes = [8, 128], strides = [1, 1]} : vector<8x512xf32> to vector<8x128xf32>
    %479 = arith.negf %478 : vector<8x128xf32>
    %480 = math.exp %479 : vector<8x128xf32>
    %cst_138 = arith.constant 1.000000e+00 : f32
    %481 = vector.broadcast %cst_138 : f32 to vector<8x128xf32>
    %482 = arith.addf %481, %480 : vector<8x128xf32>
    %483 = arith.divf %481, %482 : vector<8x128xf32>
    %484 = vector.extract_strided_slice %446 {offsets = [0, 256], sizes = [8, 128], strides = [1, 1]} : vector<8x512xf32> to vector<8x128xf32>
    %485 = math.tanh %484 : vector<8x128xf32>
    %486 = vector.extract_strided_slice %446 {offsets = [0, 384], sizes = [8, 128], strides = [1, 1]} : vector<8x512xf32> to vector<8x128xf32>
    %487 = arith.negf %486 : vector<8x128xf32>
    %488 = math.exp %487 : vector<8x128xf32>
    %cst_139 = arith.constant 1.000000e+00 : f32
    %489 = vector.broadcast %cst_139 : f32 to vector<8x128xf32>
    %490 = arith.addf %489, %488 : vector<8x128xf32>
    %491 = arith.divf %489, %490 : vector<8x128xf32>
    %492 = arith.mulf %483, %425 : vector<8x128xf32>
    %493 = arith.mulf %477, %485 : vector<8x128xf32>
    %494 = arith.addf %492, %493 : vector<8x128xf32>
    %495 = math.tanh %494 : vector<8x128xf32>
    %496 = arith.mulf %491, %495 : vector<8x128xf32>
    %497 = arith.index_cast %c6_i32 : i32 to index
    %c0_140 = arith.constant 0 : index
    %c0_141 = arith.constant 0 : index
    %498 = vector.load %arg13[%497, %c0_140, %c0_141] : memref<8x8x128xf32, #tpu.memory_space<vmem>>, vector<1x8x128xf32>
    %499 = vector.shape_cast %498 : vector<1x8x128xf32> to vector<8x128xf32>
    %500 = vector.shape_cast %471 : vector<8x128xf32> to vector<1x8x128xf32>
    tpu.vector_store %arg13[%497, %c0_140, %c0_141], %500 {strides = array<i32>} : memref<8x8x128xf32, #tpu.memory_space<vmem>>, vector<1x8x128xf32>,
    %501 = arith.index_cast %436 : i32 to index
    %c0_142 = arith.constant 0 : index
    %c0_143 = arith.constant 0 : index
    %502 = vector.load %arg14[%501, %c0_142, %c0_143] : memref<8x8x128xf32, #tpu.memory_space<vmem>>, vector<1x8x128xf32>
    %503 = vector.shape_cast %502 : vector<1x8x128xf32> to vector<8x128xf32>
    %504 = vector.shape_cast %496 : vector<8x128xf32> to vector<1x8x128xf32>
    tpu.vector_store %arg14[%501, %c0_142, %c0_143], %504 {strides = array<i32>} : memref<8x8x128xf32, #tpu.memory_space<vmem>>, vector<1x8x128xf32>,
    %c7_i32_144 = arith.constant 7 : i32
    %c7_i32_145 = arith.constant 7 : i32
    %505 = arith.subi %c7_i32_145, %c7_i32_144 : i32
    %cst_146 = arith.constant dense<0.000000e+00> : vector<8x512xf32>
    %506 = tpu.matmul %471, %12, %cst_146 {dimension_numbers = #tpu.dot_dimension_numbers<[1], [0], [0], [1], [0, 0, 1, 1], [], []>} : vector<8x128xf32>, vector<128x512xf32>, vector<8x512xf32> -> vector<8x512xf32>
    %507 = arith.index_cast %c7_i32_144 : i32 to index
    %c0_147 = arith.constant 0 : index
    %c0_148 = arith.constant 0 : index
    %508 = vector.load %arg11[%507, %c0_147, %c0_148] : memref<8x8x512xf32, #tpu.memory_space<vmem>>, vector<1x8x512xf32>
    %509 = vector.shape_cast %508 : vector<1x8x512xf32> to vector<8x512xf32>
    %510 = arith.addf %506, %509 : vector<8x512xf32>
    %cst_149 = arith.constant dense<0.000000e+00> : vector<8x512xf32>
    %511 = tpu.matmul %496, %13, %cst_149 {dimension_numbers = #tpu.dot_dimension_numbers<[1], [0], [0], [1], [0, 0, 1, 1], [], []>} : vector<8x128xf32>, vector<128x512xf32>, vector<8x512xf32> -> vector<8x512xf32>
    %512 = arith.index_cast %505 : i32 to index
    %c0_150 = arith.constant 0 : index
    %c0_151 = arith.constant 0 : index
    %513 = vector.load %arg12[%512, %c0_150, %c0_151] : memref<8x8x512xf32, #tpu.memory_space<vmem>>, vector<1x8x512xf32>
    %514 = vector.shape_cast %513 : vector<1x8x512xf32> to vector<8x512xf32>
    %515 = arith.addf %511, %514 : vector<8x512xf32>
    %516 = vector.extract_strided_slice %510 {offsets = [0, 0], sizes = [8, 128], strides = [1, 1]} : vector<8x512xf32> to vector<8x128xf32>
    %517 = arith.negf %516 : vector<8x128xf32>
    %518 = math.exp %517 : vector<8x128xf32>
    %cst_152 = arith.constant 1.000000e+00 : f32
    %519 = vector.broadcast %cst_152 : f32 to vector<8x128xf32>
    %520 = arith.addf %519, %518 : vector<8x128xf32>
    %521 = arith.divf %519, %520 : vector<8x128xf32>
    %522 = vector.extract_strided_slice %510 {offsets = [0, 128], sizes = [8, 128], strides = [1, 1]} : vector<8x512xf32> to vector<8x128xf32>
    %523 = arith.negf %522 : vector<8x128xf32>
    %524 = math.exp %523 : vector<8x128xf32>
    %cst_153 = arith.constant 1.000000e+00 : f32
    %525 = vector.broadcast %cst_153 : f32 to vector<8x128xf32>
    %526 = arith.addf %525, %524 : vector<8x128xf32>
    %527 = arith.divf %525, %526 : vector<8x128xf32>
    %528 = vector.extract_strided_slice %510 {offsets = [0, 256], sizes = [8, 128], strides = [1, 1]} : vector<8x512xf32> to vector<8x128xf32>
    %529 = math.tanh %528 : vector<8x128xf32>
    %530 = vector.extract_strided_slice %510 {offsets = [0, 384], sizes = [8, 128], strides = [1, 1]} : vector<8x512xf32> to vector<8x128xf32>
    %531 = arith.negf %530 : vector<8x128xf32>
    %532 = math.exp %531 : vector<8x128xf32>
    %cst_154 = arith.constant 1.000000e+00 : f32
    %533 = vector.broadcast %cst_154 : f32 to vector<8x128xf32>
    %534 = arith.addf %533, %532 : vector<8x128xf32>
    %535 = arith.divf %533, %534 : vector<8x128xf32>
    %536 = arith.mulf %527, %469 : vector<8x128xf32>
    %537 = arith.mulf %521, %529 : vector<8x128xf32>
    %538 = arith.addf %536, %537 : vector<8x128xf32>
    %539 = math.tanh %538 : vector<8x128xf32>
    %540 = arith.mulf %535, %539 : vector<8x128xf32>
    %541 = vector.extract_strided_slice %515 {offsets = [0, 0], sizes = [8, 128], strides = [1, 1]} : vector<8x512xf32> to vector<8x128xf32>
    %542 = arith.negf %541 : vector<8x128xf32>
    %543 = math.exp %542 : vector<8x128xf32>
    %cst_155 = arith.constant 1.000000e+00 : f32
    %544 = vector.broadcast %cst_155 : f32 to vector<8x128xf32>
    %545 = arith.addf %544, %543 : vector<8x128xf32>
    %546 = arith.divf %544, %545 : vector<8x128xf32>
    %547 = vector.extract_strided_slice %515 {offsets = [0, 128], sizes = [8, 128], strides = [1, 1]} : vector<8x512xf32> to vector<8x128xf32>
    %548 = arith.negf %547 : vector<8x128xf32>
    %549 = math.exp %548 : vector<8x128xf32>
    %cst_156 = arith.constant 1.000000e+00 : f32
    %550 = vector.broadcast %cst_156 : f32 to vector<8x128xf32>
    %551 = arith.addf %550, %549 : vector<8x128xf32>
    %552 = arith.divf %550, %551 : vector<8x128xf32>
    %553 = vector.extract_strided_slice %515 {offsets = [0, 256], sizes = [8, 128], strides = [1, 1]} : vector<8x512xf32> to vector<8x128xf32>
    %554 = math.tanh %553 : vector<8x128xf32>
    %555 = vector.extract_strided_slice %515 {offsets = [0, 384], sizes = [8, 128], strides = [1, 1]} : vector<8x512xf32> to vector<8x128xf32>
    %556 = arith.negf %555 : vector<8x128xf32>
    %557 = math.exp %556 : vector<8x128xf32>
    %cst_157 = arith.constant 1.000000e+00 : f32
    %558 = vector.broadcast %cst_157 : f32 to vector<8x128xf32>
    %559 = arith.addf %558, %557 : vector<8x128xf32>
    %560 = arith.divf %558, %559 : vector<8x128xf32>
    %561 = arith.mulf %552, %494 : vector<8x128xf32>
    %562 = arith.mulf %546, %554 : vector<8x128xf32>
    %563 = arith.addf %561, %562 : vector<8x128xf32>
    %564 = math.tanh %563 : vector<8x128xf32>
    %565 = arith.mulf %560, %564 : vector<8x128xf32>
    %566 = arith.index_cast %c7_i32_144 : i32 to index
    %c0_158 = arith.constant 0 : index
    %c0_159 = arith.constant 0 : index
    %567 = vector.load %arg13[%566, %c0_158, %c0_159] : memref<8x8x128xf32, #tpu.memory_space<vmem>>, vector<1x8x128xf32>
    %568 = vector.shape_cast %567 : vector<1x8x128xf32> to vector<8x128xf32>
    %569 = vector.shape_cast %540 : vector<8x128xf32> to vector<1x8x128xf32>
    tpu.vector_store %arg13[%566, %c0_158, %c0_159], %569 {strides = array<i32>} : memref<8x8x128xf32, #tpu.memory_space<vmem>>, vector<1x8x128xf32>,
    %570 = arith.index_cast %505 : i32 to index
    %c0_160 = arith.constant 0 : index
    %c0_161 = arith.constant 0 : index
    %571 = vector.load %arg14[%570, %c0_160, %c0_161] : memref<8x8x128xf32, #tpu.memory_space<vmem>>, vector<1x8x128xf32>
    %572 = vector.shape_cast %571 : vector<1x8x128xf32> to vector<8x128xf32>
    %573 = vector.shape_cast %565 : vector<8x128xf32> to vector<1x8x128xf32>
    tpu.vector_store %arg14[%570, %c0_160, %c0_161], %573 {strides = array<i32>} : memref<8x8x128xf32, #tpu.memory_space<vmem>>, vector<1x8x128xf32>,
    %c8_i32 = arith.constant 8 : i32
    %c0_162 = arith.constant 0 : index
    %c0_163 = arith.constant 0 : index
    %c0_164 = arith.constant 0 : index
    %574 = vector.load %arg13[%c0_162, %c0_163, %c0_164] : memref<8x8x128xf32, #tpu.memory_space<vmem>>, vector<8x8x128xf32>
    %575 = vector.shape_cast %574 : vector<8x8x128xf32> to vector<64x128xf32>
    %c0_165 = arith.constant 0 : index
    %c0_166 = arith.constant 0 : index
    %c0_167 = arith.constant 0 : index
    %576 = vector.load %arg14[%c0_165, %c0_166, %c0_167] : memref<8x8x128xf32, #tpu.memory_space<vmem>>, vector<8x8x128xf32>
    %577 = vector.shape_cast %576 : vector<8x8x128xf32> to vector<64x128xf32>
    %c0_168 = arith.constant 0 : index
    %c0_169 = arith.constant 0 : index
    %578 = vector.load %arg7[%c0_168, %c0_169] : memref<128x128xf32, #tpu.memory_space<vmem>>, vector<128x128xf32>
    %cst_170 = arith.constant dense<0.000000e+00> : vector<64x128xf32>
    %579 = tpu.matmul %575, %578, %cst_170 {dimension_numbers = #tpu.dot_dimension_numbers<[1], [0], [0], [1], [0, 0, 1, 1], [], []>} : vector<64x128xf32>, vector<128x128xf32>, vector<64x128xf32> -> vector<64x128xf32>
    %c0_171 = arith.constant 0 : index
    %c0_172 = arith.constant 0 : index
    %580 = vector.load %arg8[%c0_171, %c0_172] : memref<128x128xf32, #tpu.memory_space<vmem>>, vector<128x128xf32>
    %cst_173 = arith.constant dense<0.000000e+00> : vector<64x128xf32>
    %581 = tpu.matmul %577, %580, %cst_173 {dimension_numbers = #tpu.dot_dimension_numbers<[1], [0], [0], [1], [0, 0, 1, 1], [], []>} : vector<64x128xf32>, vector<128x128xf32>, vector<64x128xf32> -> vector<64x128xf32>
    %582 = arith.addf %579, %581 : vector<64x128xf32>
    %c0_174 = arith.constant 0 : index
    %c0_175 = arith.constant 0 : index
    %583 = vector.load %arg9[%c0_174, %c0_175] : memref<1x128xf32, #tpu.memory_space<vmem>>, vector<1x128xf32>
    %584 = vector.broadcast %583 : vector<1x128xf32> to vector<64x128xf32>
    %585 = arith.addf %582, %584 : vector<64x128xf32>
    %c0_176 = arith.constant 0 : index
    %c0_177 = arith.constant 0 : index
    %586 = vector.load %arg10[%c0_176, %c0_177] : memref<64x128xf32, #tpu.memory_space<vmem>>, vector<64x128xf32>
    tpu.vector_store %arg10[%c0_176, %c0_177], %585 {strides = array<i32>} : memref<64x128xf32, #tpu.memory_space<vmem>>, vector<64x128xf32>,
    return
  }
}

</mosaic_0001>

<bundles_post_ra>
// kernel: tpu_custom_call.1
= control target key start
LH: loop header
LB: loop body
LE: loop exit
PB: predicated region body
PF: predicated region fallthrough
CT: control target
= control target key end

     0   :  { %15 = vsyncpa [#allocation7], 0  ;;  %s7053_s0 = inlined_call_operand.vmem [shape: f32[64,32], index: 0, kind: input, shape index: {}]   ;;  %s7054_s1 = inlined_call_operand.hbm [shape: f32[32,1024], index: 1, kind: input, shape index: {}]   ;;  %s7055_s2 = inlined_call_operand.vmem [shape: f32[1,1024], index: 2, kind: input, shape index: {}]   ;;  %s7056_s3 = inlined_call_operand.hbm [shape: f32[128,512], index: 3, kind: input, shape index: {}]   ;;  %s7057_s4 = inlined_call_operand.hbm [shape: f32[128,512], index: 4, kind: input, shape index: {}]   ;;  %s7058_s5 = inlined_call_operand.vmem [shape: f32[2,8,128], index: 5, kind: input, shape index: {}]   ;;  %s7059_s6 = inlined_call_operand.vmem [shape: f32[2,8,128], index: 6, kind: input, shape index: {}]   ;;  %s7060_s7 = inlined_call_operand.hbm [shape: f32[128,128], index: 7, kind: input, shape index: {}]   ;;  %s7061_s8 = inlined_call_operand.hbm [shape: f32[128,128], index: 8, kind: input, shape index: {}]   ;;  %s7062_s9 = inlined_call_operand.vmem [shape: f32[1,128], index: 9, kind: input, shape index: {}]   ;;  %s7063_s10 = inlined_call_operand.hbm [shape: f32[64,128], index: 10, kind: output, shape index: {}]  }
   0x1   :  { %16 = vsyncpa [#allocation10], 0 }
   0x2   :  { %17 = vsyncpa [#allocation13], 0 }
   0x3   :  { %18 = vsyncpa [#allocation8], 0  ;;  %s5809_s13 = smov [#allocation9]   ;;  %s5669_s17 = scalar_lea.hbm %s7056_s3, 8192 }
   0x4   :  { %s40_s14 = sshll.u32 %s5809_s13, 4  ;;  %p5670_p0 = scmp.ne.s32.totalorder %s7056_s3, %s5669_s17  ;;  %s41_s14 = int_to_ptr.vmem [resolvable:$true] %s40_s14 }
   0x5   :  { %p5673_p1 = scmp.lt.u32.totalorder %s5669_s17, %s7056_s3 }
   0x7   :  { %p5675_p2 = pnand %p5673_p1, %p5670_p0 }
   0x9   :  { %5678 = shalt.err (!%p5675_p2)
}
   0xa   :  { %s5679_s22 = scalar_lea.vmem %s41_s14, 8192  ;;  %p5684_p4 = scmp.lt.s32.totalorder %s41_s14, %s41_s14 }
   0xb   :  { %p5680_p3 = scmp.ne.s32.totalorder %s41_s14, %s5679_s22  ;;  %p5685_p5 = scmp.lt.s32.totalorder %s5679_s22, %s5679_s22 }
   0xd   :  { %p5686_p6 = por %p5685_p5, %p5684_p4 }
   0xf   :  { %p5687_p7 = pnand %p5686_p6, %p5680_p3 }
  0x11   :  { %5690 = shalt.err (!%p5687_p7)
}
  0x12   :  { %s5810_s23 = smov 512   ;;  %s5811_s24 = smov 32  }
  0x13   :  { %46 = dma.hbm_to_vmem [thread:$0]  %s7056_s3, 8192, %s41_s14, [#allocation10], %s5810_s23, %s5810_s23, %s5811_s24  }
  0x14   :  { %s5812_s27 = smov [#allocation12]   ;;  %s5691_s11 = scalar_lea.hbm %s7060_s7, 2048 }
  0x15   :  { %s68_s28 = sshll.u32 %s5812_s27, 4  ;;  %p5692_p8 = scmp.ne.s32.totalorder %s7060_s7, %s5691_s11  ;;  %s69_s28 = int_to_ptr.vmem [resolvable:$true] %s68_s28 }
  0x16   :  { %p5695_p9 = scmp.lt.u32.totalorder %s5691_s11, %s7060_s7 }
  0x18   :  { %p5697_p10 = pnand %p5695_p9, %p5692_p8 }
  0x1a   :  { %5700 = shalt.err (!%p5697_p10)
}
  0x1b   :  { %s5701_s17 = scalar_lea.vmem %s69_s28, 2048  ;;  %p5706_p12 = scmp.lt.s32.totalorder %s69_s28, %s69_s28 }
  0x1c   :  { %p5702_p11 = scmp.ne.s32.totalorder %s69_s28, %s5701_s17  ;;  %p5707_p13 = scmp.lt.s32.totalorder %s5701_s17, %s5701_s17 }
  0x1e   :  { %p5708_p0 = por %p5707_p13, %p5706_p12 }
  0x20   :  { %p5709_p1 = pnand %p5708_p0, %p5702_p11 }
  0x22   :  { %5712 = shalt.err (!%p5709_p1)
}
  0x23   :  { %s5813_s3 = smov 128   ;;  %s5814_s14 = smov 8  }
  0x24   :  { %74 = dma.hbm_to_vmem [thread:$0]  %s7060_s7, 2048, %s69_s28, [#allocation13], %s5813_s3, %s5813_s3, %s5814_s14  }
  0x25   :  { %s5815_s20 = smov [#allocation6]   ;;  %s5713_s26 = scalar_lea.hbm %s7054_s1, 4096 }
  0x26   :  { %s26_s21 = sshll.u32 %s5815_s20, 4  ;;  %p5714_p2 = scmp.ne.s32.totalorder %s7054_s1, %s5713_s26  ;;  %s27_s21 = int_to_ptr.vmem [resolvable:$true] %s26_s21 }
  0x27   :  { %p5717_p3 = scmp.lt.u32.totalorder %s5713_s26, %s7054_s1 }
  0x29   :  { %p5719_p4 = pnand %p5717_p3, %p5714_p2 }
  0x2b   :  { %5722 = shalt.err (!%p5719_p4)
}
  0x2c   :  { %s5723_s12 = scalar_lea.vmem %s27_s21, 4096  ;;  %p5728_p6 = scmp.lt.s32.totalorder %s27_s21, %s27_s21 }
  0x2d   :  { %p5724_p5 = scmp.ne.s32.totalorder %s27_s21, %s5723_s12  ;;  %p5729_p7 = scmp.lt.s32.totalorder %s5723_s12, %s5723_s12 }
  0x2f   :  { %p5730_p8 = por %p5729_p7, %p5728_p6 }
  0x31   :  { %p5731_p9 = pnand %p5730_p8, %p5724_p5 }
  0x33   :  { %5734 = shalt.err (!%p5731_p9)
}
  0x34   :  { %s5816_s7 = smov 1024   ;;  %s5817_s28 = smov 64  }
  0x35   :  { %32 = dma.hbm_to_vmem [thread:$0]  %s7054_s1, 4096, %s27_s21, [#allocation7], %s5816_s7, %s5816_s7, %s5817_s28  }
  0x36   :  { %s5818_s16 = smov [#allocation11]   ;;  %s5819_s18 = smov [#allocation14]  }
  0x37   :  { %s52_s17 = sshll.u32 %s5818_s16, 4  ;;  %s80_s19 = sshll.u32 %s5819_s18, 4  ;;  %s53_s17 = int_to_ptr.vmem [resolvable:$true] %s52_s17  ;;  %s81_s19 = int_to_ptr.vmem [resolvable:$true] %s80_s19 }
  0x38   :  { %s5735_s25 = scalar_lea.hbm %s7057_s4, 8192 }
  0x39   :  { %p5736_p10 = scmp.ne.s32.totalorder %s7057_s4, %s5735_s25  ;;  %p5739_p11 = scmp.lt.u32.totalorder %s5735_s25, %s7057_s4 }
  0x3b   :  { %p5741_p12 = pnand %p5739_p11, %p5736_p10 }
  0x3d   :  { %5744 = shalt.err (!%p5741_p12)
}
  0x3e   :  { %s5745_s1 = scalar_lea.vmem %s53_s17, 8192  ;;  %p5750_p0 = scmp.lt.s32.totalorder %s53_s17, %s53_s17 }
  0x3f   :  { %p5746_p13 = scmp.ne.s32.totalorder %s53_s17, %s5745_s1  ;;  %p5751_p1 = scmp.lt.s32.totalorder %s5745_s1, %s5745_s1 }
  0x41   :  { %p5752_p2 = por %p5751_p1, %p5750_p0 }
  0x43   :  { %p5753_p3 = pnand %p5752_p2, %p5746_p13 }
  0x45   :  { %5756 = shalt.err (!%p5753_p3)
}
  0x46   :  { %58 = dma.hbm_to_vmem [thread:$0]  %s7057_s4, 8192, %s53_s17, [#allocation10], %s5810_s23, %s5810_s23, %s5811_s24  }
  0x47   :  { %s5757_s28 = scalar_lea.hbm %s7061_s8, 2048 }
  0x48   :  { %p5758_p4 = scmp.ne.s32.totalorder %s7061_s8, %s5757_s28  ;;  %p5761_p5 = scmp.lt.u32.totalorder %s5757_s28, %s7061_s8 }
  0x4a   :  { %p5763_p6 = pnand %p5761_p5, %p5758_p4 }
  0x4c   :  { %5766 = shalt.err (!%p5763_p6)
}
  0x4d   :  { %s5767_s20 = scalar_lea.vmem %s81_s19, 2048  ;;  %p5772_p8 = scmp.lt.s32.totalorder %s81_s19, %s81_s19 }
  0x4e   :  { %p5768_p7 = scmp.ne.s32.totalorder %s81_s19, %s5767_s20  ;;  %p5773_p9 = scmp.lt.s32.totalorder %s5767_s20, %s5767_s20 }
  0x50   :  { %p5774_p10 = por %p5773_p9, %p5772_p8 }
  0x52   :  { %p5775_p11 = pnand %p5774_p10, %p5768_p7 }
  0x54   :  { %5778 = shalt.err (!%p5775_p11)
}
  0x55   :  { %86 = dma.hbm_to_vmem [thread:$0]  %s7061_s8, 2048, %s81_s19, [#allocation13], %s5813_s3, %s5813_s3, %s5814_s14  }
  0x56   :  { %5801 = dma.done.wait [#allocation7], 4096  }
  0x57   :  { %5802 = vsyncadd [#allocation7], 4294963200 }
  0x58   :  { %5803 = dma.done.wait [#allocation10], 16384  }
  0x59   :  { %5804 = vsyncadd [#allocation10], 4294950912 }
  0x5a   :  { %5805 = dma.done.wait [#allocation13], 4096  }
  0x5b   :  { %5806 = vsyncadd [#allocation13], 4294963200  ;;  %v7068_v0 = vmov 0.0   ;;  %v113_v1 = vld [vmem:[#allocation6 + $0x8] sm:$0xff]  ;;  %v112_v6 = vld [vmem:[#allocation6] sm:$0xff]  ;;  %vm186_vm0 = vcmask 261120  }
  0x5c   :  { %275 = vmatprep.mubr.f32.mxu1 %v7068_v0  ;;  %501 = vmatprep.mubr.f32.mxu0 %v7068_v0  ;;  %v121_v2 = vld [vmem:[#allocation6 + $0x48] sm:$0xff]  ;;  %v120_v7 = vld [vmem:[#allocation6 + $0x40] sm:$0xff]  ;;  %v115_v24 = vld [vmem:[#allocation6 + $0x18] sm:$0xff]  ;;  %s5821_s24 = smov [#allocation15]  }
  0x5d   :  { %v117_v3 = vld [vmem:[#allocation6 + $0x28] sm:$0xff]  ;;  %v4144_v4 = vpack.c.bf16 %v121_v2, %v113_v1  ;;  %v4146_v9 = vpack.c.bf16 %v120_v7, %v112_v6  ;;  %v116_v10 = vld [vmem:[#allocation6 + $0x20] sm:$0xff]  ;;  %v123_v26 = vld [vmem:[#allocation6 + $0x58] sm:$0xff]  ;;  %s3911_s17 = sshll.u32 %s5821_s24, 4  ;;  %s3912_s17 = int_to_ptr.vmem [resolvable:$true] %s3911_s17 }
  0x5e   :  { %v125_v5 = vld [vmem:[#allocation6 + $0x68] sm:$0xff]  ;;  %v124_v11 = vld [vmem:[#allocation6 + $0x60] sm:$0xff]  ;;  %v4152_v29 = vpack.c.bf16 %v123_v26, %v115_v24  ;;  %v114_v31 = vld [vmem:[#allocation6 + $0x10] sm:$0xff]  ;;  %p5784_p13 = scmp.lt.s32.totalorder %s3912_s17, %s3912_s17 }
  0x5f   :  { %v4160_v8 = vpack.c.bf16 %v125_v5, %v117_v3  ;;  %v129_v12 = vld [vmem:[#allocation6 + $0x88] sm:$0xff]  ;;  %4145 = vmatprep.subr.bf16.mxu1 %v4144_v4  ;;  %v4162_v13 = vpack.c.bf16 %v124_v11, %v116_v10  ;;  %v128_v19 = vld [vmem:[#allocation6 + $0x80] sm:$0xff]  ;;  %v122_v32 = vld [vmem:[#allocation6 + $0x50] sm:$0xff] }
  0x60   :  { %v137_v14 = vld [vmem:[#allocation6 + $0xc8] sm:$0xff]  ;;  %4147 = vmatpush1.bf16.msra.mxu1 %v4146_v9  ;;  %v136_v20 = vld [vmem:[#allocation6 + $0xc0] sm:$0xff]  ;;  %v4154_v35 = vpack.c.bf16 %v122_v32, %v114_v31  ;;  %v131_v48 = vld [vmem:[#allocation6 + $0x98] sm:$0xff] }
  0x61   :  { %v133_v15 = vld [vmem:[#allocation6 + $0xa8] sm:$0xff]  ;;  %4161 = vmatprep.subr.bf16.mxu0 %v4160_v8  ;;  %v4148_v17 = vpack.c.bf16 %v137_v14, %v129_v12  ;;  %v132_v21 = vld [vmem:[#allocation6 + $0xa0] sm:$0xff]  ;;  %v4150_v22 = vpack.c.bf16 %v136_v20, %v128_v19  ;;  %v139_v52 = vld [vmem:[#allocation6 + $0xd8] sm:$0xff] }
  0x62   :  { %v141_v16 = vld [vmem:[#allocation6 + $0xe8] sm:$0xff]  ;;  %4163 = vmatpush1.bf16.msra.mxu0 %v4162_v13  ;;  %v140_v23 = vld [vmem:[#allocation6 + $0xe0] sm:$0xff]  ;;  %v4156_v54 = vpack.c.bf16 %v139_v52, %v131_v48  ;;  %v130_v55 = vld [vmem:[#allocation6 + $0x90] sm:$0xff] }
  0x63   :  { %v4164_v18 = vpack.c.bf16 %v141_v16, %v133_v15  ;;  %4149 = vmatprep.subr.bf16.mxu1 %v4148_v17  ;;  %v4166_v25 = vpack.c.bf16 %v140_v23, %v132_v21  ;;  %v728_v27 = vld [vmem:[#allocation9 + $0x8] sm:$0xff]  ;;  %v727_v33 = vld [vmem:[#allocation9] sm:$0xff]  ;;  %v138_v56 = vld [vmem:[#allocation6 + $0xd0] sm:$0xff] }
  0x64   :  { %v732_v28 = vld [vmem:[#allocation9 + $0x28] sm:$0xff]  ;;  %4151 = vmatpush1.bf16.msra.mxu1 %v4150_v22  ;;  %v5956_v34 = vld [vmem:[%s7053_s0] sm:$0xff]  ;;  %v5988_v57 = vld [vmem:[%s7053_s0 + $0x10] sm:$0xff]  ;;  %v4158_v62 = vpack.c.bf16 %v138_v56, %v130_v55 }
  0x65   :  { %4165 = vmatprep.subr.bf16.mxu0 %v4164_v18  ;;  %v5951_v30 = vpack.c.bf16 %v732_v28, %v728_v27  ;;  %v731_v36 = vld [vmem:[#allocation9 + $0x20] sm:$0xff]  ;;  %v736_v37 = vld [vmem:[#allocation9 + $0x48] sm:$0xff]  ;;  %4153 = vmatprep.subr.bf16.mxu1 %v4152_v29  ;;  %v6005_v2 = vld [vmem:[%s7053_s0 + $0x18] sm:$0xff] }
  0x66   :  { %4167 = vmatpush1.bf16.msra.mxu0 %v4166_v25  ;;  %v5958_v38 = vpack.c.bf16 %v731_v36, %v727_v33  ;;  %v740_v39 = vld [vmem:[#allocation9 + $0x68] sm:$0xff]  ;;  %v735_v41 = vld [vmem:[#allocation9 + $0x40] sm:$0xff]  ;;  %v119_v4 = vld [vmem:[#allocation6 + $0x38] sm:$0xff] }
  0x67   :  { %4177 = vmatprep.subr.bf16.mxu0 %v5951_v30  ;;  %v5961_v40 = vpack.c.bf16 %v740_v39, %v736_v37  ;;  %v739_v42 = vld [vmem:[#allocation9 + $0x60] sm:$0xff]  ;;  %3925 = vmatmul.mubr.msk.f32.vlgmr.msra.gmra.mrb[0].mxu1 %vm186_vm0, %v5956_v34  ;;  %v744_v43 = vld [vmem:[#allocation9 + $0x88] sm:$0xff]  ;;  %v127_v5 = vld [vmem:[#allocation6 + $0x78] sm:$0xff] }
  0x68   :  { %v748_v44 = vld [vmem:[#allocation9 + $0xa8] sm:$0xff]  ;;  %4155 = vmatpush1.bf16.msra.mxu1 %v4154_v35  ;;  %281 = vmatprep.mubr.f32.mxu1 %v7068_v0  ;;  %v5974_v46 = vpack.c.bf16 %v739_v42, %v735_v41  ;;  %v743_v47 = vld [vmem:[#allocation9 + $0x80] sm:$0xff]  ;;  %v4168_v9 = vpack.c.bf16 %v127_v5, %v119_v4  ;;  %v6056_v26 = vld [vmem:[%s7053_s0 + $0x30] sm:$0xff] }
  0x69   :  { %3941 = vmatmul.mubr.msk.f32.vlgmr.msra.gmra.mrb[0].mxu0 %vm186_vm0, %v5956_v34  ;;  %v5970_v45 = vld [vmem:[%s7053_s0 + $0x8] sm:$0xff]  ;;  %v5978_v49 = vpack.c.bf16 %v748_v44, %v744_v43  ;;  %v747_v50 = vld [vmem:[#allocation9 + $0xa0] sm:$0xff]  ;;  %4157 = vmatprep.subr.bf16.mxu1 %v4156_v54  ;;  %v6073_v35 = vld [vmem:[%s7053_s0 + $0x38] sm:$0xff] }
  0x6a   :  { %4179 = vmatpush1.bf16.msra.mxu0 %v5958_v38  ;;  %507 = vmatprep.mubr.f32.mxu0 %v7068_v0  ;;  %v752_v51 = vld [vmem:[#allocation9 + $0xc8] sm:$0xff]  ;;  %v5992_v58 = vpack.c.bf16 %v747_v50, %v743_v47  ;;  %v751_v60 = vld [vmem:[#allocation9 + $0xc0] sm:$0xff]  ;;  %v118_v37 = vld [vmem:[#allocation6 + $0x30] sm:$0xff] }
  0x6b   :  { %4181 = vmatprep.subr.bf16.mxu0 %v5961_v40  ;;  %7130 = vst [vmem:[#allocation20_spill] sm:$0xff] %v5978_v49  ;;  %3926 = vmatmul.mubr.msk.f32.gmra.mrb[2].mxu1 %vm186_vm0, %v5970_v45  ;;  %v756_v53 = vld [vmem:[#allocation9 + $0xe8] sm:$0xff]  ;;  %v755_v61 = vld [vmem:[#allocation9 + $0xe0] sm:$0xff]  ;;  %v126_v39 = vld [vmem:[#allocation6 + $0x70] sm:$0xff] }
  0x6c   :  { %287 = vmatprep.mubr.f32.mxu1 %v7068_v0  ;;  %7131 = vst [vmem:[#allocation21_spill] sm:$0xff] %v5992_v58  ;;  %v5995_v59 = vpack.c.bf16 %v756_v53, %v752_v51  ;;  %v760_v63 = vld [vmem:[#allocation9 + $0x108] sm:$0xff]  ;;  %v6009_v3 = vpack.c.bf16 %v755_v61, %v751_v60  ;;  %4159 = vmatpush1.bf16.msra.mxu1 %v4158_v62  ;;  %v759_v7 = vld [vmem:[#allocation9 + $0x100] sm:$0xff]  ;;  %v135_v44 = vld [vmem:[#allocation6 + $0xb8] sm:$0xff] }
  0x6d   :  { %3942 = vmatmul.mubr.msk.f32.gmra.mrb[2].mxu0 %vm186_vm0, %v5970_v45  ;;  %v764_v1 = vld [vmem:[#allocation9 + $0x128] sm:$0xff]  ;;  %v763_v8 = vld [vmem:[#allocation9 + $0x120] sm:$0xff]  ;;  %4169 = vmatprep.subr.bf16.mxu1 %v4168_v9  ;;  %v143_v47 = vld [vmem:[#allocation6 + $0xf8] sm:$0xff]  ;;  %v4170_v52 = vpack.c.bf16 %v126_v39, %v118_v37 }
  0x6e   :  { %4183 = vmatpush1.bf16.msra.mxu0 %v5974_v46  ;;  %513 = vmatprep.mubr.f32.mxu0 %v7068_v0  ;;  %7132 = vst [vmem:[#allocation22_spill] sm:$0xff] %v5995_v59  ;;  %7133 = vst [vmem:[#allocation23_spill] sm:$0xff] %v6009_v3  ;;  %v6012_v6 = vpack.c.bf16 %v764_v1, %v760_v63  ;;  %v768_v10 = vld [vmem:[#allocation9 + $0x148] sm:$0xff]  ;;  %v6022_v12 = vld [vmem:[%s7053_s0 + $0x20] sm:$0xff]  ;;  %v6026_v13 = vpack.c.bf16 %v763_v8, %v759_v7 }
  0x6f   :  { %4185 = vmatprep.subr.bf16.mxu0 %v5978_v49  ;;  %3927 = vmatmul.mubr.msk.f32.gmra.mrb[4].mxu1 %vm186_vm0, %v5988_v57  ;;  %v772_v11 = vld [vmem:[#allocation9 + $0x168] sm:$0xff]  ;;  %v767_v15 = vld [vmem:[#allocation9 + $0x140] sm:$0xff]  ;;  %v134_v54 = vld [vmem:[#allocation6 + $0xb0] sm:$0xff]  ;;  %v4172_v60 = vpack.c.bf16 %v143_v47, %v135_v44 }
  0x70   :  { %293 = vmatprep.mubr.f32.mxu1 %v7068_v0  ;;  %7134 = vst [vmem:[#allocation24_spill] sm:$0xff] %v6012_v6  ;;  %7135 = vst [vmem:[#allocation25_spill] sm:$0xff] %v6026_v13  ;;  %v6029_v14 = vpack.c.bf16 %v772_v11, %v768_v10  ;;  %v771_v16 = vld [vmem:[#allocation9 + $0x160] sm:$0xff]  ;;  %v776_v17 = vld [vmem:[#allocation9 + $0x188] sm:$0xff] }
  0x71   :  { %3943 = vmatmul.mubr.msk.f32.gmra.mrb[4].mxu0 %vm186_vm0, %v5988_v57  ;;  %v780_v18 = vld [vmem:[#allocation9 + $0x1a8] sm:$0xff]  ;;  %v6043_v20 = vpack.c.bf16 %v771_v16, %v767_v15  ;;  %v775_v22 = vld [vmem:[#allocation9 + $0x180] sm:$0xff]  ;;  %v142_v55 = vld [vmem:[#allocation6 + $0xf0] sm:$0xff] }
  0x72   :  { %4187 = vmatpush1.bf16.msra.mxu0 %v5992_v58  ;;  %519 = vmatprep.mubr.f32.mxu0 %v7068_v0  ;;  %7136 = vst [vmem:[#allocation26_spill] sm:$0xff] %v6029_v14  ;;  %v6039_v19 = vld [vmem:[%s7053_s0 + $0x28] sm:$0xff]  ;;  %v6046_v21 = vpack.c.bf16 %v780_v18, %v776_v17  ;;  %v779_v23 = vld [vmem:[#allocation9 + $0x1a0] sm:$0xff]  ;;  %v730_v63 = vld [vmem:[#allocation9 + $0x18] sm:$0xff]  ;;  %v4174_v7 = vpack.c.bf16 %v142_v55, %v134_v54 }
  0x73   :  { %4189 = vmatprep.subr.bf16.mxu0 %v5995_v59  ;;  %3928 = vmatmul.mubr.msk.f32.gmra.mrb[6].mxu1 %vm186_vm0, %v6005_v2  ;;  %7137 = vst [vmem:[#allocation27_spill] sm:$0xff] %v6043_v20  ;;  %v784_v24 = vld [vmem:[#allocation9 + $0x1c8] sm:$0xff]  ;;  %v6060_v27 = vpack.c.bf16 %v779_v23, %v775_v22  ;;  %v783_v29 = vld [vmem:[#allocation9 + $0x1c0] sm:$0xff]  ;;  %v734_v1 = vld [vmem:[#allocation9 + $0x38] sm:$0xff] }
  0x74   :  { %299 = vmatprep.mubr.f32.mxu1 %v7068_v0  ;;  %7138 = vst [vmem:[#allocation28_spill] sm:$0xff] %v6046_v21  ;;  %v788_v25 = vld [vmem:[#allocation9 + $0x1e8] sm:$0xff]  ;;  %v787_v31 = vld [vmem:[#allocation9 + $0x1e0] sm:$0xff]  ;;  %v6106_v9 = vpack.c.bf16 %v734_v1, %v730_v63 }
  0x75   :  { %3944 = vmatmul.mubr.msk.f32.gmra.mrb[6].mxu0 %vm186_vm0, %v6005_v2  ;;  %7139 = vst [vmem:[#allocation29_spill] sm:$0xff] %v6060_v27  ;;  %v6063_v28 = vpack.c.bf16 %v788_v25, %v784_v24  ;;  %v792_v32 = vld [vmem:[#allocation11 + $0x8] sm:$0xff]  ;;  %v6077_v36 = vpack.c.bf16 %v787_v31, %v783_v29  ;;  %v791_v42 = vld [vmem:[#allocation11] sm:$0xff] }
  0x76   :  { %4191 = vmatpush1.bf16.msra.mxu0 %v6009_v3  ;;  %525 = vmatprep.mubr.f32.mxu0 %v7068_v0  ;;  %v796_v33 = vld [vmem:[#allocation11 + $0x28] sm:$0xff]  ;;  %v795_v43 = vld [vmem:[#allocation11 + $0x20] sm:$0xff] }
  0x77   :  { %4193 = vmatprep.subr.bf16.mxu0 %v6012_v6  ;;  %3929 = vmatmul.mubr.msk.f32.gmra.mrb[8].mxu1 %vm186_vm0, %v6022_v12  ;;  %7140 = vst [vmem:[#allocation30_spill] sm:$0xff] %v6063_v28  ;;  %7141 = vst [vmem:[#allocation31_spill] sm:$0xff] %v6077_v36  ;;  %v6080_v41 = vpack.c.bf16 %v796_v33, %v792_v32  ;;  %v800_v48 = vld [vmem:[#allocation11 + $0x48] sm:$0xff]  ;;  %v6090_v51 = vld [vmem:[%s7058_s5] sm:$0xff]  ;;  %v6094_v53 = vpack.c.bf16 %v795_v43, %v791_v42 }
  0x78   :  { %305 = vmatprep.mubr.f32.mxu1 %v7068_v0  ;;  %v804_v50 = vld [vmem:[#allocation11 + $0x68] sm:$0xff]  ;;  %v799_v56 = vld [vmem:[#allocation11 + $0x40] sm:$0xff] }
  0x79   :  { %3945 = vmatmul.mubr.msk.f32.gmra.mrb[8].mxu0 %vm186_vm0, %v6022_v12  ;;  %7142 = vst [vmem:[#allocation32_spill] sm:$0xff] %v6080_v41  ;;  %v6097_v61 = vpack.c.bf16 %v804_v50, %v800_v48  ;;  %v803_v62 = vld [vmem:[#allocation11 + $0x60] sm:$0xff]  ;;  %v808_v4 = vld [vmem:[#allocation11 + $0x88] sm:$0xff] }
  0x7a   :  { %4195 = vmatpush1.bf16.msra.mxu0 %v6026_v13  ;;  %531 = vmatprep.mubr.f32.mxu0 %v7068_v0  ;;  %v812_v5 = vld [vmem:[#allocation11 + $0xa8] sm:$0xff]  ;;  %v6104_v8 = vpack.c.bf16 %v803_v62, %v799_v56  ;;  %v807_v11 = vld [vmem:[#allocation11 + $0x80] sm:$0xff] }
  0x7b   :  { %4197 = vmatprep.subr.bf16.mxu0 %v6029_v14  ;;  %3930 = vmatmul.mubr.msk.f32.gmra.mrb[10].mxu1 %vm186_vm0, %v6039_v19  ;;  %v6109_v10 = vpack.c.bf16 %v812_v5, %v808_v4  ;;  %v811_v15 = vld [vmem:[#allocation11 + $0xa0] sm:$0xff]  ;;  %v816_v16 = vld [vmem:[#allocation11 + $0xc8] sm:$0xff] }
  0x7c   :  { %311 = vmatprep.mubr.f32.mxu1 %v7068_v0  ;;  %v820_v17 = vld [vmem:[#allocation11 + $0xe8] sm:$0xff]  ;;  %v6116_v18 = vpack.c.bf16 %v811_v15, %v807_v11  ;;  %v815_v23 = vld [vmem:[#allocation11 + $0xc0] sm:$0xff]  ;;  %v729_v11 = vld [vmem:[#allocation9 + $0x10] sm:$0xff] }
  0x7d   :  { %3946 = vmatmul.mubr.msk.f32.gmra.mrb[10].mxu0 %vm186_vm0, %v6039_v19  ;;  %v6120_v22 = vpack.c.bf16 %v820_v17, %v816_v16  ;;  %v819_v24 = vld [vmem:[#allocation11 + $0xe0] sm:$0xff]  ;;  %v824_v25 = vld [vmem:[#allocation11 + $0x108] sm:$0xff]  ;;  %v733_v15 = vld [vmem:[#allocation9 + $0x30] sm:$0xff] }
  0x7e   :  { %4199 = vmatpush1.bf16.msra.mxu0 %v6043_v20  ;;  %537 = vmatprep.mubr.f32.mxu0 %v7068_v0  ;;  %v828_v29 = vld [vmem:[#allocation11 + $0x128] sm:$0xff]  ;;  %v6126_v31 = vpack.c.bf16 %v819_v24, %v815_v23  ;;  %v823_v33 = vld [vmem:[#allocation11 + $0x100] sm:$0xff]  ;;  %v738_v17 = vld [vmem:[#allocation9 + $0x58] sm:$0xff]  ;;  %v6168_v24 = vpack.c.bf16 %v733_v15, %v729_v11 }
  0x7f   :  { %4201 = vmatprep.subr.bf16.mxu0 %v6046_v21  ;;  %3931 = vmatmul.mubr.msk.f32.gmra.mrb[12].mxu1 %vm186_vm0, %v6056_v26  ;;  %v6129_v32 = vpack.c.bf16 %v828_v29, %v824_v25  ;;  %v827_v37 = vld [vmem:[#allocation11 + $0x120] sm:$0xff]  ;;  %v832_v39 = vld [vmem:[#allocation11 + $0x148] sm:$0xff]  ;;  %v742_v23 = vld [vmem:[#allocation9 + $0x78] sm:$0xff] }
  0x80   :  { %317 = vmatprep.mubr.f32.mxu1 %v7068_v0  ;;  %v836_v42 = vld [vmem:[#allocation11 + $0x168] sm:$0xff]  ;;  %v6135_v43 = vpack.c.bf16 %v827_v37, %v823_v33  ;;  %v831_v47 = vld [vmem:[#allocation11 + $0x140] sm:$0xff]  ;;  %v6170_v25 = vpack.c.bf16 %v742_v23, %v738_v17  ;;  %v737_v29 = vld [vmem:[#allocation9 + $0x50] sm:$0xff] }
  0x81   :  { %3947 = vmatmul.mubr.msk.f32.gmra.mrb[12].mxu0 %vm186_vm0, %v6056_v26  ;;  %v6138_v44 = vpack.c.bf16 %v836_v42, %v832_v39  ;;  %v835_v48 = vld [vmem:[#allocation11 + $0x160] sm:$0xff]  ;;  %v840_v50 = vld [vmem:[#allocation11 + $0x188] sm:$0xff]  ;;  %v741_v33 = vld [vmem:[#allocation9 + $0x70] sm:$0xff] }
  0x82   :  { %4203 = vmatpush1.bf16.msra.mxu0 %v6060_v27  ;;  %543 = vmatprep.mubr.f32.mxu0 %v7068_v0  ;;  %v6144_v54 = vpack.c.bf16 %v835_v48, %v831_v47  ;;  %v839_v56 = vld [vmem:[#allocation11 + $0x180] sm:$0xff]  ;;  %v848_v62 = vld [vmem:[#allocation11 + $0x1c8] sm:$0xff]  ;;  %v746_v37 = vld [vmem:[#allocation9 + $0x98] sm:$0xff]  ;;  %v6183_v47 = vpack.c.bf16 %v741_v33, %v737_v29 }
  0x83   :  { %4205 = vmatprep.subr.bf16.mxu0 %v6063_v28  ;;  %3932 = vmatmul.mubr.msk.f32.gmra.mrb[14].mxu1 %vm186_vm0, %v6073_v35  ;;  %v852_v63 = vld [vmem:[#allocation11 + $0x1e8] sm:$0xff]  ;;  %v847_v5 = vld [vmem:[#allocation11 + $0x1c0] sm:$0xff]  ;;  %v750_v39 = vld [vmem:[#allocation9 + $0xb8] sm:$0xff] }
  0x84   :  { %388 = vmatprep.mubr.f32.mxu1 %v7068_v0  ;;  %v6156_v4 = vpack.c.bf16 %v852_v63, %v848_v62  ;;  %v6176_v42 = vld [vmem:[%s7058_s5 + $0x8] sm:$0xff]  ;;  %v6186_v48 = vpack.c.bf16 %v750_v39, %v746_v37  ;;  %v753_v63 = vld [vmem:[#allocation9 + $0xd0] sm:$0xff]  ;;  %v766_v11 = vld [vmem:[#allocation9 + $0x138] sm:$0xff] }
  0x85   :  { %3948 = vmatmul.mubr.msk.f32.gmra.mrb[14].mxu0 %vm186_vm0, %v6073_v35  ;;  %v761_v17 = vld [vmem:[#allocation9 + $0x110] sm:$0xff]  ;;  %v770_v29 = vld [vmem:[#allocation9 + $0x158] sm:$0xff] }
  0x86   :  { %4207 = vmatpush1.bf16.msra.mxu0 %v6077_v36  ;;  %929 = vmatprep.mubr.f32.mxu0 %v7068_v0  ;;  %7143 = vst [vmem:[#allocation33_spill] sm:$0xff] %v6186_v48  ;;  %v765_v23 = vld [vmem:[#allocation9 + $0x130] sm:$0xff]  ;;  %v774_v33 = vld [vmem:[#allocation9 + $0x178] sm:$0xff] }
  0x87   :  { %4241 = vmatprep.subr.bf16.mxu0 %v6080_v41  ;;  %3933 = vmatmul.mubr.msk.f32.vlgmr.msra.gmra.mrb[16].mxu1 %vm186_vm0, %v5956_v34  ;;  %v6221_v37 = vpack.c.bf16 %v774_v33, %v770_v29  ;;  %v769_v39 = vld [vmem:[#allocation9 + $0x150] sm:$0xff]  ;;  %v794_v33 = vld [vmem:[#allocation11 + $0x18] sm:$0xff] }
  0x88   :  { %4171 = vmatpush1.bf16.msra.mxu1 %v4170_v52  ;;  %394 = vmatprep.mubr.f32.mxu1 %v7068_v0  ;;  %v844_v52 = vld [vmem:[#allocation11 + $0x1a8] sm:$0xff]  ;;  %v789_v29 = vld [vmem:[#allocation9 + $0x1f0] sm:$0xff] }
  0x89   :  { %930 = vmatmul.mubr.f32.vlgmr.msra.gmra.mrb[16].mxu0 %v6090_v51  ;;  %4173 = vmatprep.subr.bf16.mxu1 %v4172_v60  ;;  %v6147_v55 = vpack.c.bf16 %v844_v52, %v840_v50  ;;  %v843_v60 = vld [vmem:[#allocation11 + $0x1a0] sm:$0xff]  ;;  %v745_v50 = vld [vmem:[#allocation9 + $0x90] sm:$0xff]  ;;  %7149 = vst [vmem:[#allocation39_spill] sm:$0xff] %v6221_v37 }
  0x8a   :  { %4243 = vmatpush1.bf16.msra.mxu0 %v6094_v53  ;;  %1076 = vmatprep.mubr.f32.mxu0 %v7068_v0  ;;  %v6153_v1 = vpack.c.bf16 %v843_v60, %v839_v56  ;;  %v749_v52 = vld [vmem:[#allocation9 + $0xb0] sm:$0xff]  ;;  %v754_v56 = vld [vmem:[#allocation9 + $0xd8] sm:$0xff] }
  0x8b   :  { %4245 = vmatprep.subr.bf16.mxu0 %v6097_v61  ;;  %3934 = vmatmul.mubr.msk.f32.gmra.mrb[18].mxu1 %vm186_vm0, %v5970_v45  ;;  %v758_v60 = vld [vmem:[#allocation9 + $0xf8] sm:$0xff] }
  0x8c   :  { %400 = vmatprep.mubr.f32.mxu1 %v7068_v0  ;;  %4175 = vmatpush1.bf16.msra.mxu1 %v4174_v7  ;;  %v851_v7 = vld [vmem:[#allocation11 + $0x1e0] sm:$0xff]  ;;  %v6199_v62 = vpack.c.bf16 %v758_v60, %v754_v56  ;;  %v782_v56 = vld [vmem:[#allocation9 + $0x1b8] sm:$0xff] }
  0x8d   :  { %4209 = vmatprep.subr.bf16.mxu1 %v6106_v9  ;;  %v6162_v16 = vpack.c.bf16 %v851_v7, %v847_v5  ;;  %v757_v5 = vld [vmem:[#allocation9 + $0xf0] sm:$0xff]  ;;  %v762_v7 = vld [vmem:[#allocation9 + $0x118] sm:$0xff] }
  0x8e   :  { %4247 = vmatpush1.bf16.msra.mxu0 %v6104_v8  ;;  %7145 = vst [vmem:[#allocation35_spill] sm:$0xff] %v6199_v62  ;;  %v6210_v15 = vpack.c.bf16 %v766_v11, %v762_v7  ;;  %v786_v7 = vld [vmem:[#allocation9 + $0x1d8] sm:$0xff] }
  0x8f   :  { %4249 = vmatprep.subr.bf16.mxu0 %v6109_v10  ;;  %3935 = vmatmul.mubr.msk.f32.gmra.mrb[20].mxu1 %vm186_vm0, %v5988_v57  ;;  %v790_v11 = vld [vmem:[#allocation9 + $0x1f8] sm:$0xff] }
  0x90   :  { %406 = vmatprep.mubr.f32.mxu1 %v7068_v0  ;;  %7147 = vst [vmem:[#allocation37_spill] sm:$0xff] %v6210_v15 }
  0x92   :  { %4251 = vmatpush1.bf16.msra.mxu0 %v6116_v18 }
  0x93   :  { %4253 = vmatprep.subr.bf16.mxu0 %v6120_v22  ;;  %3936 = vmatmul.mubr.msk.f32.gmra.mrb[22].mxu1 %vm186_vm0, %v6005_v2 }
  0x94   :  { %412 = vmatprep.mubr.f32.mxu1 %v7068_v0 }
  0x96   :  { %4255 = vmatpush1.bf16.msra.mxu0 %v6126_v31 }
  0x97   :  { %4257 = vmatprep.subr.bf16.mxu0 %v6129_v32  ;;  %3937 = vmatmul.mubr.msk.f32.gmra.mrb[24].mxu1 %vm186_vm0, %v6022_v12 }
  0x98   :  { %418 = vmatprep.mubr.f32.mxu1 %v7068_v0 }
  0x9a   :  { %4259 = vmatpush1.bf16.msra.mxu0 %v6135_v43 }
  0x9b   :  { %4261 = vmatprep.subr.bf16.mxu0 %v6138_v44  ;;  %3938 = vmatmul.mubr.msk.f32.gmra.mrb[26].mxu1 %vm186_vm0, %v6039_v19 }
  0x9c   :  { %424 = vmatprep.mubr.f32.mxu1 %v7068_v0 }
  0x9e   :  { %4263 = vmatpush1.bf16.msra.mxu0 %v6144_v54 }
  0x9f   :  { %4265 = vmatprep.subr.bf16.mxu0 %v6147_v55  ;;  %3939 = vmatmul.mubr.msk.f32.gmra.mrb[28].mxu1 %vm186_vm0, %v6056_v26 }
  0xa0   :  { %430 = vmatprep.mubr.f32.mxu1 %v7068_v0 }
  0xa2   :  { %4267 = vmatpush1.bf16.msra.mxu0 %v6153_v1 }
  0xa3   :  { %4269 = vmatprep.subr.bf16.mxu0 %v6156_v4  ;;  %3940 = vmatmul.mubr.msk.f32.gmra.mrb[30].mxu1 %vm186_vm0, %v6073_v35 }
  0xa4   :  { %614 = vmatprep.mubr.f32.mxu1 %v7068_v0 }
  0xa6   :  { %4271 = vmatpush1.bf16.msra.mxu0 %v6162_v16 }
  0xa7   :  { %4305 = vmatprep.subr.bf16.mxu0 %v5951_v30  ;;  %3949 = vmatmul.mubr.msk.f32.vlgmr.msra.gmra.mrb[32].mxu1 %vm186_vm0, %v5956_v34  ;;  %v6196_v34 = vpack.c.bf16 %v749_v52, %v745_v50  ;;  %v773_v50 = vld [vmem:[#allocation9 + $0x170] sm:$0xff]  ;;  %v778_v52 = vld [vmem:[#allocation9 + $0x198] sm:$0xff] }
  0xa8   :  { %4211 = vmatpush1.bf16.msra.mxu1 %v6168_v24  ;;  %620 = vmatprep.mubr.f32.mxu1 %v7068_v0  ;;  %v6232_v60 = vpack.c.bf16 %v782_v56, %v778_v52  ;;  %v793_v52 = vld [vmem:[#allocation11 + $0x10] sm:$0xff] }
  0xa9   :  { %4213 = vmatprep.subr.bf16.mxu1 %v6170_v25  ;;  %1077 = vmatmul.mubr.f32.vlgmr.msra.gmra.mrb[14].mxu0 %v6176_v42  ;;  %7144 = vst [vmem:[#allocation34_spill] sm:$0xff] %v6196_v34  ;;  %v797_v56 = vld [vmem:[#allocation11 + $0x30] sm:$0xff] }
  0xaa   :  { %4307 = vmatpush1.bf16.msra.mxu0 %v5958_v38  ;;  %1274 = vmatprep.mubr.f32.mxu0 %v7068_v0  ;;  %7151 = vst [vmem:[#allocation41_spill] sm:$0xff] %v6232_v60 }
  0xab   :  { %3950 = vmatmul.mubr.msk.f32.gmra.mrb[34].mxu1 %vm186_vm0, %v5970_v45  ;;  %4309 = vmatprep.subr.bf16.mxu0 %v5961_v40  ;;  %v6207_v45 = vpack.c.bf16 %v757_v5, %v753_v63  ;;  %v777_v63 = vld [vmem:[#allocation9 + $0x190] sm:$0xff] }
  0xac   :  { %4215 = vmatpush1.bf16.msra.mxu1 %v6183_v47  ;;  %626 = vmatprep.mubr.f32.mxu1 %v7068_v0  ;;  %v781_v5 = vld [vmem:[#allocation9 + $0x1b0] sm:$0xff] }
  0xad   :  { %4217 = vmatprep.subr.bf16.mxu1 %v6186_v48  ;;  %7146 = vst [vmem:[#allocation36_spill] sm:$0xff] %v6207_v45 }
  0xae   :  { %4311 = vmatpush1.bf16.msra.mxu0 %v5974_v46 }
  0xaf   :  { %3951 = vmatmul.mubr.msk.f32.gmra.mrb[36].mxu1 %vm186_vm0, %v5988_v57  ;;  %4313 = vmatprep.subr.bf16.mxu0 %v5978_v49  ;;  %v6218_v57 = vpack.c.bf16 %v765_v23, %v761_v17  ;;  %v6243_v17 = vpack.c.bf16 %v790_v11, %v786_v7  ;;  %v785_v23 = vld [vmem:[#allocation9 + $0x1d0] sm:$0xff] }
  0xb0   :  { %4219 = vmatpush1.bf16.msra.mxu1 %v6196_v34  ;;  %632 = vmatprep.mubr.f32.mxu1 %v7068_v0  ;;  %v801_v11 = vld [vmem:[#allocation11 + $0x50] sm:$0xff] }
  0xb1   :  { %4221 = vmatprep.subr.bf16.mxu1 %v6199_v62  ;;  %7148 = vst [vmem:[#allocation38_spill] sm:$0xff] %v6218_v57  ;;  %7153 = vst [vmem:[#allocation43_spill] sm:$0xff] %v6243_v17 }
  0xb2   :  { %4315 = vmatpush1.bf16.msra.mxu0 %v5992_v58 }
  0xb3   :  { %3952 = vmatmul.mubr.msk.f32.gmra.mrb[38].mxu1 %vm186_vm0, %v6005_v2  ;;  %4317 = vmatprep.subr.bf16.mxu0 %v5995_v59  ;;  %v6229_v2 = vpack.c.bf16 %v773_v50, %v769_v39  ;;  %v798_v39 = vld [vmem:[#allocation11 + $0x38] sm:$0xff] }
  0xb4   :  { %4223 = vmatpush1.bf16.msra.mxu1 %v6207_v45  ;;  %638 = vmatprep.mubr.f32.mxu1 %v7068_v0  ;;  %v6254_v50 = vpack.c.bf16 %v798_v39, %v794_v33  ;;  %v814_v33 = vld [vmem:[#allocation11 + $0xb8] sm:$0xff] }
  0xb5   :  { %4225 = vmatprep.subr.bf16.mxu1 %v6210_v15  ;;  %7150 = vst [vmem:[#allocation40_spill] sm:$0xff] %v6229_v2 }
  0xb6   :  { %4319 = vmatpush1.bf16.msra.mxu0 %v6009_v3  ;;  %7155 = vst [vmem:[#allocation45_spill] sm:$0xff] %v6254_v50  ;;  %v853_v3 = vld [vmem:[#allocation11 + $0x1f0] sm:$0xff] }
  0xb7   :  { %3953 = vmatmul.mubr.msk.f32.gmra.mrb[40].mxu1 %vm186_vm0, %v6022_v12  ;;  %4321 = vmatprep.subr.bf16.mxu0 %v6012_v6  ;;  %v6240_v12 = vpack.c.bf16 %v781_v5, %v777_v63  ;;  %v802_v63 = vld [vmem:[#allocation11 + $0x58] sm:$0xff]  ;;  %v849_v6 = vld [vmem:[#allocation11 + $0x1d0] sm:$0xff] }
  0xb8   :  { %4227 = vmatpush1.bf16.msra.mxu1 %v6218_v57  ;;  %644 = vmatprep.mubr.f32.mxu1 %v7068_v0  ;;  %v806_v5 = vld [vmem:[#allocation11 + $0x78] sm:$0xff] }
  0xb9   :  { %4229 = vmatprep.subr.bf16.mxu1 %v6221_v37  ;;  %7152 = vst [vmem:[#allocation42_spill] sm:$0xff] %v6240_v12  ;;  %v6265_v7 = vpack.c.bf16 %v806_v5, %v802_v63  ;;  %v818_v63 = vld [vmem:[#allocation11 + $0xd8] sm:$0xff] }
  0xba   :  { %4323 = vmatpush1.bf16.msra.mxu0 %v6026_v13  ;;  %v822_v5 = vld [vmem:[#allocation11 + $0xf8] sm:$0xff]  ;;  %v845_v13 = vld [vmem:[#allocation11 + $0x1b0] sm:$0xff] }
  0xbb   :  { %3954 = vmatmul.mubr.msk.f32.gmra.mrb[42].mxu1 %vm186_vm0, %v6039_v19  ;;  %4325 = vmatprep.subr.bf16.mxu0 %v6029_v14  ;;  %v6251_v19 = vpack.c.bf16 %v789_v29, %v785_v23  ;;  %v805_v23 = vld [vmem:[#allocation11 + $0x70] sm:$0xff]  ;;  %v810_v29 = vld [vmem:[#allocation11 + $0x98] sm:$0xff] }
  0xbc   :  { %4231 = vmatpush1.bf16.msra.mxu1 %v6229_v2  ;;  %650 = vmatprep.mubr.f32.mxu1 %v7068_v0  ;;  %v6275_v39 = vpack.c.bf16 %v814_v33, %v810_v29  ;;  %v841_v14 = vld [vmem:[#allocation11 + $0x190] sm:$0xff] }
  0xbd   :  { %4233 = vmatprep.subr.bf16.mxu1 %v6232_v60  ;;  %7154 = vst [vmem:[#allocation44_spill] sm:$0xff] %v6251_v19 }
  0xbe   :  { %4327 = vmatpush1.bf16.msra.mxu0 %v6043_v20  ;;  %v837_v20 = vld [vmem:[#allocation11 + $0x170] sm:$0xff] }
  0xbf   :  { %3955 = vmatmul.mubr.msk.f32.gmra.mrb[44].mxu1 %vm186_vm0, %v6056_v26  ;;  %4329 = vmatprep.subr.bf16.mxu0 %v6046_v21  ;;  %v6262_v26 = vpack.c.bf16 %v797_v56, %v793_v52  ;;  %v809_v52 = vld [vmem:[#allocation11 + $0x90] sm:$0xff] }
  0xc0   :  { %4235 = vmatpush1.bf16.msra.mxu1 %v6240_v12  ;;  %656 = vmatprep.mubr.f32.mxu1 %v7068_v0  ;;  %v813_v56 = vld [vmem:[#allocation11 + $0xb0] sm:$0xff] }
  0xc1   :  { %4237 = vmatprep.subr.bf16.mxu1 %v6243_v17  ;;  %v833_v21 = vld [vmem:[#allocation11 + $0x150] sm:$0xff] }
  0xc2   :  { %4331 = vmatpush1.bf16.msra.mxu0 %v6060_v27  ;;  %v829_v27 = vld [vmem:[#allocation11 + $0x130] sm:$0xff] }
  0xc3   :  { %3956 = vmatmul.mubr.msk.f32.gmra.mrb[46].mxu1 %vm186_vm0, %v6073_v35  ;;  %4333 = vmatprep.subr.bf16.mxu0 %v6063_v28  ;;  %v6271_v35 = vpack.c.bf16 %v805_v23, %v801_v11  ;;  %v817_v11 = vld [vmem:[#allocation11 + $0xd0] sm:$0xff] }
  0xc4   :  { %4239 = vmatpush1.bf16.msra.mxu1 %v6251_v19  ;;  %1000 = vmatprep.mubr.f32.mxu1 %v7068_v0  ;;  %v821_v23 = vld [vmem:[#allocation11 + $0xf0] sm:$0xff] }
  0xc5   :  { %4273 = vmatprep.subr.bf16.mxu1 %v6254_v50  ;;  %v6284_v29 = vpack.c.bf16 %v821_v23, %v817_v11  ;;  %v825_v28 = vld [vmem:[#allocation11 + $0x110] sm:$0xff]  ;;  %v842_v11 = vld [vmem:[#allocation11 + $0x198] sm:$0xff] }
  0xc6   :  { %4335 = vmatpush1.bf16.msra.mxu0 %v6077_v36  ;;  %v6278_v36 = vpack.c.bf16 %v813_v56, %v809_v52  ;;  %v834_v52 = vld [vmem:[#allocation11 + $0x158] sm:$0xff] }
  0xc7   :  { %1001 = vmatmul.mubr.f32.vlgmr.msra.gmra.mrb[16].mxu1 %v6090_v51  ;;  %4369 = vmatprep.subr.bf16.mxu0 %v6080_v41  ;;  %v6281_v51 = vpack.c.bf16 %v822_v5, %v818_v63  ;;  %v826_v41 = vld [vmem:[#allocation11 + $0x118] sm:$0xff]  ;;  %v6290_v63 = vpack.c.bf16 %v829_v27, %v825_v28 }
  0xc8   :  { %4275 = vmatpush1.bf16.msra.mxu1 %v6262_v26  ;;  %1147 = vmatprep.mubr.f32.mxu1 %v7068_v0  ;;  %v830_v0 = vld [vmem:[#allocation11 + $0x138] sm:$0xff] }
  0xc9   :  { %4277 = vmatprep.subr.bf16.mxu1 %v6265_v7  ;;  %v6287_v33 = vpack.c.bf16 %v830_v0, %v826_v41  ;;  %v838_v56 = vld [vmem:[#allocation11 + $0x178] sm:$0xff]  ;;  %v6296_v0 = vpack.c.bf16 %v837_v20, %v833_v21  ;;  %v6308_v20 = vpack.c.bf16 %v853_v3, %v849_v6  ;;  %v146_v3 = vlaneseq  ;;  %v6337_v21 = vld [vmem:[%s7055_s2] sm:$0xff] }
  0xca   :  { %v6293_v5 = vpack.c.bf16 %v838_v56, %v834_v52  ;;  %v846_v23 = vld [vmem:[#allocation11 + $0x1b8] sm:$0xff]  ;;  %v6302_v52 = vpack.c.bf16 %v845_v13, %v841_v14  ;;  %v7156_v13 = vmov 0.0  }
  0xcb   :  { %v6299_v41 = vpack.c.bf16 %v846_v23, %v842_v11  ;;  %v850_v27 = vld [vmem:[#allocation11 + $0x1d8] sm:$0xff]  ;;  %v6331_v6 = vshrl.u32 %v146_v3, 7 }
  0xcc   :  { %4279 = vmatpush1.bf16.msra.mxu1 %v6271_v35  ;;  %v854_v28 = vld [vmem:[#allocation11 + $0x1f8] sm:$0xff] }
  0xcd   :  { %4281 = vmatprep.subr.bf16.mxu1 %v6275_v39  ;;  %v6305_v56 = vpack.c.bf16 %v854_v28, %v850_v27  ;;  %v148_v14 = vsub.s32 0, %v6331_v6  ;;  %v152_v11 = vsub.s32 1, %v6331_v6 }
  0xcf   :  { %v149_v27 = vrot.slane %v6337_v21, %v148_v14  ;;  %v153_v28 = vrot.slane %v6337_v21, %v152_v11 }
  0xd0   :  { %4283 = vmatpush1.bf16.msra.mxu1 %v6278_v36 }
  0xd1   :  { %4285 = vmatprep.subr.bf16.mxu1 %v6281_v51 }
  0xd4   :  { %4287 = vmatpush1.bf16.msra.mxu1 %v6284_v29 }
  0xd5   :  { %4289 = vmatprep.subr.bf16.mxu1 %v6287_v33 }
  0xd8   :  { %4291 = vmatpush1.bf16.msra.mxu1 %v6290_v63 }
  0xd9   :  { %4293 = vmatprep.subr.bf16.mxu1 %v6293_v5 }
  0xdc   :  { %4295 = vmatpush1.bf16.msra.mxu1 %v6296_v0 }
  0xdd   :  { %4297 = vmatprep.subr.bf16.mxu1 %v6299_v41 }
  0xe0   :  { %4299 = vmatpush1.bf16.msra.mxu1 %v6302_v52 }
  0xe1   :  { %4301 = vmatprep.subr.bf16.mxu1 %v6305_v56 }
  0xe4   :  { %4303 = vmatpush1.bf16.msra.mxu1 %v6308_v20 }
  0xe5   :  { %4337 = vmatprep.subr.bf16.mxu1 %v6106_v9 }
  0xe7   :  { %1148 = vmatmul.mubr.f32.vlgmr.msra.gmra.mrb[46].mxu1 %v6176_v42 }
  0xe8   :  { %4339 = vmatpush1.bf16.msra.mxu1 %v6168_v24  ;;  %1345 = vmatprep.mubr.f32.mxu1 %v7156_v13 }
  0xe9   :  { %4341 = vmatprep.subr.bf16.mxu1 %v6170_v25 }
  0xec   :  { %4343 = vmatpush1.bf16.msra.mxu1 %v6183_v47 }
  0xed   :  { %4345 = vmatprep.subr.bf16.mxu1 %v6186_v48 }
  0xf0   :  { %4347 = vmatpush1.bf16.msra.mxu1 %v6196_v34 }
  0xf1   :  { %4349 = vmatprep.subr.bf16.mxu1 %v6199_v62 }
  0xf4   :  { %4351 = vmatpush1.bf16.msra.mxu1 %v6207_v45 }
  0xf5   :  { %4353 = vmatprep.subr.bf16.mxu1 %v6210_v15 }
  0xf8   :  { %4355 = vmatpush1.bf16.msra.mxu1 %v6218_v57 }
  0xf9   :  { %4357 = vmatprep.subr.bf16.mxu1 %v6221_v37 }
  0xfc   :  { %4359 = vmatpush1.bf16.msra.mxu1 %v6229_v2 }
  0xfd   :  { %4361 = vmatprep.subr.bf16.mxu1 %v6232_v60 }
 0x100   :  { %4363 = vmatpush1.bf16.msra.mxu1 %v6240_v12 }
 0x101   :  { %4365 = vmatprep.subr.bf16.mxu1 %v6243_v17 }
 0x104   :  { %4367 = vmatpush1.bf16.msra.mxu1 %v6251_v19 }
 0x105   :  { %4401 = vmatprep.subr.bf16.mxu1 %v6254_v50 }
 0x13a   :  { %v277_v42 = vpop.f32.mrb[0].mxu1 }
 0x13b   :  { %v279_v23 = vpop.f32.mrb[1].mxu1 }
 0x13e   :  { %v283_v19 = vpop.f32.mrb[2].mxu1 }
 0x13f   :  { %v6342_v50 = vadd.f32 %v283_v19, %v149_v27  ;;  %v285_v3 = vpop.f32.mrb[3].mxu1 }
 0x140   :  { %v6344_v17 = vadd.f32 %v285_v3, %v153_v28 }
 0x141   :  { %7157 = vst [vmem:[#allocation46_spill] sm:$0xff] %v6342_v50 }
 0x142   :  { %7158 = vst [vmem:[#allocation47_spill] sm:$0xff] %v6344_v17  ;;  %v289_v12 = vpop.f32.mrb[4].mxu1 }
 0x143   :  { %v6346_v60 = vadd.f32 %v289_v12, %v149_v27  ;;  %v291_v2 = vpop.f32.mrb[5].mxu1 }
 0x144   :  { %v6348_v37 = vadd.f32 %v291_v2, %v153_v28 }
 0x145   :  { %7159 = vst [vmem:[#allocation48_spill] sm:$0xff] %v6346_v60 }
 0x146   :  { %7160 = vst [vmem:[#allocation49_spill] sm:$0xff] %v6348_v37  ;;  %v295_v57 = vpop.f32.mrb[6].mxu1 }
 0x147   :  { %v6350_v15 = vadd.f32 %v295_v57, %v149_v27  ;;  %v297_v45 = vpop.f32.mrb[7].mxu1 }
 0x148   :  { %v6352_v62 = vadd.f32 %v297_v45, %v153_v28 }
 0x149   :  { %7161 = vst [vmem:[#allocation50_spill] sm:$0xff] %v6350_v15 }
 0x14a   :  { %7162 = vst [vmem:[#allocation51_spill] sm:$0xff] %v6352_v62  ;;  %v301_v14 = vpop.f32.mrb[8].mxu1 }
 0x14b   :  { %v6354_v11 = vadd.f32 %v301_v14, %v149_v27  ;;  %v303_v19 = vpop.f32.mrb[9].mxu1 }
 0x14c   :  { %v6356_v50 = vadd.f32 %v303_v19, %v153_v28  ;;  %v278_v19 = vadd.f32 %v277_v42, %v149_v27 }
 0x14d   :  { %7163 = vst [vmem:[#allocation52_spill] sm:$0xff] %v6354_v11 }
 0x14e   :  { %7164 = vst [vmem:[#allocation53_spill] sm:$0xff] %v6356_v50  ;;  %v307_v3 = vpop.f32.mrb[10].mxu1  ;;  %v280_v50 = vadd.f32 %v279_v23, %v153_v28 }
 0x14f   :  { %v6358_v17 = vadd.f32 %v307_v3, %v149_v27  ;;  %v309_v12 = vpop.f32.mrb[11].mxu1 }
 0x150   :  { %v6360_v60 = vadd.f32 %v309_v12, %v153_v28 }
 0x151   :  { %7165 = vst [vmem:[#allocation54_spill] sm:$0xff] %v6358_v17 }
 0x152   :  { %7166 = vst [vmem:[#allocation55_spill] sm:$0xff] %v6360_v60  ;;  %v313_v2 = vpop.f32.mrb[12].mxu1 }
 0x153   :  { %v6362_v37 = vadd.f32 %v313_v2, %v149_v27  ;;  %v315_v57 = vpop.f32.mrb[13].mxu1 }
 0x154   :  { %v6364_v15 = vadd.f32 %v315_v57, %v153_v28  ;;  %v156_v57 = vsub.s32 2, %v6331_v6 }
 0x155   :  { %7167 = vst [vmem:[#allocation56_spill] sm:$0xff] %v6362_v37 }
 0x156   :  { %7168 = vst [vmem:[#allocation57_spill] sm:$0xff] %v6364_v15  ;;  %v319_v45 = vpop.f32.mrb[14].mxu1  ;;  %v6373_v42 = vrot.slane %v6337_v21, %v156_v57 }
 0x157   :  { %v6366_v62 = vadd.f32 %v319_v45, %v149_v27  ;;  %v321_v14 = vpop.f32.mrb[15].mxu1  ;;  %v160_v45 = vsub.s32 3, %v6331_v6 }
 0x158   :  { %v6368_v11 = vadd.f32 %v321_v14, %v153_v28 }
 0x159   :  { %7169 = vst [vmem:[#allocation58_spill] sm:$0xff] %v6366_v62 }
 0x15a   :  { %7170 = vst [vmem:[#allocation59_spill] sm:$0xff] %v6368_v11  ;;  %v176_v11 = vsub.s32 7, %v6331_v6 }
 0x15c   :  { %v931_v59 = vpop.f32.mrb[16].mxu0 }
 0x15d   :  { %v932_v3 = vadd.f32 %v931_v59, %v278_v19  ;;  %v933_v17 = vpop.f32.mrb[17].mxu0  ;;  %v6376_v59 = vrot.slane %v6337_v21, %v160_v45  ;;  %v856_v45 = vld [vmem:[%s7059_s6] sm:$0xff] }
 0x15e   :  { %v934_v34 = vadd.f32 %v933_v17, %v280_v50  ;;  %v168_v17 = vsub.s32 5, %v6331_v6 }
 0x15f   :  { %v3959_v2 = vmul.f32 -1.442695, %v932_v3 }
 0x160   :  { %v3960_v58 = vmul.f32 -1.442695, %v934_v34 }
 0x162   :  { %5413 = vpow2.f32 %v3960_v58  ;;  %v164_v58 = vsub.s32 4, %v6331_v6 }
 0x163   :  { %5415 = vpow2.f32 %v3959_v2 }
 0x164   :  { %v6386_v19 = vrot.slane %v6337_v21, %v164_v58 }
 0x16c   :  { %v5414_v15 = vpop.eup %5413 }
 0x16d   :  { %v5416_v62 = vpop.eup %5415  ;;  %v1163_v14 = vadd.f32 1.0, %v5414_v15  ;;  %v6383_v15 = vrot.slane %v6337_v21, %v168_v17 }
 0x16e   :  { %v1157_v23 = vadd.f32 1.0, %v5416_v62 }
 0x16f   :  { %5417 = vrcp.f32 %v1163_v14  ;;  %7171 = vst [vmem:[#allocation60_spill] sm:$0xff] %v6383_v15 }
 0x170   :  { %5419 = vrcp.f32 %v1157_v23 }
 0x179   :  { %v5418_v57 = vpop.eup %5417 }
 0x17a   :  { %v5420_v14 = vpop.eup %5419  ;;  %v1173_v17 = vmul.f32 %v5418_v57, %v856_v45 }
 0x17c   :  { %v1078_v12 = vpop.f32.mrb[14].mxu0 }
 0x17d   :  { %v1080_v60 = vpop.f32.mrb[15].mxu0  ;;  %v5326_v2 = vadd.f32 %v1078_v12, %v6386_v19 }
 0x17e   :  { %v5327_v3 = vadd.f32 %v1080_v60, %v6383_v15  ;;  %v172_v60 = vsub.s32 6, %v6331_v6 }
 0x180   :  { %v3963_v23 = vmul.f32 -1.442695, %v5327_v3  ;;  %v6399_v57 = vrot.slane %v6337_v21, %v172_v60 }
 0x19a   :  { %v1002_v34 = vpop.f32.mrb[16].mxu1 }
 0x19b   :  { %v5296_v50 = vadd.f32 %v1002_v34, %v6373_v42  ;;  %v1004_v27 = vpop.f32.mrb[17].mxu1 }
 0x19c   :  { %v5297_v28 = vadd.f32 %v1004_v27, %v6376_v59 }
 0x19d   :  { %5421 = vtanh.f32 %v5296_v50  ;;  %v3962_v50 = vmul.f32 -1.442695, %v5326_v2 }
 0x19e   :  { %v3961_v62 = vmul.f32 -1.442695, %v5297_v28 }
 0x1a0   :  { %5423 = vpow2.f32 %v3961_v62 }
 0x1a1   :  { %5425 = vpow2.f32 %v3963_v23 }
 0x1a2   :  { %5427 = vpow2.f32 %v3962_v50 }
 0x1a7   :  { %v5422_v34 = vpop.eup %5421 }
 0x1a8   :  { %v1174_v27 = vmul.f32 %v5422_v34, %v5420_v14  ;;  %v6402_v14 = vrot.slane %v6337_v21, %v176_v11 }
 0x1aa   :  { %v5424_v28 = vpop.eup %5423  ;;  %v6393_v58 = vadd.f32 %v1174_v27, %v1173_v17 }
 0x1ab   :  { %v1170_v62 = vadd.f32 1.0, %v5424_v28  ;;  %v5426_v12 = vpop.eup %5425 }
 0x1ac   :  { %5429 = vtanh.f32 %v6393_v58  ;;  %v5428_v37 = vpop.eup %5427  ;;  %v1187_v2 = vadd.f32 1.0, %v5426_v12 }
 0x1ad   :  { %5431 = vrcp.f32 %v1170_v62  ;;  %v1181_v45 = vadd.f32 1.0, %v5428_v37 }
 0x1ae   :  { %5433 = vrcp.f32 %v1187_v2 }
 0x1af   :  { %5435 = vrcp.f32 %v1181_v45 }
 0x1b6   :  { %v5430_v3 = vpop.eup %5429 }
 0x1b7   :  { %v5432_v15 = vpop.eup %5431 }
 0x1b8   :  { %v6404_v23 = vmul.f32 %v5432_v15, %v5430_v3  ;;  %v5434_v11 = vpop.eup %5433  ;;  %v3958_v15 = vld [vmem:[%s7059_s6 + $0x8] sm:$0xff] }
 0x1b9   :  { %v5436_v17 = vpop.eup %5435  ;;  %v1197_v28 = vmul.f32 %v5434_v11, %v3958_v15  ;;  %v7178_v11 = vld [vmem:[#allocation23_spill] sm:$0xff]  ;;  %v7179_v15 = vld [vmem:[#allocation36_spill] sm:$0xff] }
 0x1ba   :  { %7172 = vst [vmem:[#allocation61_spill] sm:$0xff] %v6404_v23  ;;  %v1149_v34 = vpop.f32.mrb[46].mxu1  ;;  %1275 = vmatmul.mubr.f32.vlgmr.msra.gmra.mrb[18].mxu0 %v6404_v23  ;;  %1346 = vmatmul.mubr.f32.vlgmr.msra.gmra.mrb[18].mxu1 %v6404_v23  ;;  %v7188_v23 = vld [vmem:[#allocation28_spill] sm:$0xff] }
 0x1bb   :  { %v5342_v6 = vadd.f32 %v1149_v34, %v6399_v57  ;;  %v1151_v50 = vpop.f32.mrb[47].mxu1  ;;  %4371 = vmatpush1.bf16.msra.mxu0 %v6094_v53  ;;  %4403 = vmatpush1.bf16.msra.mxu1 %v6262_v26 }
 0x1bc   :  { %v5343_v37 = vadd.f32 %v1151_v50, %v6402_v14  ;;  %4373 = vmatprep.subr.bf16.mxu0 %v6097_v61  ;;  %4405 = vmatprep.subr.bf16.mxu1 %v6265_v7  ;;  %v7175_v50 = vld [vmem:[#allocation34_spill] sm:$0xff] }
 0x1bd   :  { %5437 = vtanh.f32 %v5342_v6  ;;  %1421 = vmatprep.mubr.f32.mxu0 %v7156_v13  ;;  %1492 = vmatprep.mubr.f32.mxu1 %v7156_v13  ;;  %v7174_v6 = vld [vmem:[#allocation21_spill] sm:$0xff] }
 0x1be   :  { %v3964_v21 = vmul.f32 -1.442695, %v5343_v37  ;;  %v7176_v37 = vld [vmem:[#allocation22_spill] sm:$0xff] }
 0x1bf   :  { %4375 = vmatpush1.bf16.msra.mxu0 %v6104_v8  ;;  %4407 = vmatpush1.bf16.msra.mxu1 %v6271_v35 }
 0x1c0   :  { %5439 = vpow2.f32 %v3964_v21  ;;  %4377 = vmatprep.subr.bf16.mxu0 %v6109_v10  ;;  %4409 = vmatprep.subr.bf16.mxu1 %v6275_v39  ;;  %v7177_v21 = vld [vmem:[#allocation35_spill] sm:$0xff] }
 0x1c3   :  { %4379 = vmatpush1.bf16.msra.mxu0 %v6116_v18  ;;  %4411 = vmatpush1.bf16.msra.mxu1 %v6278_v36 }
 0x1c4   :  { %4381 = vmatprep.subr.bf16.mxu0 %v6120_v22  ;;  %4413 = vmatprep.subr.bf16.mxu1 %v6281_v51 }
 0x1c7   :  { %v5438_v27 = vpop.eup %5437  ;;  %4383 = vmatpush1.bf16.msra.mxu0 %v6126_v31  ;;  %4415 = vmatpush1.bf16.msra.mxu1 %v6284_v29 }
 0x1c8   :  { %v1198_v62 = vmul.f32 %v5438_v27, %v5436_v17  ;;  %4385 = vmatprep.subr.bf16.mxu0 %v6129_v32  ;;  %4417 = vmatprep.subr.bf16.mxu1 %v6287_v33  ;;  %v7180_v17 = vld [vmem:[#allocation24_spill] sm:$0xff]  ;;  %v7181_v27 = vld [vmem:[#allocation37_spill] sm:$0xff] }
 0x1ca   :  { %v5440_v60 = vpop.eup %5439  ;;  %v6431_v12 = vadd.f32 %v1198_v62, %v1197_v28  ;;  %v7182_v28 = vld [vmem:[#allocation25_spill] sm:$0xff]  ;;  %v7183_v62 = vld [vmem:[#allocation38_spill] sm:$0xff] }
 0x1cb   :  { %v1194_v3 = vadd.f32 1.0, %v5440_v60  ;;  %4387 = vmatpush1.bf16.msra.mxu0 %v6135_v43  ;;  %4419 = vmatpush1.bf16.msra.mxu1 %v6290_v63  ;;  %v7184_v60 = vld [vmem:[#allocation26_spill] sm:$0xff] }
 0x1cc   :  { %5441 = vtanh.f32 %v6431_v12  ;;  %4389 = vmatprep.subr.bf16.mxu0 %v6138_v44  ;;  %4421 = vmatprep.subr.bf16.mxu1 %v6293_v5 }
 0x1cd   :  { %5443 = vrcp.f32 %v1194_v3  ;;  %v7185_v3 = vld [vmem:[#allocation39_spill] sm:$0xff] }
 0x1cf   :  { %4391 = vmatpush1.bf16.msra.mxu0 %v6144_v54  ;;  %4423 = vmatpush1.bf16.msra.mxu1 %v6296_v0 }
 0x1d0   :  { %4393 = vmatprep.subr.bf16.mxu0 %v6147_v55  ;;  %4425 = vmatprep.subr.bf16.mxu1 %v6299_v41 }
 0x1d3   :  { %4395 = vmatpush1.bf16.msra.mxu0 %v6153_v1  ;;  %4427 = vmatpush1.bf16.msra.mxu1 %v6302_v52 }
 0x1d4   :  { %4397 = vmatprep.subr.bf16.mxu0 %v6156_v4  ;;  %4429 = vmatprep.subr.bf16.mxu1 %v6305_v56 }
 0x1d6   :  { %v5442_v2 = vpop.eup %5441 }
 0x1d7   :  { %v5444_v45 = vpop.eup %5443  ;;  %4399 = vmatpush1.bf16.msra.mxu0 %v6162_v16  ;;  %4431 = vmatpush1.bf16.msra.mxu1 %v6308_v20 }
 0x1d8   :  { %v6448_v34 = vmul.f32 %v5444_v45, %v5442_v2  ;;  %4433 = vmatprep.subr.bf16.mxu0 %v5951_v30  ;;  %4465 = vmatprep.subr.bf16.mxu1 %v6106_v9  ;;  %v7186_v2 = vld [vmem:[#allocation27_spill] sm:$0xff]  ;;  %v7187_v45 = vld [vmem:[#allocation40_spill] sm:$0xff] }
 0x1da   :  { %7173 = vst [vmem:[#allocation62_spill] sm:$0xff] %v6448_v34  ;;  %1422 = vmatmul.mubr.f32.vlgmr.msra.gmra.mrb[12].mxu0 %v6448_v34  ;;  %1493 = vmatmul.mubr.f32.vlgmr.msra.gmra.mrb[44].mxu1 %v6448_v34  ;;  %v7189_v34 = vld [vmem:[#allocation41_spill] sm:$0xff] }
 0x1db   :  { %4435 = vmatpush1.bf16.msra.mxu0 %v5958_v38  ;;  %4467 = vmatpush1.bf16.msra.mxu1 %v6168_v24 }
 0x1dc   :  { %4437 = vmatprep.subr.bf16.mxu0 %v5961_v40  ;;  %4469 = vmatprep.subr.bf16.mxu1 %v6170_v25 }
 0x1dd   :  { %1620 = vmatprep.mubr.f32.mxu0 %v7156_v13  ;;  %1691 = vmatprep.mubr.f32.mxu1 %v7156_v13 }
 0x1df   :  { %4439 = vmatpush1.bf16.msra.mxu0 %v5974_v46  ;;  %4471 = vmatpush1.bf16.msra.mxu1 %v6183_v47 }
 0x1e0   :  { %4441 = vmatprep.subr.bf16.mxu0 %v5978_v49  ;;  %4473 = vmatprep.subr.bf16.mxu1 %v6186_v48 }
 0x1e3   :  { %4443 = vmatpush1.bf16.msra.mxu0 %v7174_v6  ;;  %4475 = vmatpush1.bf16.msra.mxu1 %v7175_v50 }
 0x1e4   :  { %4445 = vmatprep.subr.bf16.mxu0 %v7176_v37  ;;  %4477 = vmatprep.subr.bf16.mxu1 %v7177_v21  ;;  %v7199_v37 = vld [vmem:[#allocation47_spill] sm:$0xff] }
 0x1e7   :  { %4447 = vmatpush1.bf16.msra.mxu0 %v7178_v11  ;;  %4479 = vmatpush1.bf16.msra.mxu1 %v7179_v15  ;;  %v7190_v15 = vld [vmem:[#allocation29_spill] sm:$0xff]  ;;  %v7198_v11 = vld [vmem:[#allocation46_spill] sm:$0xff] }
 0x1e8   :  { %4449 = vmatprep.subr.bf16.mxu0 %v7180_v17  ;;  %4481 = vmatprep.subr.bf16.mxu1 %v7181_v27  ;;  %v7191_v17 = vld [vmem:[#allocation42_spill] sm:$0xff] }
 0x1e9   :  { %v7192_v27 = vld [vmem:[#allocation30_spill] sm:$0xff] }
 0x1eb   :  { %4451 = vmatpush1.bf16.msra.mxu0 %v7182_v28  ;;  %4483 = vmatpush1.bf16.msra.mxu1 %v7183_v62  ;;  %v7193_v28 = vld [vmem:[#allocation43_spill] sm:$0xff] }
 0x1ec   :  { %4453 = vmatprep.subr.bf16.mxu0 %v7184_v60  ;;  %4485 = vmatprep.subr.bf16.mxu1 %v7185_v3  ;;  %v7194_v62 = vld [vmem:[#allocation31_spill] sm:$0xff]  ;;  %v7195_v60 = vld [vmem:[#allocation44_spill] sm:$0xff] }
 0x1ed   :  { %v7196_v3 = vld [vmem:[#allocation32_spill] sm:$0xff] }
 0x1ef   :  { %4455 = vmatpush1.bf16.msra.mxu0 %v7186_v2  ;;  %4487 = vmatpush1.bf16.msra.mxu1 %v7187_v45  ;;  %v7197_v2 = vld [vmem:[#allocation45_spill] sm:$0xff] }
 0x1f0   :  { %4457 = vmatprep.subr.bf16.mxu0 %v7188_v23  ;;  %4489 = vmatprep.subr.bf16.mxu1 %v7189_v34 }
 0x1f3   :  { %4459 = vmatpush1.bf16.msra.mxu0 %v7190_v15  ;;  %4491 = vmatpush1.bf16.msra.mxu1 %v7191_v17 }
 0x1f4   :  { %4461 = vmatprep.subr.bf16.mxu0 %v7192_v27  ;;  %4493 = vmatprep.subr.bf16.mxu1 %v7193_v28 }
 0x1f7   :  { %4463 = vmatpush1.bf16.msra.mxu0 %v7194_v62  ;;  %4495 = vmatpush1.bf16.msra.mxu1 %v7195_v60 }
 0x1f8   :  { %4497 = vmatprep.subr.bf16.mxu0 %v7196_v3  ;;  %4529 = vmatprep.subr.bf16.mxu1 %v7197_v2 }
 0x28d   :  { %v1276_v45 = vpop.f32.mrb[18].mxu0  ;;  %v1347_v23 = vpop.f32.mrb[18].mxu1 }
 0x28e   :  { %v1277_v34 = vadd.f32 %v1276_v45, %v7198_v11  ;;  %v1278_v21 = vpop.f32.mrb[19].mxu0  ;;  %v1349_v15 = vpop.f32.mrb[19].mxu1  ;;  %v5298_v60 = vadd.f32 %v1347_v23, %v6373_v42 }
 0x28f   :  { %v1279_v17 = vadd.f32 %v1278_v21, %v7199_v37  ;;  %v5299_v62 = vadd.f32 %v1349_v15, %v6376_v59 }
 0x290   :  { %v3965_v50 = vmul.f32 -1.442695, %v1277_v34 }
 0x291   :  { %v3966_v27 = vmul.f32 -1.442695, %v1279_v17  ;;  %v3967_v28 = vmul.f32 -1.442695, %v5299_v62 }
 0x292   :  { %5445 = vpow2.f32 %v3965_v50 }
 0x293   :  { %5447 = vpow2.f32 %v3966_v27 }
 0x294   :  { %5449 = vpow2.f32 %v3967_v28 }
 0x295   :  { %5451 = vtanh.f32 %v5298_v60 }
 0x29c   :  { %v5446_v3 = vpop.eup %5445 }
 0x29d   :  { %v5448_v6 = vpop.eup %5447  ;;  %v1502_v2 = vadd.f32 1.0, %v5446_v3 }
 0x29e   :  { %v1508_v48 = vadd.f32 1.0, %v5448_v6  ;;  %v5450_v11 = vpop.eup %5449  ;;  %v7200_v6 = vld [vmem:[#allocation60_spill] sm:$0xff] }
 0x29f   :  { %5453 = vrcp.f32 %v1502_v2  ;;  %v5452_v45 = vpop.eup %5451  ;;  %v1515_v50 = vadd.f32 1.0, %v5450_v11 }
 0x2a0   :  { %5455 = vrcp.f32 %v1508_v48 }
 0x2a1   :  { %5457 = vrcp.f32 %v1515_v50 }
 0x2a9   :  { %v5454_v37 = vpop.eup %5453 }
 0x2aa   :  { %v5456_v34 = vpop.eup %5455  ;;  %v1519_v21 = vmul.f32 %v5454_v37, %v5452_v45 }
 0x2ab   :  { %v1518_v17 = vmul.f32 %v5456_v34, %v6393_v58  ;;  %v5458_v58 = vpop.eup %5457 }
 0x2ad   :  { %v6493_v15 = vadd.f32 %v1519_v21, %v1518_v17  ;;  %v1423_v27 = vpop.f32.mrb[12].mxu0  ;;  %v1494_v23 = vpop.f32.mrb[44].mxu1 }
 0x2ae   :  { %v5324_v62 = vadd.f32 %v1423_v27, %v6386_v19  ;;  %v1425_v28 = vpop.f32.mrb[13].mxu0  ;;  %v1496_v60 = vpop.f32.mrb[45].mxu1  ;;  %v5340_v34 = vadd.f32 %v1494_v23, %v6399_v57 }
 0x2af   :  { %v5325_v3 = vadd.f32 %v1425_v28, %v7200_v6  ;;  %5459 = vtanh.f32 %v6493_v15  ;;  %v5341_v11 = vadd.f32 %v1496_v60, %v6402_v14 }
 0x2b0   :  { %v3968_v48 = vmul.f32 -1.442695, %v5324_v62 }
 0x2b1   :  { %v3969_v2 = vmul.f32 -1.442695, %v5325_v3  ;;  %v3970_v37 = vmul.f32 -1.442695, %v5341_v11 }
 0x2b2   :  { %5461 = vpow2.f32 %v3968_v48 }
 0x2b3   :  { %5463 = vpow2.f32 %v3969_v2 }
 0x2b4   :  { %5465 = vpow2.f32 %v3970_v37 }
 0x2b5   :  { %5467 = vtanh.f32 %v5340_v34  ;;  %v7203_v34 = vld [vmem:[#allocation33_spill] sm:$0xff] }
 0x2b9   :  { %v5460_v45 = vpop.eup %5459 }
 0x2ba   :  { %v6500_v21 = vmul.f32 %v5460_v45, %v5458_v58 }
 0x2bc   :  { %7201 = vst [vmem:[#allocation46_spill] sm:$0xff] %v6500_v21  ;;  %v5462_v50 = vpop.eup %5461  ;;  %1621 = vmatmul.mubr.f32.vlgmr.msra.gmra.mrb[20].mxu0 %v6500_v21  ;;  %1692 = vmatmul.mubr.f32.vlgmr.msra.gmra.mrb[20].mxu1 %v6500_v21  ;;  %v7217_v21 = vld [vmem:[#allocation40_spill] sm:$0xff] }
 0x2bd   :  { %v5464_v17 = vpop.eup %5463  ;;  %v1526_v27 = vadd.f32 1.0, %v5462_v50  ;;  %4499 = vmatpush1.bf16.msra.mxu0 %v6094_v53  ;;  %4531 = vmatpush1.bf16.msra.mxu1 %v6262_v26  ;;  %v7204_v50 = vld [vmem:[#allocation21_spill] sm:$0xff] }
 0x2be   :  { %v1532_v62 = vadd.f32 1.0, %v5464_v17  ;;  %4501 = vmatprep.subr.bf16.mxu0 %v6097_v61  ;;  %4533 = vmatprep.subr.bf16.mxu1 %v6265_v7  ;;  %v5466_v23 = vpop.eup %5465  ;;  %v7205_v17 = vld [vmem:[#allocation34_spill] sm:$0xff] }
 0x2bf   :  { %5469 = vrcp.f32 %v1526_v27  ;;  %1767 = vmatprep.mubr.f32.mxu0 %v7156_v13  ;;  %1838 = vmatprep.mubr.f32.mxu1 %v7156_v13  ;;  %v5468_v28 = vpop.eup %5467  ;;  %v1539_v2 = vadd.f32 1.0, %v5466_v23  ;;  %v7206_v27 = vld [vmem:[#allocation22_spill] sm:$0xff]  ;;  %v7208_v23 = vld [vmem:[#allocation23_spill] sm:$0xff] }
 0x2c0   :  { %5471 = vrcp.f32 %v1532_v62  ;;  %v7207_v62 = vld [vmem:[#allocation35_spill] sm:$0xff] }
 0x2c1   :  { %4503 = vmatpush1.bf16.msra.mxu0 %v6104_v8  ;;  %4535 = vmatpush1.bf16.msra.mxu1 %v6271_v35  ;;  %5473 = vrcp.f32 %v1539_v2  ;;  %v7213_v2 = vld [vmem:[#allocation38_spill] sm:$0xff] }
 0x2c2   :  { %4505 = vmatprep.subr.bf16.mxu0 %v6109_v10  ;;  %4537 = vmatprep.subr.bf16.mxu1 %v6275_v39 }
 0x2c5   :  { %4507 = vmatpush1.bf16.msra.mxu0 %v6116_v18  ;;  %4539 = vmatpush1.bf16.msra.mxu1 %v6278_v36 }
 0x2c6   :  { %4509 = vmatprep.subr.bf16.mxu0 %v6120_v22  ;;  %4541 = vmatprep.subr.bf16.mxu1 %v6281_v51 }
 0x2c9   :  { %v5470_v60 = vpop.eup %5469  ;;  %4511 = vmatpush1.bf16.msra.mxu0 %v6126_v31  ;;  %4543 = vmatpush1.bf16.msra.mxu1 %v6284_v29 }
 0x2ca   :  { %v5472_v3 = vpop.eup %5471  ;;  %v1543_v48 = vmul.f32 %v5470_v60, %v5468_v28  ;;  %4513 = vmatprep.subr.bf16.mxu0 %v6129_v32  ;;  %4545 = vmatprep.subr.bf16.mxu1 %v6287_v33  ;;  %v7209_v28 = vld [vmem:[#allocation36_spill] sm:$0xff] }
 0x2cb   :  { %v1542_v11 = vmul.f32 %v5472_v3, %v6431_v12  ;;  %v5474_v12 = vpop.eup %5473  ;;  %v7210_v60 = vld [vmem:[#allocation24_spill] sm:$0xff]  ;;  %v7211_v3 = vld [vmem:[#allocation37_spill] sm:$0xff] }
 0x2cd   :  { %v6523_v58 = vadd.f32 %v1543_v48, %v1542_v11  ;;  %4515 = vmatpush1.bf16.msra.mxu0 %v6135_v43  ;;  %4547 = vmatpush1.bf16.msra.mxu1 %v6290_v63  ;;  %v7212_v48 = vld [vmem:[#allocation25_spill] sm:$0xff]  ;;  %v7214_v11 = vld [vmem:[#allocation26_spill] sm:$0xff] }
 0x2ce   :  { %4517 = vmatprep.subr.bf16.mxu0 %v6138_v44  ;;  %4549 = vmatprep.subr.bf16.mxu1 %v6293_v5 }
 0x2cf   :  { %5475 = vtanh.f32 %v6523_v58 }
 0x2d1   :  { %4519 = vmatpush1.bf16.msra.mxu0 %v6144_v54  ;;  %4551 = vmatpush1.bf16.msra.mxu1 %v6296_v0 }
 0x2d2   :  { %4521 = vmatprep.subr.bf16.mxu0 %v6147_v55  ;;  %4553 = vmatprep.subr.bf16.mxu1 %v6299_v41 }
 0x2d5   :  { %4523 = vmatpush1.bf16.msra.mxu0 %v6153_v1  ;;  %4555 = vmatpush1.bf16.msra.mxu1 %v6302_v52 }
 0x2d6   :  { %4525 = vmatprep.subr.bf16.mxu0 %v6156_v4  ;;  %4557 = vmatprep.subr.bf16.mxu1 %v6305_v56 }
 0x2d9   :  { %v5476_v45 = vpop.eup %5475  ;;  %4527 = vmatpush1.bf16.msra.mxu0 %v6162_v16  ;;  %4559 = vmatpush1.bf16.msra.mxu1 %v6308_v20 }
 0x2da   :  { %v6540_v37 = vmul.f32 %v5476_v45, %v5474_v12  ;;  %4561 = vmatprep.subr.bf16.mxu0 %v5951_v30  ;;  %4593 = vmatprep.subr.bf16.mxu1 %v6106_v9  ;;  %v7215_v12 = vld [vmem:[#allocation39_spill] sm:$0xff] }
 0x2db   :  { %v7216_v45 = vld [vmem:[#allocation27_spill] sm:$0xff] }
 0x2dc   :  { %7202 = vst [vmem:[#allocation47_spill] sm:$0xff] %v6540_v37  ;;  %1768 = vmatmul.mubr.f32.vlgmr.msra.gmra.mrb[10].mxu0 %v6540_v37  ;;  %1839 = vmatmul.mubr.f32.vlgmr.msra.gmra.mrb[42].mxu1 %v6540_v37  ;;  %v7218_v37 = vld [vmem:[#allocation28_spill] sm:$0xff] }
 0x2dd   :  { %4563 = vmatpush1.bf16.msra.mxu0 %v5958_v38  ;;  %4595 = vmatpush1.bf16.msra.mxu1 %v6168_v24 }
 0x2de   :  { %4565 = vmatprep.subr.bf16.mxu0 %v5961_v40  ;;  %4597 = vmatprep.subr.bf16.mxu1 %v6170_v25 }
 0x2df   :  { %1966 = vmatprep.mubr.f32.mxu0 %v7156_v13  ;;  %2037 = vmatprep.mubr.f32.mxu1 %v7156_v13 }
 0x2e1   :  { %4567 = vmatpush1.bf16.msra.mxu0 %v5974_v46  ;;  %4599 = vmatpush1.bf16.msra.mxu1 %v6183_v47 }
 0x2e2   :  { %4569 = vmatprep.subr.bf16.mxu0 %v5978_v49  ;;  %4601 = vmatprep.subr.bf16.mxu1 %v7203_v34 }
 0x2e5   :  { %4571 = vmatpush1.bf16.msra.mxu0 %v7204_v50  ;;  %4603 = vmatpush1.bf16.msra.mxu1 %v7205_v17  ;;  %v7229_v17 = vld [vmem:[#allocation49_spill] sm:$0xff] }
 0x2e6   :  { %4573 = vmatprep.subr.bf16.mxu0 %v7206_v27  ;;  %4605 = vmatprep.subr.bf16.mxu1 %v7207_v62  ;;  %v7228_v62 = vld [vmem:[#allocation48_spill] sm:$0xff] }
 0x2e9   :  { %4575 = vmatpush1.bf16.msra.mxu0 %v7208_v23  ;;  %4607 = vmatpush1.bf16.msra.mxu1 %v7209_v28  ;;  %v7219_v23 = vld [vmem:[#allocation41_spill] sm:$0xff] }
 0x2ea   :  { %4577 = vmatprep.subr.bf16.mxu0 %v7210_v60  ;;  %4609 = vmatprep.subr.bf16.mxu1 %v7211_v3  ;;  %v7220_v28 = vld [vmem:[#allocation29_spill] sm:$0xff]  ;;  %v7221_v60 = vld [vmem:[#allocation42_spill] sm:$0xff] }
 0x2eb   :  { %v7222_v3 = vld [vmem:[#allocation30_spill] sm:$0xff] }
 0x2ed   :  { %4579 = vmatpush1.bf16.msra.mxu0 %v7212_v48  ;;  %4611 = vmatpush1.bf16.msra.mxu1 %v7213_v2  ;;  %v7223_v48 = vld [vmem:[#allocation43_spill] sm:$0xff] }
 0x2ee   :  { %4581 = vmatprep.subr.bf16.mxu0 %v7214_v11  ;;  %4613 = vmatprep.subr.bf16.mxu1 %v7215_v12  ;;  %v7224_v2 = vld [vmem:[#allocation31_spill] sm:$0xff]  ;;  %v7225_v11 = vld [vmem:[#allocation44_spill] sm:$0xff] }
 0x2ef   :  { %v7226_v12 = vld [vmem:[#allocation32_spill] sm:$0xff] }
 0x2f1   :  { %4583 = vmatpush1.bf16.msra.mxu0 %v7216_v45  ;;  %4615 = vmatpush1.bf16.msra.mxu1 %v7217_v21  ;;  %v7227_v45 = vld [vmem:[#allocation45_spill] sm:$0xff] }
 0x2f2   :  { %4585 = vmatprep.subr.bf16.mxu0 %v7218_v37  ;;  %4617 = vmatprep.subr.bf16.mxu1 %v7219_v23 }
 0x2f5   :  { %4587 = vmatpush1.bf16.msra.mxu0 %v7220_v28  ;;  %4619 = vmatpush1.bf16.msra.mxu1 %v7221_v60 }
 0x2f6   :  { %4589 = vmatprep.subr.bf16.mxu0 %v7222_v3  ;;  %4621 = vmatprep.subr.bf16.mxu1 %v7223_v48 }
 0x2f9   :  { %4591 = vmatpush1.bf16.msra.mxu0 %v7224_v2  ;;  %4623 = vmatpush1.bf16.msra.mxu1 %v7225_v11 }
 0x2fa   :  { %4625 = vmatprep.subr.bf16.mxu0 %v7226_v12  ;;  %4657 = vmatprep.subr.bf16.mxu1 %v7227_v45 }
 0x38f   :  { %v1622_v21 = vpop.f32.mrb[20].mxu0  ;;  %v1693_v37 = vpop.f32.mrb[20].mxu1 }
 0x390   :  { %v1623_v23 = vadd.f32 %v1622_v21, %v7228_v62  ;;  %v1624_v27 = vpop.f32.mrb[21].mxu0  ;;  %v1695_v28 = vpop.f32.mrb[21].mxu1  ;;  %v5300_v11 = vadd.f32 %v1693_v37, %v6373_v42 }
 0x391   :  { %v1625_v60 = vadd.f32 %v1624_v27, %v7229_v17  ;;  %v5301_v2 = vadd.f32 %v1695_v28, %v6376_v59 }
 0x392   :  { %v3971_v50 = vmul.f32 -1.442695, %v1623_v23 }
 0x393   :  { %v3972_v3 = vmul.f32 -1.442695, %v1625_v60  ;;  %v3973_v48 = vmul.f32 -1.442695, %v5301_v2 }
 0x394   :  { %5477 = vpow2.f32 %v3971_v50 }
 0x395   :  { %5479 = vpow2.f32 %v3972_v3 }
 0x396   :  { %5481 = vpow2.f32 %v3973_v48 }
 0x397   :  { %5483 = vtanh.f32 %v5300_v11 }
 0x39e   :  { %v5478_v12 = vpop.eup %5477 }
 0x39f   :  { %v5480_v34 = vpop.eup %5479  ;;  %v1848_v45 = vadd.f32 1.0, %v5478_v12 }
 0x3a0   :  { %v1854_v49 = vadd.f32 1.0, %v5480_v34  ;;  %v5482_v21 = vpop.eup %5481 }
 0x3a1   :  { %5485 = vrcp.f32 %v1848_v45  ;;  %v5484_v62 = vpop.eup %5483  ;;  %v1861_v50 = vadd.f32 1.0, %v5482_v21 }
 0x3a2   :  { %5487 = vrcp.f32 %v1854_v49 }
 0x3a3   :  { %5489 = vrcp.f32 %v1861_v50 }
 0x3ab   :  { %v5486_v17 = vpop.eup %5485 }
 0x3ac   :  { %v5488_v27 = vpop.eup %5487  ;;  %v1865_v23 = vmul.f32 %v5486_v17, %v5484_v62 }
 0x3ad   :  { %v1864_v60 = vmul.f32 %v5488_v27, %v6493_v15  ;;  %v5490_v15 = vpop.eup %5489 }
 0x3af   :  { %v6585_v28 = vadd.f32 %v1865_v23, %v1864_v60  ;;  %v1769_v3 = vpop.f32.mrb[10].mxu0  ;;  %v1840_v37 = vpop.f32.mrb[42].mxu1 }
 0x3b0   :  { %v5322_v2 = vadd.f32 %v1769_v3, %v6386_v19  ;;  %v1771_v48 = vpop.f32.mrb[11].mxu0  ;;  %v1842_v11 = vpop.f32.mrb[43].mxu1  ;;  %v5338_v17 = vadd.f32 %v1840_v37, %v6399_v57 }
 0x3b1   :  { %v5323_v34 = vadd.f32 %v1771_v48, %v7200_v6  ;;  %5491 = vtanh.f32 %v6585_v28  ;;  %v5339_v45 = vadd.f32 %v1842_v11, %v6402_v14 }
 0x3b2   :  { %v3974_v49 = vmul.f32 -1.442695, %v5322_v2 }
 0x3b3   :  { %v3975_v12 = vmul.f32 -1.442695, %v5323_v34  ;;  %v3976_v62 = vmul.f32 -1.442695, %v5339_v45 }
 0x3b4   :  { %5493 = vpow2.f32 %v3974_v49 }
 0x3b5   :  { %5495 = vpow2.f32 %v3975_v12 }
 0x3b6   :  { %5497 = vpow2.f32 %v3976_v62  ;;  %v7232_v62 = vld [vmem:[#allocation20_spill] sm:$0xff] }
 0x3b7   :  { %5499 = vtanh.f32 %v5338_v17  ;;  %v7233_v17 = vld [vmem:[#allocation33_spill] sm:$0xff] }
 0x3bb   :  { %v5492_v21 = vpop.eup %5491 }
 0x3bc   :  { %v6592_v27 = vmul.f32 %v5492_v21, %v5490_v15 }
 0x3be   :  { %7230 = vst [vmem:[#allocation60_spill] sm:$0xff] %v6592_v27  ;;  %v5494_v23 = vpop.eup %5493  ;;  %1967 = vmatmul.mubr.f32.vlgmr.msra.gmra.mrb[22].mxu0 %v6592_v27  ;;  %2038 = vmatmul.mubr.f32.vlgmr.msra.gmra.mrb[22].mxu1 %v6592_v27  ;;  %v7247_v27 = vld [vmem:[#allocation40_spill] sm:$0xff] }
 0x3bf   :  { %v5496_v50 = vpop.eup %5495  ;;  %v1872_v60 = vadd.f32 1.0, %v5494_v23  ;;  %4627 = vmatpush1.bf16.msra.mxu0 %v6094_v53  ;;  %4659 = vmatpush1.bf16.msra.mxu1 %v6262_v26  ;;  %v7234_v23 = vld [vmem:[#allocation21_spill] sm:$0xff] }
 0x3c0   :  { %v1878_v3 = vadd.f32 1.0, %v5496_v50  ;;  %4629 = vmatprep.subr.bf16.mxu0 %v6097_v61  ;;  %4661 = vmatprep.subr.bf16.mxu1 %v6265_v7  ;;  %v5498_v37 = vpop.eup %5497  ;;  %v7235_v50 = vld [vmem:[#allocation34_spill] sm:$0xff] }
 0x3c1   :  { %5501 = vrcp.f32 %v1872_v60  ;;  %2113 = vmatprep.mubr.f32.mxu0 %v7156_v13  ;;  %2184 = vmatprep.mubr.f32.mxu1 %v7156_v13  ;;  %v5500_v2 = vpop.eup %5499  ;;  %v1885_v49 = vadd.f32 1.0, %v5498_v37  ;;  %v7236_v60 = vld [vmem:[#allocation22_spill] sm:$0xff]  ;;  %v7238_v37 = vld [vmem:[#allocation23_spill] sm:$0xff] }
 0x3c2   :  { %5503 = vrcp.f32 %v1878_v3  ;;  %v7237_v3 = vld [vmem:[#allocation35_spill] sm:$0xff] }
 0x3c3   :  { %4631 = vmatpush1.bf16.msra.mxu0 %v6104_v8  ;;  %4663 = vmatpush1.bf16.msra.mxu1 %v6271_v35  ;;  %5505 = vrcp.f32 %v1885_v49  ;;  %v7243_v49 = vld [vmem:[#allocation38_spill] sm:$0xff] }
 0x3c4   :  { %4633 = vmatprep.subr.bf16.mxu0 %v6109_v10  ;;  %4665 = vmatprep.subr.bf16.mxu1 %v6275_v39 }
 0x3c7   :  { %4635 = vmatpush1.bf16.msra.mxu0 %v6116_v18  ;;  %4667 = vmatpush1.bf16.msra.mxu1 %v6278_v36 }
 0x3c8   :  { %4637 = vmatprep.subr.bf16.mxu0 %v6120_v22  ;;  %4669 = vmatprep.subr.bf16.mxu1 %v6281_v51 }
 0x3cb   :  { %v5502_v48 = vpop.eup %5501  ;;  %4639 = vmatpush1.bf16.msra.mxu0 %v6126_v31  ;;  %4671 = vmatpush1.bf16.msra.mxu1 %v6284_v29 }
 0x3cc   :  { %v5504_v11 = vpop.eup %5503  ;;  %v1889_v34 = vmul.f32 %v5502_v48, %v5500_v2  ;;  %4641 = vmatprep.subr.bf16.mxu0 %v6129_v32  ;;  %4673 = vmatprep.subr.bf16.mxu1 %v6287_v33  ;;  %v7239_v2 = vld [vmem:[#allocation36_spill] sm:$0xff] }
 0x3cd   :  { %v1888_v12 = vmul.f32 %v5504_v11, %v6523_v58  ;;  %v5506_v58 = vpop.eup %5505  ;;  %v7240_v48 = vld [vmem:[#allocation24_spill] sm:$0xff]  ;;  %v7241_v11 = vld [vmem:[#allocation37_spill] sm:$0xff] }
 0x3cf   :  { %v6615_v45 = vadd.f32 %v1889_v34, %v1888_v12  ;;  %4643 = vmatpush1.bf16.msra.mxu0 %v6135_v43  ;;  %4675 = vmatpush1.bf16.msra.mxu1 %v6290_v63  ;;  %v7242_v34 = vld [vmem:[#allocation25_spill] sm:$0xff]  ;;  %v7244_v12 = vld [vmem:[#allocation26_spill] sm:$0xff] }
 0x3d0   :  { %4645 = vmatprep.subr.bf16.mxu0 %v6138_v44  ;;  %4677 = vmatprep.subr.bf16.mxu1 %v6293_v5 }
 0x3d1   :  { %5507 = vtanh.f32 %v6615_v45 }
 0x3d3   :  { %4647 = vmatpush1.bf16.msra.mxu0 %v6144_v54  ;;  %4679 = vmatpush1.bf16.msra.mxu1 %v6296_v0 }
 0x3d4   :  { %4649 = vmatprep.subr.bf16.mxu0 %v6147_v55  ;;  %4681 = vmatprep.subr.bf16.mxu1 %v6299_v41 }
 0x3d7   :  { %4651 = vmatpush1.bf16.msra.mxu0 %v6153_v1  ;;  %4683 = vmatpush1.bf16.msra.mxu1 %v6302_v52 }
 0x3d8   :  { %4653 = vmatprep.subr.bf16.mxu0 %v6156_v4  ;;  %4685 = vmatprep.subr.bf16.mxu1 %v6305_v56 }
 0x3db   :  { %v5508_v15 = vpop.eup %5507  ;;  %4655 = vmatpush1.bf16.msra.mxu0 %v6162_v16  ;;  %4687 = vmatpush1.bf16.msra.mxu1 %v6308_v20 }
 0x3dc   :  { %v6632_v21 = vmul.f32 %v5508_v15, %v5506_v58  ;;  %4689 = vmatprep.subr.bf16.mxu0 %v5951_v30  ;;  %4721 = vmatprep.subr.bf16.mxu1 %v6106_v9  ;;  %v7245_v58 = vld [vmem:[#allocation39_spill] sm:$0xff] }
 0x3dd   :  { %v7246_v15 = vld [vmem:[#allocation27_spill] sm:$0xff] }
 0x3de   :  { %7231 = vst [vmem:[#allocation48_spill] sm:$0xff] %v6632_v21  ;;  %2114 = vmatmul.mubr.f32.vlgmr.msra.gmra.mrb[8].mxu0 %v6632_v21  ;;  %2185 = vmatmul.mubr.f32.vlgmr.msra.gmra.mrb[40].mxu1 %v6632_v21  ;;  %v7248_v21 = vld [vmem:[#allocation28_spill] sm:$0xff] }
 0x3df   :  { %4691 = vmatpush1.bf16.msra.mxu0 %v5958_v38  ;;  %4723 = vmatpush1.bf16.msra.mxu1 %v6168_v24 }
 0x3e0   :  { %4693 = vmatprep.subr.bf16.mxu0 %v5961_v40  ;;  %4725 = vmatprep.subr.bf16.mxu1 %v6170_v25 }
 0x3e1   :  { %2312 = vmatprep.mubr.f32.mxu0 %v7156_v13  ;;  %2383 = vmatprep.mubr.f32.mxu1 %v7156_v13 }
 0x3e3   :  { %4695 = vmatpush1.bf16.msra.mxu0 %v5974_v46  ;;  %4727 = vmatpush1.bf16.msra.mxu1 %v6183_v47 }
 0x3e4   :  { %4697 = vmatprep.subr.bf16.mxu0 %v7232_v62  ;;  %4729 = vmatprep.subr.bf16.mxu1 %v7233_v17 }
 0x3e7   :  { %4699 = vmatpush1.bf16.msra.mxu0 %v7234_v23  ;;  %4731 = vmatpush1.bf16.msra.mxu1 %v7235_v50  ;;  %v7259_v50 = vld [vmem:[#allocation51_spill] sm:$0xff] }
 0x3e8   :  { %4701 = vmatprep.subr.bf16.mxu0 %v7236_v60  ;;  %4733 = vmatprep.subr.bf16.mxu1 %v7237_v3  ;;  %v7258_v3 = vld [vmem:[#allocation50_spill] sm:$0xff] }
 0x3eb   :  { %4703 = vmatpush1.bf16.msra.mxu0 %v7238_v37  ;;  %4735 = vmatpush1.bf16.msra.mxu1 %v7239_v2  ;;  %v7249_v37 = vld [vmem:[#allocation41_spill] sm:$0xff] }
 0x3ec   :  { %4705 = vmatprep.subr.bf16.mxu0 %v7240_v48  ;;  %4737 = vmatprep.subr.bf16.mxu1 %v7241_v11  ;;  %v7250_v2 = vld [vmem:[#allocation29_spill] sm:$0xff]  ;;  %v7251_v48 = vld [vmem:[#allocation42_spill] sm:$0xff] }
 0x3ed   :  { %v7252_v11 = vld [vmem:[#allocation30_spill] sm:$0xff] }
 0x3ef   :  { %4707 = vmatpush1.bf16.msra.mxu0 %v7242_v34  ;;  %4739 = vmatpush1.bf16.msra.mxu1 %v7243_v49  ;;  %v7253_v34 = vld [vmem:[#allocation43_spill] sm:$0xff] }
 0x3f0   :  { %4709 = vmatprep.subr.bf16.mxu0 %v7244_v12  ;;  %4741 = vmatprep.subr.bf16.mxu1 %v7245_v58  ;;  %v7254_v49 = vld [vmem:[#allocation31_spill] sm:$0xff]  ;;  %v7255_v12 = vld [vmem:[#allocation44_spill] sm:$0xff] }
 0x3f1   :  { %v7256_v58 = vld [vmem:[#allocation32_spill] sm:$0xff] }
 0x3f3   :  { %4711 = vmatpush1.bf16.msra.mxu0 %v7246_v15  ;;  %4743 = vmatpush1.bf16.msra.mxu1 %v7247_v27  ;;  %v7257_v15 = vld [vmem:[#allocation45_spill] sm:$0xff] }
 0x3f4   :  { %4713 = vmatprep.subr.bf16.mxu0 %v7248_v21  ;;  %4745 = vmatprep.subr.bf16.mxu1 %v7249_v37 }
 0x3f7   :  { %4715 = vmatpush1.bf16.msra.mxu0 %v7250_v2  ;;  %4747 = vmatpush1.bf16.msra.mxu1 %v7251_v48 }
 0x3f8   :  { %4717 = vmatprep.subr.bf16.mxu0 %v7252_v11  ;;  %4749 = vmatprep.subr.bf16.mxu1 %v7253_v34 }
 0x3fb   :  { %4719 = vmatpush1.bf16.msra.mxu0 %v7254_v49  ;;  %4751 = vmatpush1.bf16.msra.mxu1 %v7255_v12 }
 0x3fc   :  { %4753 = vmatprep.subr.bf16.mxu0 %v7256_v58  ;;  %4785 = vmatprep.subr.bf16.mxu1 %v7257_v15 }
 0x491   :  { %v1968_v27 = vpop.f32.mrb[22].mxu0  ;;  %v2039_v21 = vpop.f32.mrb[22].mxu1 }
 0x492   :  { %v1969_v37 = vadd.f32 %v1968_v27, %v7258_v3  ;;  %v1970_v60 = vpop.f32.mrb[23].mxu0  ;;  %v2041_v2 = vpop.f32.mrb[23].mxu1  ;;  %v5302_v12 = vadd.f32 %v2039_v21, %v6373_v42 }
 0x493   :  { %v1971_v48 = vadd.f32 %v1970_v60, %v7259_v50  ;;  %v5303_v49 = vadd.f32 %v2041_v2, %v6376_v59 }
 0x494   :  { %v3977_v23 = vmul.f32 -1.442695, %v1969_v37 }
 0x495   :  { %v3978_v11 = vmul.f32 -1.442695, %v1971_v48  ;;  %v3979_v34 = vmul.f32 -1.442695, %v5303_v49 }
 0x496   :  { %5509 = vpow2.f32 %v3977_v23 }
 0x497   :  { %5511 = vpow2.f32 %v3978_v11 }
 0x498   :  { %5513 = vpow2.f32 %v3979_v34 }
 0x499   :  { %5515 = vtanh.f32 %v5302_v12 }
 0x4a0   :  { %v5510_v58 = vpop.eup %5509 }
 0x4a1   :  { %v5512_v17 = vpop.eup %5511  ;;  %v2194_v15 = vadd.f32 1.0, %v5510_v58 }
 0x4a2   :  { %v2200_v62 = vadd.f32 1.0, %v5512_v17  ;;  %v5514_v27 = vpop.eup %5513 }
 0x4a3   :  { %5517 = vrcp.f32 %v2194_v15  ;;  %v5516_v3 = vpop.eup %5515  ;;  %v2207_v23 = vadd.f32 1.0, %v5514_v27 }
 0x4a4   :  { %5519 = vrcp.f32 %v2200_v62 }
 0x4a5   :  { %5521 = vrcp.f32 %v2207_v23 }
 0x4ad   :  { %v5518_v50 = vpop.eup %5517 }
 0x4ae   :  { %v5520_v60 = vpop.eup %5519  ;;  %v2211_v37 = vmul.f32 %v5518_v50, %v5516_v3 }
 0x4af   :  { %v2210_v48 = vmul.f32 %v5520_v60, %v6585_v28  ;;  %v5522_v28 = vpop.eup %5521 }
 0x4b1   :  { %v6677_v2 = vadd.f32 %v2211_v37, %v2210_v48  ;;  %v2115_v11 = vpop.f32.mrb[8].mxu0  ;;  %v2186_v21 = vpop.f32.mrb[40].mxu1 }
 0x4b2   :  { %v5320_v49 = vadd.f32 %v2115_v11, %v6386_v19  ;;  %v2117_v34 = vpop.f32.mrb[9].mxu0  ;;  %v2188_v12 = vpop.f32.mrb[41].mxu1  ;;  %v5336_v50 = vadd.f32 %v2186_v21, %v6399_v57 }
 0x4b3   :  { %v5321_v17 = vadd.f32 %v2117_v34, %v7200_v6  ;;  %5523 = vtanh.f32 %v6677_v2  ;;  %v5337_v15 = vadd.f32 %v2188_v12, %v6402_v14 }
 0x4b4   :  { %v3980_v62 = vmul.f32 -1.442695, %v5320_v49 }
 0x4b5   :  { %v3981_v58 = vmul.f32 -1.442695, %v5321_v17  ;;  %v3982_v3 = vmul.f32 -1.442695, %v5337_v15 }
 0x4b6   :  { %5525 = vpow2.f32 %v3980_v62 }
 0x4b7   :  { %5527 = vpow2.f32 %v3981_v58 }
 0x4b8   :  { %5529 = vpow2.f32 %v3982_v3  ;;  %v7262_v3 = vld [vmem:[#allocation20_spill] sm:$0xff] }
 0x4b9   :  { %5531 = vtanh.f32 %v5336_v50  ;;  %v7263_v50 = vld [vmem:[#allocation33_spill] sm:$0xff] }
 0x4bd   :  { %v5524_v27 = vpop.eup %5523 }
 0x4be   :  { %v6684_v60 = vmul.f32 %v5524_v27, %v5522_v28 }
 0x4c0   :  { %7260 = vst [vmem:[#allocation49_spill] sm:$0xff] %v6684_v60  ;;  %v5526_v37 = vpop.eup %5525  ;;  %2313 = vmatmul.mubr.f32.vlgmr.msra.gmra.mrb[24].mxu0 %v6684_v60  ;;  %2384 = vmatmul.mubr.f32.vlgmr.msra.gmra.mrb[24].mxu1 %v6684_v60  ;;  %v7277_v60 = vld [vmem:[#allocation40_spill] sm:$0xff] }
 0x4c1   :  { %v5528_v23 = vpop.eup %5527  ;;  %v2218_v48 = vadd.f32 1.0, %v5526_v37  ;;  %4755 = vmatpush1.bf16.msra.mxu0 %v6094_v53  ;;  %4787 = vmatpush1.bf16.msra.mxu1 %v6262_v26  ;;  %v7264_v37 = vld [vmem:[#allocation21_spill] sm:$0xff] }
 0x4c2   :  { %v2224_v11 = vadd.f32 1.0, %v5528_v23  ;;  %4757 = vmatprep.subr.bf16.mxu0 %v6097_v61  ;;  %4789 = vmatprep.subr.bf16.mxu1 %v6265_v7  ;;  %v5530_v21 = vpop.eup %5529  ;;  %v7265_v23 = vld [vmem:[#allocation34_spill] sm:$0xff] }
 0x4c3   :  { %5533 = vrcp.f32 %v2218_v48  ;;  %2459 = vmatprep.mubr.f32.mxu0 %v7156_v13  ;;  %2530 = vmatprep.mubr.f32.mxu1 %v7156_v13  ;;  %v5532_v49 = vpop.eup %5531  ;;  %v2231_v62 = vadd.f32 1.0, %v5530_v21  ;;  %v7266_v48 = vld [vmem:[#allocation22_spill] sm:$0xff]  ;;  %v7268_v21 = vld [vmem:[#allocation23_spill] sm:$0xff] }
 0x4c4   :  { %5535 = vrcp.f32 %v2224_v11  ;;  %v7267_v11 = vld [vmem:[#allocation35_spill] sm:$0xff] }
 0x4c5   :  { %4759 = vmatpush1.bf16.msra.mxu0 %v6104_v8  ;;  %4791 = vmatpush1.bf16.msra.mxu1 %v6271_v35  ;;  %5537 = vrcp.f32 %v2231_v62  ;;  %v7273_v62 = vld [vmem:[#allocation38_spill] sm:$0xff] }
 0x4c6   :  { %4761 = vmatprep.subr.bf16.mxu0 %v6109_v10  ;;  %4793 = vmatprep.subr.bf16.mxu1 %v6275_v39 }
 0x4c9   :  { %4763 = vmatpush1.bf16.msra.mxu0 %v6116_v18  ;;  %4795 = vmatpush1.bf16.msra.mxu1 %v6278_v36 }
 0x4ca   :  { %4765 = vmatprep.subr.bf16.mxu0 %v6120_v22  ;;  %4797 = vmatprep.subr.bf16.mxu1 %v6281_v51 }
 0x4cd   :  { %v5534_v34 = vpop.eup %5533  ;;  %4767 = vmatpush1.bf16.msra.mxu0 %v6126_v31  ;;  %4799 = vmatpush1.bf16.msra.mxu1 %v6284_v29 }
 0x4ce   :  { %v5536_v12 = vpop.eup %5535  ;;  %v2235_v17 = vmul.f32 %v5534_v34, %v5532_v49  ;;  %4769 = vmatprep.subr.bf16.mxu0 %v6129_v32  ;;  %4801 = vmatprep.subr.bf16.mxu1 %v6287_v33  ;;  %v7269_v49 = vld [vmem:[#allocation36_spill] sm:$0xff] }
 0x4cf   :  { %v2234_v58 = vmul.f32 %v5536_v12, %v6615_v45  ;;  %v5538_v45 = vpop.eup %5537  ;;  %v7270_v34 = vld [vmem:[#allocation24_spill] sm:$0xff]  ;;  %v7271_v12 = vld [vmem:[#allocation37_spill] sm:$0xff] }
 0x4d1   :  { %v6707_v15 = vadd.f32 %v2235_v17, %v2234_v58  ;;  %4771 = vmatpush1.bf16.msra.mxu0 %v6135_v43  ;;  %4803 = vmatpush1.bf16.msra.mxu1 %v6290_v63  ;;  %v7272_v17 = vld [vmem:[#allocation25_spill] sm:$0xff]  ;;  %v7274_v58 = vld [vmem:[#allocation26_spill] sm:$0xff] }
 0x4d2   :  { %4773 = vmatprep.subr.bf16.mxu0 %v6138_v44  ;;  %4805 = vmatprep.subr.bf16.mxu1 %v6293_v5 }
 0x4d3   :  { %5539 = vtanh.f32 %v6707_v15 }
 0x4d5   :  { %4775 = vmatpush1.bf16.msra.mxu0 %v6144_v54  ;;  %4807 = vmatpush1.bf16.msra.mxu1 %v6296_v0 }
 0x4d6   :  { %4777 = vmatprep.subr.bf16.mxu0 %v6147_v55  ;;  %4809 = vmatprep.subr.bf16.mxu1 %v6299_v41 }
 0x4d9   :  { %4779 = vmatpush1.bf16.msra.mxu0 %v6153_v1  ;;  %4811 = vmatpush1.bf16.msra.mxu1 %v6302_v52 }
 0x4da   :  { %4781 = vmatprep.subr.bf16.mxu0 %v6156_v4  ;;  %4813 = vmatprep.subr.bf16.mxu1 %v6305_v56 }
 0x4dd   :  { %v5540_v28 = vpop.eup %5539  ;;  %4783 = vmatpush1.bf16.msra.mxu0 %v6162_v16  ;;  %4815 = vmatpush1.bf16.msra.mxu1 %v6308_v20 }
 0x4de   :  { %v6724_v27 = vmul.f32 %v5540_v28, %v5538_v45  ;;  %4817 = vmatprep.subr.bf16.mxu0 %v5951_v30  ;;  %4849 = vmatprep.subr.bf16.mxu1 %v6106_v9  ;;  %v7275_v45 = vld [vmem:[#allocation39_spill] sm:$0xff] }
 0x4df   :  { %v7276_v28 = vld [vmem:[#allocation27_spill] sm:$0xff] }
 0x4e0   :  { %7261 = vst [vmem:[#allocation50_spill] sm:$0xff] %v6724_v27  ;;  %2460 = vmatmul.mubr.f32.vlgmr.msra.gmra.mrb[6].mxu0 %v6724_v27  ;;  %2531 = vmatmul.mubr.f32.vlgmr.msra.gmra.mrb[38].mxu1 %v6724_v27  ;;  %v7278_v27 = vld [vmem:[#allocation28_spill] sm:$0xff] }
 0x4e1   :  { %4819 = vmatpush1.bf16.msra.mxu0 %v5958_v38  ;;  %4851 = vmatpush1.bf16.msra.mxu1 %v6168_v24 }
 0x4e2   :  { %4821 = vmatprep.subr.bf16.mxu0 %v5961_v40  ;;  %4853 = vmatprep.subr.bf16.mxu1 %v6170_v25 }
 0x4e3   :  { %2658 = vmatprep.mubr.f32.mxu0 %v7156_v13  ;;  %2729 = vmatprep.mubr.f32.mxu1 %v7156_v13 }
 0x4e5   :  { %4823 = vmatpush1.bf16.msra.mxu0 %v5974_v46  ;;  %4855 = vmatpush1.bf16.msra.mxu1 %v6183_v47 }
 0x4e6   :  { %4825 = vmatprep.subr.bf16.mxu0 %v7262_v3  ;;  %4857 = vmatprep.subr.bf16.mxu1 %v7263_v50 }
 0x4e9   :  { %4827 = vmatpush1.bf16.msra.mxu0 %v7264_v37  ;;  %4859 = vmatpush1.bf16.msra.mxu1 %v7265_v23  ;;  %v7289_v23 = vld [vmem:[#allocation53_spill] sm:$0xff] }
 0x4ea   :  { %4829 = vmatprep.subr.bf16.mxu0 %v7266_v48  ;;  %4861 = vmatprep.subr.bf16.mxu1 %v7267_v11  ;;  %v7288_v11 = vld [vmem:[#allocation52_spill] sm:$0xff] }
 0x4ed   :  { %4831 = vmatpush1.bf16.msra.mxu0 %v7268_v21  ;;  %4863 = vmatpush1.bf16.msra.mxu1 %v7269_v49  ;;  %v7279_v21 = vld [vmem:[#allocation41_spill] sm:$0xff] }
 0x4ee   :  { %4833 = vmatprep.subr.bf16.mxu0 %v7270_v34  ;;  %4865 = vmatprep.subr.bf16.mxu1 %v7271_v12  ;;  %v7280_v49 = vld [vmem:[#allocation29_spill] sm:$0xff]  ;;  %v7281_v34 = vld [vmem:[#allocation42_spill] sm:$0xff] }
 0x4ef   :  { %v7282_v12 = vld [vmem:[#allocation30_spill] sm:$0xff] }
 0x4f1   :  { %4835 = vmatpush1.bf16.msra.mxu0 %v7272_v17  ;;  %4867 = vmatpush1.bf16.msra.mxu1 %v7273_v62  ;;  %v7283_v17 = vld [vmem:[#allocation43_spill] sm:$0xff] }
 0x4f2   :  { %4837 = vmatprep.subr.bf16.mxu0 %v7274_v58  ;;  %4869 = vmatprep.subr.bf16.mxu1 %v7275_v45  ;;  %v7284_v62 = vld [vmem:[#allocation31_spill] sm:$0xff]  ;;  %v7285_v58 = vld [vmem:[#allocation44_spill] sm:$0xff] }
 0x4f3   :  { %v7286_v45 = vld [vmem:[#allocation32_spill] sm:$0xff] }
 0x4f5   :  { %4839 = vmatpush1.bf16.msra.mxu0 %v7276_v28  ;;  %4871 = vmatpush1.bf16.msra.mxu1 %v7277_v60  ;;  %v7287_v28 = vld [vmem:[#allocation45_spill] sm:$0xff] }
 0x4f6   :  { %4841 = vmatprep.subr.bf16.mxu0 %v7278_v27  ;;  %4873 = vmatprep.subr.bf16.mxu1 %v7279_v21 }
 0x4f9   :  { %4843 = vmatpush1.bf16.msra.mxu0 %v7280_v49  ;;  %4875 = vmatpush1.bf16.msra.mxu1 %v7281_v34 }
 0x4fa   :  { %4845 = vmatprep.subr.bf16.mxu0 %v7282_v12  ;;  %4877 = vmatprep.subr.bf16.mxu1 %v7283_v17 }
 0x4fd   :  { %4847 = vmatpush1.bf16.msra.mxu0 %v7284_v62  ;;  %4879 = vmatpush1.bf16.msra.mxu1 %v7285_v58 }
 0x4fe   :  { %4881 = vmatprep.subr.bf16.mxu0 %v7286_v45  ;;  %4913 = vmatprep.subr.bf16.mxu1 %v7287_v28 }
 0x593   :  { %v2314_v60 = vpop.f32.mrb[24].mxu0  ;;  %v2385_v27 = vpop.f32.mrb[24].mxu1 }
 0x594   :  { %v2315_v21 = vadd.f32 %v2314_v60, %v7288_v11  ;;  %v2316_v48 = vpop.f32.mrb[25].mxu0  ;;  %v2387_v49 = vpop.f32.mrb[25].mxu1  ;;  %v5304_v58 = vadd.f32 %v2385_v27, %v6373_v42 }
 0x595   :  { %v2317_v34 = vadd.f32 %v2316_v48, %v7289_v23  ;;  %v5305_v62 = vadd.f32 %v2387_v49, %v6376_v59 }
 0x596   :  { %v3983_v37 = vmul.f32 -1.442695, %v2315_v21 }
 0x597   :  { %v3984_v12 = vmul.f32 -1.442695, %v2317_v34  ;;  %v3985_v17 = vmul.f32 -1.442695, %v5305_v62 }
 0x598   :  { %5541 = vpow2.f32 %v3983_v37 }
 0x599   :  { %5543 = vpow2.f32 %v3984_v12 }
 0x59a   :  { %5545 = vpow2.f32 %v3985_v17 }
 0x59b   :  { %5547 = vtanh.f32 %v5304_v58 }
 0x5a2   :  { %v5542_v45 = vpop.eup %5541 }
 0x5a3   :  { %v5544_v50 = vpop.eup %5543  ;;  %v2540_v28 = vadd.f32 1.0, %v5542_v45 }
 0x5a4   :  { %v2546_v3 = vadd.f32 1.0, %v5544_v50  ;;  %v5546_v60 = vpop.eup %5545 }
 0x5a5   :  { %5549 = vrcp.f32 %v2540_v28  ;;  %v5548_v11 = vpop.eup %5547  ;;  %v2553_v37 = vadd.f32 1.0, %v5546_v60 }
 0x5a6   :  { %5551 = vrcp.f32 %v2546_v3 }
 0x5a7   :  { %5553 = vrcp.f32 %v2553_v37 }
 0x5af   :  { %v5550_v23 = vpop.eup %5549 }
 0x5b0   :  { %v5552_v48 = vpop.eup %5551  ;;  %v2557_v21 = vmul.f32 %v5550_v23, %v5548_v11 }
 0x5b1   :  { %v2556_v34 = vmul.f32 %v5552_v48, %v6677_v2  ;;  %v5554_v2 = vpop.eup %5553 }
 0x5b3   :  { %v6769_v49 = vadd.f32 %v2557_v21, %v2556_v34  ;;  %v2461_v12 = vpop.f32.mrb[6].mxu0  ;;  %v2532_v27 = vpop.f32.mrb[38].mxu1 }
 0x5b4   :  { %v5318_v62 = vadd.f32 %v2461_v12, %v6386_v19  ;;  %v2463_v17 = vpop.f32.mrb[7].mxu0  ;;  %v2534_v58 = vpop.f32.mrb[39].mxu1  ;;  %v5334_v23 = vadd.f32 %v2532_v27, %v6399_v57 }
 0x5b5   :  { %v5319_v50 = vadd.f32 %v2463_v17, %v7200_v6  ;;  %5555 = vtanh.f32 %v6769_v49  ;;  %v5335_v28 = vadd.f32 %v2534_v58, %v6402_v14 }
 0x5b6   :  { %v3986_v3 = vmul.f32 -1.442695, %v5318_v62 }
 0x5b7   :  { %v3987_v45 = vmul.f32 -1.442695, %v5319_v50  ;;  %v3988_v11 = vmul.f32 -1.442695, %v5335_v28 }
 0x5b8   :  { %5557 = vpow2.f32 %v3986_v3 }
 0x5b9   :  { %5559 = vpow2.f32 %v3987_v45 }
 0x5ba   :  { %5561 = vpow2.f32 %v3988_v11  ;;  %v7292_v11 = vld [vmem:[#allocation20_spill] sm:$0xff] }
 0x5bb   :  { %5563 = vtanh.f32 %v5334_v23  ;;  %v7293_v23 = vld [vmem:[#allocation33_spill] sm:$0xff] }
 0x5bf   :  { %v5556_v60 = vpop.eup %5555 }
 0x5c0   :  { %v6776_v48 = vmul.f32 %v5556_v60, %v5554_v2 }
 0x5c2   :  { %7290 = vst [vmem:[#allocation51_spill] sm:$0xff] %v6776_v48  ;;  %v5558_v21 = vpop.eup %5557  ;;  %2659 = vmatmul.mubr.f32.vlgmr.msra.gmra.mrb[26].mxu0 %v6776_v48  ;;  %2730 = vmatmul.mubr.f32.vlgmr.msra.gmra.mrb[26].mxu1 %v6776_v48  ;;  %v7307_v48 = vld [vmem:[#allocation40_spill] sm:$0xff] }
 0x5c3   :  { %v5560_v37 = vpop.eup %5559  ;;  %v2564_v34 = vadd.f32 1.0, %v5558_v21  ;;  %4883 = vmatpush1.bf16.msra.mxu0 %v6094_v53  ;;  %4915 = vmatpush1.bf16.msra.mxu1 %v6262_v26  ;;  %v7294_v21 = vld [vmem:[#allocation21_spill] sm:$0xff] }
 0x5c4   :  { %v2570_v12 = vadd.f32 1.0, %v5560_v37  ;;  %4885 = vmatprep.subr.bf16.mxu0 %v6097_v61  ;;  %4917 = vmatprep.subr.bf16.mxu1 %v6265_v7  ;;  %v5562_v27 = vpop.eup %5561  ;;  %v7295_v37 = vld [vmem:[#allocation34_spill] sm:$0xff] }
 0x5c5   :  { %5565 = vrcp.f32 %v2564_v34  ;;  %2805 = vmatprep.mubr.f32.mxu0 %v7156_v13  ;;  %2876 = vmatprep.mubr.f32.mxu1 %v7156_v13  ;;  %v5564_v62 = vpop.eup %5563  ;;  %v2577_v3 = vadd.f32 1.0, %v5562_v27  ;;  %v7296_v34 = vld [vmem:[#allocation22_spill] sm:$0xff]  ;;  %v7298_v27 = vld [vmem:[#allocation23_spill] sm:$0xff] }
 0x5c6   :  { %5567 = vrcp.f32 %v2570_v12  ;;  %v7297_v12 = vld [vmem:[#allocation35_spill] sm:$0xff] }
 0x5c7   :  { %4887 = vmatpush1.bf16.msra.mxu0 %v6104_v8  ;;  %4919 = vmatpush1.bf16.msra.mxu1 %v6271_v35  ;;  %5569 = vrcp.f32 %v2577_v3  ;;  %v7303_v3 = vld [vmem:[#allocation38_spill] sm:$0xff] }
 0x5c8   :  { %4889 = vmatprep.subr.bf16.mxu0 %v6109_v10  ;;  %4921 = vmatprep.subr.bf16.mxu1 %v6275_v39 }
 0x5cb   :  { %4891 = vmatpush1.bf16.msra.mxu0 %v6116_v18  ;;  %4923 = vmatpush1.bf16.msra.mxu1 %v6278_v36 }
 0x5cc   :  { %4893 = vmatprep.subr.bf16.mxu0 %v6120_v22  ;;  %4925 = vmatprep.subr.bf16.mxu1 %v6281_v51 }
 0x5cf   :  { %v5566_v17 = vpop.eup %5565  ;;  %4895 = vmatpush1.bf16.msra.mxu0 %v6126_v31  ;;  %4927 = vmatpush1.bf16.msra.mxu1 %v6284_v29 }
 0x5d0   :  { %v5568_v58 = vpop.eup %5567  ;;  %v2581_v50 = vmul.f32 %v5566_v17, %v5564_v62  ;;  %4897 = vmatprep.subr.bf16.mxu0 %v6129_v32  ;;  %4929 = vmatprep.subr.bf16.mxu1 %v6287_v33  ;;  %v7299_v62 = vld [vmem:[#allocation36_spill] sm:$0xff] }
 0x5d1   :  { %v2580_v45 = vmul.f32 %v5568_v58, %v6707_v15  ;;  %v5570_v15 = vpop.eup %5569  ;;  %v7300_v17 = vld [vmem:[#allocation24_spill] sm:$0xff]  ;;  %v7301_v58 = vld [vmem:[#allocation37_spill] sm:$0xff] }
 0x5d3   :  { %v6799_v28 = vadd.f32 %v2581_v50, %v2580_v45  ;;  %4899 = vmatpush1.bf16.msra.mxu0 %v6135_v43  ;;  %4931 = vmatpush1.bf16.msra.mxu1 %v6290_v63  ;;  %v7302_v50 = vld [vmem:[#allocation25_spill] sm:$0xff]  ;;  %v7304_v45 = vld [vmem:[#allocation26_spill] sm:$0xff] }
 0x5d4   :  { %4901 = vmatprep.subr.bf16.mxu0 %v6138_v44  ;;  %4933 = vmatprep.subr.bf16.mxu1 %v6293_v5 }
 0x5d5   :  { %5571 = vtanh.f32 %v6799_v28 }
 0x5d7   :  { %4903 = vmatpush1.bf16.msra.mxu0 %v6144_v54  ;;  %4935 = vmatpush1.bf16.msra.mxu1 %v6296_v0 }
 0x5d8   :  { %4905 = vmatprep.subr.bf16.mxu0 %v6147_v55  ;;  %4937 = vmatprep.subr.bf16.mxu1 %v6299_v41 }
 0x5db   :  { %4907 = vmatpush1.bf16.msra.mxu0 %v6153_v1  ;;  %4939 = vmatpush1.bf16.msra.mxu1 %v6302_v52 }
 0x5dc   :  { %4909 = vmatprep.subr.bf16.mxu0 %v6156_v4  ;;  %4941 = vmatprep.subr.bf16.mxu1 %v6305_v56 }
 0x5df   :  { %v5572_v2 = vpop.eup %5571  ;;  %4911 = vmatpush1.bf16.msra.mxu0 %v6162_v16  ;;  %4943 = vmatpush1.bf16.msra.mxu1 %v6308_v20 }
 0x5e0   :  { %v6816_v60 = vmul.f32 %v5572_v2, %v5570_v15  ;;  %4945 = vmatprep.subr.bf16.mxu0 %v5951_v30  ;;  %4977 = vmatprep.subr.bf16.mxu1 %v6106_v9  ;;  %v7305_v15 = vld [vmem:[#allocation39_spill] sm:$0xff] }
 0x5e1   :  { %v7306_v2 = vld [vmem:[#allocation27_spill] sm:$0xff] }
 0x5e2   :  { %7291 = vst [vmem:[#allocation52_spill] sm:$0xff] %v6816_v60  ;;  %2806 = vmatmul.mubr.f32.vlgmr.msra.gmra.mrb[4].mxu0 %v6816_v60  ;;  %2877 = vmatmul.mubr.f32.vlgmr.msra.gmra.mrb[36].mxu1 %v6816_v60  ;;  %v7308_v60 = vld [vmem:[#allocation28_spill] sm:$0xff] }
 0x5e3   :  { %4947 = vmatpush1.bf16.msra.mxu0 %v5958_v38  ;;  %4979 = vmatpush1.bf16.msra.mxu1 %v6168_v24 }
 0x5e4   :  { %4949 = vmatprep.subr.bf16.mxu0 %v5961_v40  ;;  %4981 = vmatprep.subr.bf16.mxu1 %v6170_v25 }
 0x5e5   :  { %3004 = vmatprep.mubr.f32.mxu0 %v7156_v13  ;;  %3075 = vmatprep.mubr.f32.mxu1 %v7156_v13 }
 0x5e7   :  { %4951 = vmatpush1.bf16.msra.mxu0 %v5974_v46  ;;  %4983 = vmatpush1.bf16.msra.mxu1 %v6183_v47 }
 0x5e8   :  { %4953 = vmatprep.subr.bf16.mxu0 %v7292_v11  ;;  %4985 = vmatprep.subr.bf16.mxu1 %v7293_v23 }
 0x5eb   :  { %4955 = vmatpush1.bf16.msra.mxu0 %v7294_v21  ;;  %4987 = vmatpush1.bf16.msra.mxu1 %v7295_v37  ;;  %v7319_v37 = vld [vmem:[#allocation55_spill] sm:$0xff] }
 0x5ec   :  { %4957 = vmatprep.subr.bf16.mxu0 %v7296_v34  ;;  %4989 = vmatprep.subr.bf16.mxu1 %v7297_v12  ;;  %v7318_v12 = vld [vmem:[#allocation54_spill] sm:$0xff] }
 0x5ef   :  { %4959 = vmatpush1.bf16.msra.mxu0 %v7298_v27  ;;  %4991 = vmatpush1.bf16.msra.mxu1 %v7299_v62  ;;  %v7309_v27 = vld [vmem:[#allocation41_spill] sm:$0xff] }
 0x5f0   :  { %4961 = vmatprep.subr.bf16.mxu0 %v7300_v17  ;;  %4993 = vmatprep.subr.bf16.mxu1 %v7301_v58  ;;  %v7310_v62 = vld [vmem:[#allocation29_spill] sm:$0xff]  ;;  %v7311_v17 = vld [vmem:[#allocation42_spill] sm:$0xff] }
 0x5f1   :  { %v7312_v58 = vld [vmem:[#allocation30_spill] sm:$0xff] }
 0x5f3   :  { %4963 = vmatpush1.bf16.msra.mxu0 %v7302_v50  ;;  %4995 = vmatpush1.bf16.msra.mxu1 %v7303_v3  ;;  %v7313_v50 = vld [vmem:[#allocation43_spill] sm:$0xff] }
 0x5f4   :  { %4965 = vmatprep.subr.bf16.mxu0 %v7304_v45  ;;  %4997 = vmatprep.subr.bf16.mxu1 %v7305_v15  ;;  %v7314_v3 = vld [vmem:[#allocation31_spill] sm:$0xff]  ;;  %v7315_v45 = vld [vmem:[#allocation44_spill] sm:$0xff] }
 0x5f5   :  { %v7316_v15 = vld [vmem:[#allocation32_spill] sm:$0xff] }
 0x5f7   :  { %4967 = vmatpush1.bf16.msra.mxu0 %v7306_v2  ;;  %4999 = vmatpush1.bf16.msra.mxu1 %v7307_v48  ;;  %v7317_v2 = vld [vmem:[#allocation45_spill] sm:$0xff] }
 0x5f8   :  { %4969 = vmatprep.subr.bf16.mxu0 %v7308_v60  ;;  %5001 = vmatprep.subr.bf16.mxu1 %v7309_v27 }
 0x5fb   :  { %4971 = vmatpush1.bf16.msra.mxu0 %v7310_v62  ;;  %5003 = vmatpush1.bf16.msra.mxu1 %v7311_v17 }
 0x5fc   :  { %4973 = vmatprep.subr.bf16.mxu0 %v7312_v58  ;;  %5005 = vmatprep.subr.bf16.mxu1 %v7313_v50 }
 0x5ff   :  { %4975 = vmatpush1.bf16.msra.mxu0 %v7314_v3  ;;  %5007 = vmatpush1.bf16.msra.mxu1 %v7315_v45 }
 0x600   :  { %5009 = vmatprep.subr.bf16.mxu0 %v7316_v15  ;;  %5041 = vmatprep.subr.bf16.mxu1 %v7317_v2 }
 0x695   :  { %v2660_v48 = vpop.f32.mrb[26].mxu0  ;;  %v2731_v60 = vpop.f32.mrb[26].mxu1 }
 0x696   :  { %v2661_v27 = vadd.f32 %v2660_v48, %v7318_v12  ;;  %v2662_v34 = vpop.f32.mrb[27].mxu0  ;;  %v2733_v62 = vpop.f32.mrb[27].mxu1  ;;  %v5306_v45 = vadd.f32 %v2731_v60, %v6373_v42 }
 0x697   :  { %v2663_v17 = vadd.f32 %v2662_v34, %v7319_v37  ;;  %v5307_v3 = vadd.f32 %v2733_v62, %v6376_v59 }
 0x698   :  { %v3989_v21 = vmul.f32 -1.442695, %v2661_v27 }
 0x699   :  { %v3990_v58 = vmul.f32 -1.442695, %v2663_v17  ;;  %v3991_v50 = vmul.f32 -1.442695, %v5307_v3 }
 0x69a   :  { %5573 = vpow2.f32 %v3989_v21 }
 0x69b   :  { %5575 = vpow2.f32 %v3990_v58 }
 0x69c   :  { %5577 = vpow2.f32 %v3991_v50 }
 0x69d   :  { %5579 = vtanh.f32 %v5306_v45 }
 0x6a4   :  { %v5574_v15 = vpop.eup %5573 }
 0x6a5   :  { %v5576_v23 = vpop.eup %5575  ;;  %v2886_v2 = vadd.f32 1.0, %v5574_v15 }
 0x6a6   :  { %v2892_v11 = vadd.f32 1.0, %v5576_v23  ;;  %v5578_v48 = vpop.eup %5577 }
 0x6a7   :  { %5581 = vrcp.f32 %v2886_v2  ;;  %v5580_v12 = vpop.eup %5579  ;;  %v2899_v21 = vadd.f32 1.0, %v5578_v48 }
 0x6a8   :  { %5583 = vrcp.f32 %v2892_v11 }
 0x6a9   :  { %5585 = vrcp.f32 %v2899_v21 }
 0x6b1   :  { %v5582_v37 = vpop.eup %5581 }
 0x6b2   :  { %v5584_v34 = vpop.eup %5583  ;;  %v2903_v27 = vmul.f32 %v5582_v37, %v5580_v12 }
 0x6b3   :  { %v2902_v17 = vmul.f32 %v5584_v34, %v6769_v49  ;;  %v5586_v49 = vpop.eup %5585 }
 0x6b5   :  { %v6861_v62 = vadd.f32 %v2903_v27, %v2902_v17  ;;  %v2807_v58 = vpop.f32.mrb[4].mxu0  ;;  %v2878_v60 = vpop.f32.mrb[36].mxu1 }
 0x6b6   :  { %v5316_v3 = vadd.f32 %v2807_v58, %v6386_v19  ;;  %v2809_v50 = vpop.f32.mrb[5].mxu0  ;;  %v2880_v45 = vpop.f32.mrb[37].mxu1  ;;  %v5332_v37 = vadd.f32 %v2878_v60, %v6399_v57 }
 0x6b7   :  { %v5317_v23 = vadd.f32 %v2809_v50, %v7200_v6  ;;  %5587 = vtanh.f32 %v6861_v62  ;;  %v5333_v2 = vadd.f32 %v2880_v45, %v6402_v14 }
 0x6b8   :  { %v3992_v11 = vmul.f32 -1.442695, %v5316_v3 }
 0x6b9   :  { %v3993_v15 = vmul.f32 -1.442695, %v5317_v23  ;;  %v3994_v12 = vmul.f32 -1.442695, %v5333_v2 }
 0x6ba   :  { %5589 = vpow2.f32 %v3992_v11 }
 0x6bb   :  { %5591 = vpow2.f32 %v3993_v15 }
 0x6bc   :  { %5593 = vpow2.f32 %v3994_v12  ;;  %v7322_v12 = vld [vmem:[#allocation21_spill] sm:$0xff] }
 0x6bd   :  { %5595 = vtanh.f32 %v5332_v37  ;;  %v7327_v37 = vld [vmem:[#allocation36_spill] sm:$0xff] }
 0x6c1   :  { %v5588_v48 = vpop.eup %5587 }
 0x6c2   :  { %v6868_v34 = vmul.f32 %v5588_v48, %v5586_v49 }
 0x6c4   :  { %v5590_v27 = vpop.eup %5589  ;;  %3005 = vmatmul.mubr.f32.vlgmr.msra.gmra.mrb[28].mxu0 %v6868_v34  ;;  %3076 = vmatmul.mubr.f32.vlgmr.msra.gmra.mrb[28].mxu1 %v6868_v34 }
 0x6c5   :  { %v5592_v21 = vpop.eup %5591  ;;  %v2910_v17 = vadd.f32 1.0, %v5590_v27  ;;  %5011 = vmatpush1.bf16.msra.mxu0 %v6094_v53  ;;  %5043 = vmatpush1.bf16.msra.mxu1 %v6262_v26  ;;  %v7328_v27 = vld [vmem:[#allocation24_spill] sm:$0xff] }
 0x6c6   :  { %v2916_v58 = vadd.f32 1.0, %v5592_v21  ;;  %5013 = vmatprep.subr.bf16.mxu0 %v6097_v61  ;;  %5045 = vmatprep.subr.bf16.mxu1 %v6265_v7  ;;  %v5594_v60 = vpop.eup %5593  ;;  %v7331_v21 = vld [vmem:[#allocation38_spill] sm:$0xff] }
 0x6c7   :  { %5597 = vrcp.f32 %v2910_v17  ;;  %3151 = vmatprep.mubr.f32.mxu0 %v7156_v13  ;;  %3222 = vmatprep.mubr.f32.mxu1 %v7156_v13  ;;  %v5596_v3 = vpop.eup %5595  ;;  %v2923_v11 = vadd.f32 1.0, %v5594_v60  ;;  %v7332_v17 = vld [vmem:[#allocation26_spill] sm:$0xff]  ;;  %v7334_v60 = vld [vmem:[#allocation27_spill] sm:$0xff] }
 0x6c8   :  { %5599 = vrcp.f32 %v2916_v58  ;;  %v7333_v58 = vld [vmem:[#allocation39_spill] sm:$0xff] }
 0x6c9   :  { %5015 = vmatpush1.bf16.msra.mxu0 %v6104_v8  ;;  %5047 = vmatpush1.bf16.msra.mxu1 %v6271_v35  ;;  %5601 = vrcp.f32 %v2923_v11  ;;  %v7339_v11 = vld [vmem:[#allocation42_spill] sm:$0xff] }
 0x6ca   :  { %5017 = vmatprep.subr.bf16.mxu0 %v6109_v10  ;;  %5049 = vmatprep.subr.bf16.mxu1 %v6275_v39 }
 0x6cd   :  { %5019 = vmatpush1.bf16.msra.mxu0 %v6116_v18  ;;  %5051 = vmatpush1.bf16.msra.mxu1 %v6278_v36 }
 0x6ce   :  { %5021 = vmatprep.subr.bf16.mxu0 %v6120_v22  ;;  %5053 = vmatprep.subr.bf16.mxu1 %v6281_v51 }
 0x6d1   :  { %v5598_v50 = vpop.eup %5597  ;;  %5023 = vmatpush1.bf16.msra.mxu0 %v6126_v31  ;;  %5055 = vmatpush1.bf16.msra.mxu1 %v6284_v29 }
 0x6d2   :  { %v5600_v45 = vpop.eup %5599  ;;  %v2927_v23 = vmul.f32 %v5598_v50, %v5596_v3  ;;  %5025 = vmatprep.subr.bf16.mxu0 %v6129_v32  ;;  %5057 = vmatprep.subr.bf16.mxu1 %v6287_v33  ;;  %v7335_v3 = vld [vmem:[#allocation40_spill] sm:$0xff] }
 0x6d3   :  { %v2926_v15 = vmul.f32 %v5600_v45, %v6799_v28  ;;  %v5602_v28 = vpop.eup %5601  ;;  %v7336_v50 = vld [vmem:[#allocation28_spill] sm:$0xff]  ;;  %v7337_v45 = vld [vmem:[#allocation41_spill] sm:$0xff] }
 0x6d5   :  { %v6891_v2 = vadd.f32 %v2927_v23, %v2926_v15  ;;  %5027 = vmatpush1.bf16.msra.mxu0 %v6135_v43  ;;  %5059 = vmatpush1.bf16.msra.mxu1 %v6290_v63  ;;  %v7338_v23 = vld [vmem:[#allocation29_spill] sm:$0xff]  ;;  %v7340_v15 = vld [vmem:[#allocation30_spill] sm:$0xff] }
 0x6d6   :  { %5029 = vmatprep.subr.bf16.mxu0 %v6138_v44  ;;  %5061 = vmatprep.subr.bf16.mxu1 %v6293_v5 }
 0x6d7   :  { %5603 = vtanh.f32 %v6891_v2 }
 0x6d9   :  { %5031 = vmatpush1.bf16.msra.mxu0 %v6144_v54  ;;  %5063 = vmatpush1.bf16.msra.mxu1 %v6296_v0 }
 0x6da   :  { %5033 = vmatprep.subr.bf16.mxu0 %v6147_v55  ;;  %5065 = vmatprep.subr.bf16.mxu1 %v6299_v41 }
 0x6dd   :  { %5035 = vmatpush1.bf16.msra.mxu0 %v6153_v1  ;;  %5067 = vmatpush1.bf16.msra.mxu1 %v6302_v52 }
 0x6de   :  { %5037 = vmatprep.subr.bf16.mxu0 %v6156_v4  ;;  %5069 = vmatprep.subr.bf16.mxu1 %v6305_v56 }
 0x6e1   :  { %v5604_v49 = vpop.eup %5603  ;;  %5039 = vmatpush1.bf16.msra.mxu0 %v6162_v16  ;;  %5071 = vmatpush1.bf16.msra.mxu1 %v6308_v20 }
 0x6e2   :  { %v6908_v48 = vmul.f32 %v5604_v49, %v5602_v28  ;;  %5073 = vmatprep.subr.bf16.mxu0 %v5951_v30  ;;  %5105 = vmatprep.subr.bf16.mxu1 %v6106_v9  ;;  %v7320_v30 = vld [vmem:[#allocation20_spill] sm:$0xff]  ;;  %v7321_v9 = vld [vmem:[#allocation33_spill] sm:$0xff]  ;;  %v7341_v28 = vld [vmem:[#allocation43_spill] sm:$0xff] }
 0x6e3   :  { %v7342_v49 = vld [vmem:[#allocation31_spill] sm:$0xff] }
 0x6e4   :  { %3152 = vmatmul.mubr.f32.vlgmr.msra.gmra.mrb[2].mxu0 %v6908_v48  ;;  %3223 = vmatmul.mubr.f32.vlgmr.msra.gmra.mrb[34].mxu1 %v6908_v48 }
 0x6e5   :  { %5075 = vmatpush1.bf16.msra.mxu0 %v5958_v38  ;;  %5107 = vmatpush1.bf16.msra.mxu1 %v6168_v24  ;;  %v7323_v38 = vld [vmem:[#allocation34_spill] sm:$0xff] }
 0x6e6   :  { %5077 = vmatprep.subr.bf16.mxu0 %v5961_v40  ;;  %5109 = vmatprep.subr.bf16.mxu1 %v6170_v25  ;;  %v7324_v24 = vld [vmem:[#allocation22_spill] sm:$0xff]  ;;  %v7325_v40 = vld [vmem:[#allocation35_spill] sm:$0xff] }
 0x6e7   :  { %3350 = vmatprep.mubr.f32.mxu0 %v7156_v13  ;;  %3421 = vmatprep.mubr.f32.mxu1 %v7156_v13  ;;  %v7326_v25 = vld [vmem:[#allocation23_spill] sm:$0xff] }
 0x6e9   :  { %5079 = vmatpush1.bf16.msra.mxu0 %v5974_v46  ;;  %5111 = vmatpush1.bf16.msra.mxu1 %v6183_v47  ;;  %v7329_v46 = vld [vmem:[#allocation37_spill] sm:$0xff] }
 0x6ea   :  { %5081 = vmatprep.subr.bf16.mxu0 %v7320_v30  ;;  %5113 = vmatprep.subr.bf16.mxu1 %v7321_v9  ;;  %v7330_v47 = vld [vmem:[#allocation25_spill] sm:$0xff]  ;;  %v7343_v30 = vld [vmem:[#allocation44_spill] sm:$0xff] }
 0x6eb   :  { %v7344_v9 = vld [vmem:[#allocation32_spill] sm:$0xff] }
 0x6ed   :  { %5083 = vmatpush1.bf16.msra.mxu0 %v7322_v12  ;;  %5115 = vmatpush1.bf16.msra.mxu1 %v7323_v38  ;;  %v7345_v12 = vld [vmem:[#allocation45_spill] sm:$0xff] }
 0x6ee   :  { %5085 = vmatprep.subr.bf16.mxu0 %v7324_v24  ;;  %5117 = vmatprep.subr.bf16.mxu1 %v7325_v40  ;;  %v7346_v40 = vld [vmem:[#allocation56_spill] sm:$0xff] }
 0x6f1   :  { %5087 = vmatpush1.bf16.msra.mxu0 %v7326_v25  ;;  %5119 = vmatpush1.bf16.msra.mxu1 %v7327_v37 }
 0x6f2   :  { %5089 = vmatprep.subr.bf16.mxu0 %v7328_v27  ;;  %5121 = vmatprep.subr.bf16.mxu1 %v7329_v46  ;;  %v7347_v46 = vld [vmem:[#allocation57_spill] sm:$0xff] }
 0x6f5   :  { %5091 = vmatpush1.bf16.msra.mxu0 %v7330_v47  ;;  %5123 = vmatpush1.bf16.msra.mxu1 %v7331_v21 }
 0x6f6   :  { %5093 = vmatprep.subr.bf16.mxu0 %v7332_v17  ;;  %5125 = vmatprep.subr.bf16.mxu1 %v7333_v58 }
 0x6f9   :  { %5095 = vmatpush1.bf16.msra.mxu0 %v7334_v60  ;;  %5127 = vmatpush1.bf16.msra.mxu1 %v7335_v3 }
 0x6fa   :  { %5097 = vmatprep.subr.bf16.mxu0 %v7336_v50  ;;  %5129 = vmatprep.subr.bf16.mxu1 %v7337_v45 }
 0x6fd   :  { %5099 = vmatpush1.bf16.msra.mxu0 %v7338_v23  ;;  %5131 = vmatpush1.bf16.msra.mxu1 %v7339_v11 }
 0x6fe   :  { %5101 = vmatprep.subr.bf16.mxu0 %v7340_v15  ;;  %5133 = vmatprep.subr.bf16.mxu1 %v7341_v28 }
 0x701   :  { %5103 = vmatpush1.bf16.msra.mxu0 %v7342_v49  ;;  %5135 = vmatpush1.bf16.msra.mxu1 %v7343_v30 }
 0x702   :  { %5137 = vmatprep.subr.bf16.mxu0 %v7344_v9  ;;  %5169 = vmatprep.subr.bf16.mxu1 %v7345_v12 }
 0x797   :  { %v3006_v38 = vpop.f32.mrb[28].mxu0  ;;  %v3077_v24 = vpop.f32.mrb[28].mxu1 }
 0x798   :  { %v3007_v25 = vadd.f32 %v3006_v38, %v7346_v40  ;;  %v3008_v37 = vpop.f32.mrb[29].mxu0  ;;  %v3079_v27 = vpop.f32.mrb[29].mxu1  ;;  %v5308_v3 = vadd.f32 %v3077_v24, %v6373_v42 }
 0x799   :  { %v3009_v47 = vadd.f32 %v3008_v37, %v7347_v46  ;;  %v5309_v58 = vadd.f32 %v3079_v27, %v6376_v59 }
 0x79a   :  { %v3995_v21 = vmul.f32 -1.442695, %v3007_v25 }
 0x79b   :  { %v3996_v17 = vmul.f32 -1.442695, %v3009_v47  ;;  %v3997_v60 = vmul.f32 -1.442695, %v5309_v58 }
 0x79c   :  { %5605 = vpow2.f32 %v3995_v21 }
 0x79d   :  { %5607 = vpow2.f32 %v3996_v17 }
 0x79e   :  { %5609 = vpow2.f32 %v3997_v60 }
 0x79f   :  { %5611 = vtanh.f32 %v5308_v3 }
 0x7a6   :  { %v5606_v50 = vpop.eup %5605 }
 0x7a7   :  { %v5608_v45 = vpop.eup %5607  ;;  %v3232_v23 = vadd.f32 1.0, %v5606_v50 }
 0x7a8   :  { %v3238_v11 = vadd.f32 1.0, %v5608_v45  ;;  %v5610_v15 = vpop.eup %5609 }
 0x7a9   :  { %5613 = vrcp.f32 %v3232_v23  ;;  %v5612_v28 = vpop.eup %5611  ;;  %v3245_v12 = vadd.f32 1.0, %v5610_v15 }
 0x7aa   :  { %5615 = vrcp.f32 %v3238_v11 }
 0x7ab   :  { %5617 = vrcp.f32 %v3245_v12  ;;  %v3641_v12 = vld [vmem:[#allocation12] sm:$0xff] }
 0x7b3   :  { %v5614_v49 = vpop.eup %5613 }
 0x7b4   :  { %v5616_v30 = vpop.eup %5615  ;;  %v3249_v9 = vmul.f32 %v5614_v49, %v5612_v28  ;;  %v3671_v49 = vld [vmem:[#allocation14 + $0x70] sm:$0xff] }
 0x7b5   :  { %v3248_v38 = vmul.f32 %v5616_v30, %v6861_v62  ;;  %v5618_v62 = vpop.eup %5617  ;;  %v3672_v30 = vld [vmem:[#allocation14 + $0x78] sm:$0xff] }
 0x7b7   :  { %v6953_v40 = vadd.f32 %v3249_v9, %v3248_v38  ;;  %v3153_v25 = vpop.f32.mrb[2].mxu0  ;;  %v3224_v24 = vpop.f32.mrb[34].mxu1  ;;  %v5228_v9 = vpack.c.bf16 %v3672_v30, %v3671_v49  ;;  %v3642_v38 = vld [vmem:[#allocation12 + $0x8] sm:$0xff]  ;;  %v3644_v49 = vld [vmem:[#allocation12 + $0x18] sm:$0xff] }
 0x7b8   :  { %v5314_v37 = vadd.f32 %v3153_v25, %v6386_v19  ;;  %v3155_v27 = vpop.f32.mrb[3].mxu0  ;;  %v3226_v46 = vpop.f32.mrb[35].mxu1  ;;  %v5330_v50 = vadd.f32 %v3224_v24, %v6399_v57  ;;  %v7004_v25 = vpack.c.bf16 %v3642_v38, %v3641_v12  ;;  %v3645_v38 = vld [vmem:[#allocation12 + $0x20] sm:$0xff] }
 0x7b9   :  { %v5315_v47 = vadd.f32 %v3155_v27, %v7200_v6  ;;  %5619 = vtanh.f32 %v6953_v40  ;;  %v5331_v58 = vadd.f32 %v3226_v46, %v6402_v14  ;;  %v7348_v27 = vld [vmem:[#allocation58_spill] sm:$0xff] }
 0x7ba   :  { %v3998_v21 = vmul.f32 -1.442695, %v5314_v37 }
 0x7bb   :  { %v3999_v17 = vmul.f32 -1.442695, %v5315_v47  ;;  %v4000_v3 = vmul.f32 -1.442695, %v5331_v58 }
 0x7bc   :  { %5621 = vpow2.f32 %v3998_v21 }
 0x7bd   :  { %5623 = vpow2.f32 %v3999_v17  ;;  %v7349_v17 = vld [vmem:[#allocation59_spill] sm:$0xff] }
 0x7be   :  { %5625 = vpow2.f32 %v4000_v3 }
 0x7bf   :  { %5627 = vtanh.f32 %v5330_v50 }
 0x7c3   :  { %v5620_v60 = vpop.eup %5619 }
 0x7c4   :  { %v6960_v45 = vmul.f32 %v5620_v60, %v5618_v62 }
 0x7c6   :  { %v5622_v23 = vpop.eup %5621  ;;  %3351 = vmatmul.mubr.f32.vlgmr.msra.gmra.mrb[30].mxu0 %v6960_v45  ;;  %3422 = vmatmul.mubr.f32.vlgmr.msra.gmra.mrb[30].mxu1 %v6960_v45 }
 0x7c7   :  { %v5624_v11 = vpop.eup %5623  ;;  %v3256_v15 = vadd.f32 1.0, %v5622_v23  ;;  %5139 = vmatpush1.bf16.msra.mxu0 %v6094_v53  ;;  %5171 = vmatpush1.bf16.msra.mxu1 %v6262_v26 }
 0x7c8   :  { %v3262_v28 = vadd.f32 1.0, %v5624_v11  ;;  %5141 = vmatprep.subr.bf16.mxu0 %v6097_v61  ;;  %5173 = vmatprep.subr.bf16.mxu1 %v6265_v7  ;;  %v5626_v53 = vpop.eup %5625 }
 0x7c9   :  { %5629 = vrcp.f32 %v3256_v15  ;;  %3496 = vmatprep.mubr.f32.mxu0 %v7156_v13  ;;  %3567 = vmatprep.mubr.f32.mxu1 %v7156_v13  ;;  %v5628_v61 = vpop.eup %5627  ;;  %v3670_v13 = vld [vmem:[#allocation14 + $0x68] sm:$0xff] }
 0x7ca   :  { %5631 = vrcp.f32 %v3262_v28 }
 0x7cb   :  { %5143 = vmatpush1.bf16.msra.mxu0 %v6104_v8  ;;  %5175 = vmatpush1.bf16.msra.mxu1 %v6271_v35  ;;  %v3661_v35 = vld [vmem:[#allocation14 + $0x20] sm:$0xff] }
 0x7cc   :  { %5145 = vmatprep.subr.bf16.mxu0 %v6109_v10  ;;  %5177 = vmatprep.subr.bf16.mxu1 %v6275_v39  ;;  %v3269_v10 = vadd.f32 1.0, %v5626_v53 }
 0x7ce   :  { %5633 = vrcp.f32 %v3269_v10 }
 0x7cf   :  { %5147 = vmatpush1.bf16.msra.mxu0 %v6116_v18  ;;  %5179 = vmatpush1.bf16.msra.mxu1 %v6278_v36 }
 0x7d0   :  { %5149 = vmatprep.subr.bf16.mxu0 %v6120_v22  ;;  %5181 = vmatprep.subr.bf16.mxu1 %v6281_v51  ;;  %v3663_v51 = vld [vmem:[#allocation14 + $0x30] sm:$0xff] }
 0x7d3   :  { %v5630_v26 = vpop.eup %5629  ;;  %5151 = vmatpush1.bf16.msra.mxu0 %v6126_v31  ;;  %5183 = vmatpush1.bf16.msra.mxu1 %v6284_v29  ;;  %v3664_v29 = vld [vmem:[#allocation14 + $0x38] sm:$0xff] }
 0x7d4   :  { %v5632_v8 = vpop.eup %5631  ;;  %v3273_v7 = vmul.f32 %v5630_v26, %v5628_v61  ;;  %5153 = vmatprep.subr.bf16.mxu0 %v6129_v32  ;;  %5185 = vmatprep.subr.bf16.mxu1 %v6287_v33  ;;  %v5212_v33 = vpack.c.bf16 %v3664_v29, %v3663_v51 }
 0x7d5   :  { %v3272_v36 = vmul.f32 %v5632_v8, %v6891_v2 }
 0x7d7   :  { %v6983_v18 = vadd.f32 %v3273_v7, %v3272_v36  ;;  %5155 = vmatpush1.bf16.msra.mxu0 %v6135_v43  ;;  %5187 = vmatpush1.bf16.msra.mxu1 %v6290_v63  ;;  %v3657_v43 = vld [vmem:[#allocation14] sm:$0xff] }
 0x7d8   :  { %5157 = vmatprep.subr.bf16.mxu0 %v6138_v44  ;;  %5189 = vmatprep.subr.bf16.mxu1 %v6293_v5  ;;  %v5634_v22 = vpop.eup %5633  ;;  %v3658_v44 = vld [vmem:[#allocation14 + $0x8] sm:$0xff]  ;;  %v3665_v63 = vld [vmem:[#allocation14 + $0x40] sm:$0xff] }
 0x7d9   :  { %5635 = vtanh.f32 %v6983_v18  ;;  %v3666_v5 = vld [vmem:[#allocation14 + $0x48] sm:$0xff] }
 0x7db   :  { %5159 = vmatpush1.bf16.msra.mxu0 %v6144_v54  ;;  %5191 = vmatpush1.bf16.msra.mxu1 %v6296_v0  ;;  %v5200_v54 = vpack.c.bf16 %v3658_v44, %v3657_v43  ;;  %v5216_v0 = vpack.c.bf16 %v3666_v5, %v3665_v63 }
 0x7dc   :  { %5161 = vmatprep.subr.bf16.mxu0 %v6147_v55  ;;  %5193 = vmatprep.subr.bf16.mxu1 %v6299_v41  ;;  %v3659_v55 = vld [vmem:[#allocation14 + $0x10] sm:$0xff] }
 0x7dd   :  { %v3667_v41 = vld [vmem:[#allocation14 + $0x50] sm:$0xff] }
 0x7df   :  { %5163 = vmatpush1.bf16.msra.mxu0 %v6153_v1  ;;  %5195 = vmatpush1.bf16.msra.mxu1 %v6302_v52  ;;  %v3660_v1 = vld [vmem:[#allocation14 + $0x18] sm:$0xff] }
 0x7e0   :  { %5165 = vmatprep.subr.bf16.mxu0 %v6156_v4  ;;  %5197 = vmatprep.subr.bf16.mxu1 %v6305_v56  ;;  %v5204_v4 = vpack.c.bf16 %v3660_v1, %v3659_v55  ;;  %v3668_v52 = vld [vmem:[#allocation14 + $0x58] sm:$0xff] }
 0x7e1   :  { %v5220_v56 = vpack.c.bf16 %v3668_v52, %v3667_v41 }
 0x7e3   :  { %v5636_v31 = vpop.eup %5635  ;;  %5167 = vmatpush1.bf16.msra.mxu0 %v6162_v16  ;;  %5199 = vmatpush1.bf16.msra.mxu1 %v6308_v20  ;;  %v3662_v16 = vld [vmem:[#allocation14 + $0x28] sm:$0xff]  ;;  %v3669_v20 = vld [vmem:[#allocation14 + $0x60] sm:$0xff] }
 0x7e4   :  { %v7000_v32 = vmul.f32 %v5636_v31, %v5634_v22  ;;  %5201 = vmatprep.subr.bf16.mxu0 %v5200_v54  ;;  %v5208_v39 = vpack.c.bf16 %v3662_v16, %v3661_v35  ;;  %v5224_v2 = vpack.c.bf16 %v3670_v13, %v3669_v20 }
 0x7e6   :  { %3497 = vmatmul.mubr.f32.vlgmr.msra.gmra.mrb[0].mxu0 %v7000_v32  ;;  %3568 = vmatmul.mubr.f32.vlgmr.msra.gmra.mrb[32].mxu1 %v7000_v32 }
 0x7e7   :  { %5203 = vmatpush3.bf16.msra.mxu0 %v5200_v54 }
 0x7e8   :  { %5205 = vmatprep.subr.bf16.mxu0 %v5204_v4 }
 0x7eb   :  { %5207 = vmatpush3.bf16.msra.mxu0 %v5204_v4 }
 0x7ec   :  { %5209 = vmatprep.subr.bf16.mxu0 %v5208_v39 }
 0x7ef   :  { %5211 = vmatpush3.bf16.msra.mxu0 %v5208_v39 }
 0x7f0   :  { %5213 = vmatprep.subr.bf16.mxu0 %v5212_v33 }
 0x7f3   :  { %5215 = vmatpush3.bf16.msra.mxu0 %v5212_v33 }
 0x7f4   :  { %5217 = vmatprep.subr.bf16.mxu0 %v5216_v0 }
 0x7f7   :  { %5219 = vmatpush3.bf16.msra.mxu0 %v5216_v0 }
 0x7f8   :  { %5221 = vmatprep.subr.bf16.mxu0 %v5220_v56 }
 0x7fb   :  { %5223 = vmatpush3.bf16.msra.mxu0 %v5220_v56 }
 0x7fc   :  { %5225 = vmatprep.subr.bf16.mxu0 %v5224_v2 }
 0x7ff   :  { %5227 = vmatpush3.bf16.msra.mxu0 %v5224_v2  ;;  %v3643_v2 = vld [vmem:[#allocation12 + $0x10] sm:$0xff] }
 0x800   :  { %5229 = vmatprep.subr.bf16.mxu0 %v5228_v9  ;;  %v5236_v12 = vpack.c.bf16 %v3644_v49, %v3643_v2 }
 0x803   :  { %5231 = vmatpush3.bf16.msra.mxu0 %v5228_v9 }
 0x804   :  { %5233 = vmatprep.subr.bf16.mxu0 %v7004_v25 }
 0x899   :  { %v3352_v24 = vpop.f32.mrb[30].mxu0  ;;  %v3423_v37 = vpop.f32.mrb[30].mxu1 }
 0x89a   :  { %v3353_v46 = vadd.f32 %v3352_v24, %v7348_v27  ;;  %v3354_v47 = vpop.f32.mrb[31].mxu0  ;;  %v3425_v21 = vpop.f32.mrb[31].mxu1  ;;  %v5310_v23 = vadd.f32 %v3423_v37, %v6373_v42  ;;  %v3646_v24 = vld [vmem:[#allocation12 + $0x28] sm:$0xff]  ;;  %v3647_v37 = vld [vmem:[#allocation12 + $0x30] sm:$0xff]  ;;  %v3648_v27 = vld [vmem:[#allocation12 + $0x38] sm:$0xff] }
 0x89b   :  { %v3355_v58 = vadd.f32 %v3354_v47, %v7349_v17  ;;  %v5311_v3 = vadd.f32 %v3425_v21, %v6376_v59  ;;  %v7351_v47 = vld [vmem:[#allocation50_spill] sm:$0xff]  ;;  %v5244_v21 = vpack.c.bf16 %v3648_v27, %v3647_v37  ;;  %v3649_v17 = vld [vmem:[#allocation12 + $0x40] sm:$0xff] }
 0x89c   :  { %v4001_v62 = vmul.f32 -1.442695, %v3353_v46  ;;  %v7350_v46 = vld [vmem:[#allocation52_spill] sm:$0xff] }
 0x89d   :  { %v4002_v60 = vmul.f32 -1.442695, %v3355_v58  ;;  %v4003_v50 = vmul.f32 -1.442695, %v5311_v3  ;;  %v3650_v58 = vld [vmem:[#allocation12 + $0x48] sm:$0xff]  ;;  %v7354_v3 = vld [vmem:[#allocation62_spill] sm:$0xff] }
 0x89e   :  { %5637 = vpow2.f32 %v4001_v62  ;;  %v7352_v62 = vld [vmem:[#allocation48_spill] sm:$0xff] }
 0x89f   :  { %5639 = vpow2.f32 %v4002_v60  ;;  %v3652_v60 = vld [vmem:[#allocation12 + $0x58] sm:$0xff] }
 0x8a0   :  { %5641 = vpow2.f32 %v4003_v50  ;;  %v7355_v50 = vld [vmem:[#allocation61_spill] sm:$0xff] }
 0x8a1   :  { %5643 = vtanh.f32 %v5310_v23 }
 0x8a8   :  { %v5638_v11 = vpop.eup %5637 }
 0x8a9   :  { %v5640_v15 = vpop.eup %5639  ;;  %v3577_v28 = vadd.f32 1.0, %v5638_v11  ;;  %v3653_v11 = vld [vmem:[#allocation12 + $0x60] sm:$0xff] }
 0x8aa   :  { %v3583_v53 = vadd.f32 1.0, %v5640_v15  ;;  %v5642_v61 = vpop.eup %5641  ;;  %v3654_v15 = vld [vmem:[#allocation12 + $0x68] sm:$0xff] }
 0x8ab   :  { %5645 = vrcp.f32 %v3577_v28  ;;  %v5644_v26 = vpop.eup %5643  ;;  %v3590_v36 = vadd.f32 1.0, %v5642_v61  ;;  %v5256_v28 = vpack.c.bf16 %v3654_v15, %v3653_v11  ;;  %v3656_v61 = vld [vmem:[#allocation12 + $0x78] sm:$0xff] }
 0x8ac   :  { %5647 = vrcp.f32 %v3583_v53  ;;  %v3655_v53 = vld [vmem:[#allocation12 + $0x70] sm:$0xff] }
 0x8ad   :  { %5649 = vrcp.f32 %v3590_v36  ;;  %v7359_v36 = vld [vmem:[#allocation51_spill] sm:$0xff] }
 0x8b5   :  { %v5646_v8 = vpop.eup %5645 }
 0x8b6   :  { %v5648_v7 = vpop.eup %5647  ;;  %v3594_v10 = vmul.f32 %v5646_v8, %v5644_v26  ;;  %v5260_v26 = vpack.c.bf16 %v3656_v61, %v3655_v53  ;;  %v7356_v8 = vld [vmem:[#allocation46_spill] sm:$0xff] }
 0x8b7   :  { %v3593_v22 = vmul.f32 %v5648_v7, %v6953_v40  ;;  %v5650_v16 = vpop.eup %5649  ;;  %v7357_v7 = vld [vmem:[#allocation60_spill] sm:$0xff] }
 0x8b9   :  { %v3498_v59 = vpop.f32.mrb[0].mxu0  ;;  %v3569_v31 = vpop.f32.mrb[32].mxu1  ;;  %v3595_v43 = vadd.f32 %v3594_v10, %v3593_v22  ;;  %v7358_v10 = vld [vmem:[#allocation49_spill] sm:$0xff]  ;;  %v4007_v22 = vld [vmem:[%s7062_s9] ss:$0 sm:$0xff]  ;;  %s5779_s9 = scalar_lea.vmem %s3912_s17, 1024 }
 0x8ba   :  { %v5312_v42 = vadd.f32 %v3498_v59, %v6386_v19  ;;  %v3500_v44 = vpop.f32.mrb[1].mxu0  ;;  %v3571_v54 = vpop.f32.mrb[33].mxu1  ;;  %v5328_v51 = vadd.f32 %v3569_v31, %v6399_v57  ;;  %p5780_p12 = scmp.ne.s32.totalorder %s3912_s17, %s5779_s9  ;;  %p5785_p0 = scmp.lt.s32.totalorder %s5779_s9, %s5779_s9 }
 0x8bb   :  { %v5313_v55 = vadd.f32 %v3500_v44, %v7200_v6  ;;  %5651 = vtanh.f32 %v3595_v43  ;;  %v5329_v35 = vadd.f32 %v3571_v54, %v6402_v14 }
 0x8bc   :  { %v4004_v1 = vmul.f32 -1.442695, %v5312_v42  ;;  %p5786_p1 = por %p5785_p0, %p5784_p13 }
 0x8bd   :  { %v4005_v4 = vmul.f32 -1.442695, %v5313_v55  ;;  %v4006_v40 = vmul.f32 -1.442695, %v5329_v35 }
 0x8be   :  { %5653 = vpow2.f32 %v4004_v1  ;;  %p5787_p2 = pnand %p5786_p1, %p5780_p12 }
 0x8bf   :  { %5655 = vpow2.f32 %v4005_v4 }
 0x8c0   :  { %5657 = vpow2.f32 %v4006_v40 }
 0x8c1   :  { %5659 = vtanh.f32 %v5328_v51 }
 0x8c5   :  { %v5652_v39 = vpop.eup %5651 }
 0x8c6   :  { %v7016_v29 = vmul.f32 %v5652_v39, %v5650_v16 }
 0x8c8   :  { %v5654_v33 = vpop.eup %5653 }
 0x8c9   :  { %v5656_v19 = vpop.eup %5655  ;;  %v3601_v63 = vadd.f32 1.0, %v5654_v33 }
 0x8ca   :  { %v3607_v6 = vadd.f32 1.0, %v5656_v19  ;;  %v5658_v5 = vpop.eup %5657 }
 0x8cb   :  { %5661 = vrcp.f32 %v3601_v63  ;;  %v5660_v0 = vpop.eup %5659  ;;  %v3614_v56 = vadd.f32 1.0, %v5658_v5 }
 0x8cc   :  { %5663 = vrcp.f32 %v3607_v6 }
 0x8cd   :  { %5665 = vrcp.f32 %v3614_v56 }
 0x8d5   :  { %v5662_v41 = vpop.eup %5661 }
 0x8d6   :  { %v5664_v52 = vpop.eup %5663  ;;  %v3618_v14 = vmul.f32 %v5662_v41, %v5660_v0 }
 0x8d7   :  { %v3617_v20 = vmul.f32 %v5664_v52, %v6983_v18  ;;  %v5666_v57 = vpop.eup %5665  ;;  %v5240_v18 = vpack.c.bf16 %v3646_v24, %v3645_v38 }
 0x8d9   :  { %v3619_v13 = vadd.f32 %v3618_v14, %v3617_v20 }
 0x8db   :  { %5667 = vtanh.f32 %v3619_v13 }
 0x8e5   :  { %v5668_v30 = vpop.eup %5667 }
 0x8e6   :  { %v3621_v9 = vmul.f32 %v5668_v30, %v5666_v57 }
 0x8e8   :  { %4088 = vmatprep.mubr.f32.mxu0 %v3621_v9 }
 0x8e9   :  { %4089 = vmatmul.mubr.f32.vlgmr.msra.gmra.mrb[32].mxu0 %v7000_v32  ;;  %v7353_v32 = vld [vmem:[#allocation47_spill] sm:$0xff] }
 0x8ea   :  { %5235 = vmatpush3.bf16.msra.mxu0 %v7004_v25  ;;  %4091 = vmatprep.mubr.f32.mxu0 %v6908_v48  ;;  %v5248_v48 = vpack.c.bf16 %v3650_v58, %v3649_v17  ;;  %v3651_v25 = vld [vmem:[#allocation12 + $0x50] sm:$0xff] }
 0x8eb   :  { %5237 = vmatprep.subr.bf16.mxu0 %v5236_v12  ;;  %v5252_v23 = vpack.c.bf16 %v3652_v60, %v3651_v25 }
 0x8ed   :  { %4092 = vmatmul.mubr.f32.gmra.mrb[34].mxu0 %v7350_v46 }
 0x8ee   :  { %5239 = vmatpush3.bf16.msra.mxu0 %v5236_v12  ;;  %4094 = vmatprep.mubr.f32.mxu0 %v7351_v47 }
 0x8ef   :  { %5241 = vmatprep.subr.bf16.mxu0 %v5240_v18 }
 0x8f1   :  { %4095 = vmatmul.mubr.f32.gmra.mrb[36].mxu0 %v7352_v62 }
 0x8f2   :  { %5243 = vmatpush3.bf16.msra.mxu0 %v5240_v18  ;;  %4097 = vmatprep.mubr.f32.mxu0 %v7353_v32 }
 0x8f3   :  { %5245 = vmatprep.subr.bf16.mxu0 %v5244_v21 }
 0x8f5   :  { %4098 = vmatmul.mubr.f32.gmra.mrb[38].mxu0 %v7354_v3 }
 0x8f6   :  { %5247 = vmatpush3.bf16.msra.mxu0 %v5244_v21  ;;  %4132 = vmatprep.mubr.f32.mxu0 %v7355_v50 }
 0x8f7   :  { %5249 = vmatprep.subr.bf16.mxu0 %v5248_v48 }
 0x8fa   :  { %5251 = vmatpush3.bf16.msra.mxu0 %v5248_v48 }
 0x8fb   :  { %5253 = vmatprep.subr.bf16.mxu0 %v5252_v23 }
 0x8fe   :  { %5255 = vmatpush3.bf16.msra.mxu0 %v5252_v23 }
 0x8ff   :  { %5257 = vmatprep.subr.bf16.mxu0 %v5256_v28 }
 0x902   :  { %5259 = vmatpush3.bf16.msra.mxu0 %v5256_v28 }
 0x903   :  { %5261 = vmatprep.subr.bf16.mxu0 %v5260_v26 }
 0x906   :  { %5263 = vmatpush3.bf16.msra.mxu0 %v5260_v26 }
 0x909   :  { %4133 = vmatmul.mubr.f32.vlgmr.msra.gmra.mrb[32].mxu0 %v7356_v8 }
 0x90a   :  { %4135 = vmatprep.mubr.f32.mxu0 %v7357_v7 }
 0x90d   :  { %4136 = vmatmul.mubr.f32.gmra.mrb[34].mxu0 %v7358_v10 }
 0x90e   :  { %4138 = vmatprep.mubr.f32.mxu0 %v7359_v36 }
 0x911   :  { %4139 = vmatmul.mubr.f32.gmra.mrb[36].mxu0 %v6868_v34 }
 0x912   :  { %4141 = vmatprep.mubr.f32.mxu0 %v6960_v45 }
 0x915   :  { %4142 = vmatmul.mubr.f32.gmra.mrb[38].mxu0 %v7016_v29 }
 0x9dc   :  { %v4134_v59 = vpop.f32.mrb[32].mxu0 }
 0x9dd   :  { %v3891_v31 = vadd.f32 %v4134_v59, %v4007_v22  ;;  %v3844_v43 = vpop.f32.mrb[33].mxu0 }
 0x9de   :  { %v3890_v42 = vadd.f32 %v4007_v22, %v3844_v43 }
 0x9df   :  { %3899 = vst [vmem:[#allocation15 + $0x8] sm:$0xff] %v3891_v31 }
 0x9e0   :  { %3898 = vst [vmem:[#allocation15] sm:$0xff] %v3890_v42  ;;  %v4137_v44 = vpop.f32.mrb[34].mxu0 }
 0x9e1   :  { %v3893_v54 = vadd.f32 %v4137_v44, %v4007_v22  ;;  %v3854_v55 = vpop.f32.mrb[35].mxu0 }
 0x9e2   :  { %v3892_v1 = vadd.f32 %v4007_v22, %v3854_v55 }
 0x9e3   :  { %3901 = vst [vmem:[#allocation15 + $0x18] sm:$0xff] %v3893_v54 }
 0x9e4   :  { %3900 = vst [vmem:[#allocation15 + $0x10] sm:$0xff] %v3892_v1  ;;  %v4140_v34 = vpop.f32.mrb[36].mxu0 }
 0x9e5   :  { %v3895_v45 = vadd.f32 %v4140_v34, %v4007_v22  ;;  %v3864_v4 = vpop.f32.mrb[37].mxu0 }
 0x9e6   :  { %v3894_v35 = vadd.f32 %v4007_v22, %v3864_v4 }
 0x9e7   :  { %3903 = vst [vmem:[#allocation15 + $0x28] sm:$0xff] %v3895_v45 }
 0x9e8   :  { %3902 = vst [vmem:[#allocation15 + $0x20] sm:$0xff] %v3894_v35  ;;  %v4143_v16 = vpop.f32.mrb[38].mxu0 }
 0x9e9   :  { %v3897_v39 = vadd.f32 %v4143_v16, %v4007_v22  ;;  %v3874_v40 = vpop.f32.mrb[39].mxu0 }
 0x9ea   :  { %v3896_v51 = vadd.f32 %v4007_v22, %v3874_v40 }
 0x9eb   :  { %3905 = vst [vmem:[#allocation15 + $0x38] sm:$0xff] %v3897_v39 }
 0x9ec   :  { %3904 = vst [vmem:[#allocation15 + $0x30] sm:$0xff] %v3896_v51 }
 0x9ed   :  { %5790 = shalt.err (!%p5787_p2)
}
 0x9ee   :  { %s5791_s25 = scalar_lea.hbm %s7063_s10, 1024 }
 0x9ef   :  { %p5792_p3 = scmp.ne.s32.totalorder %s7063_s10, %s5791_s25  ;;  %p5795_p4 = scmp.lt.u32.totalorder %s5791_s25, %s7063_s10 }
 0x9f1   :  { %p5797_p5 = pnand %p5795_p4, %p5792_p3 }
 0x9f3   :  { %5800 = shalt.err (!%p5797_p5)
}
 0x9f4   :  { %3917 = dma.vmem_to_hbm [thread:$0]  %s3912_s17, 1024, %s7063_s10, [#allocation8], %s5813_s3, %s5813_s3, %s5814_s14  }
 0x9f5   :  { %5807 = dma.done.wait [#allocation8], 1024  }
 0x9f6   :  { %5808 = vsyncadd [#allocation8], 4294966272 }
 0x9f7   :  { %3921 = vsyncpa [#allocation7], 1 }
 0x9f8   :  { %3922 = vsyncpa [#allocation10], 1 }
 0x9f9   :  { %3923 = vsyncpa [#allocation13], 1 }
 0x9fa   :  { %3924 = vsyncpa [#allocation8], 1 }

</bundles_post_ra>
